<compile_context>
chip_gen: v7x
topology: tpu7x:2x2x1
jax: 0.10.0
libtpu: 0.0.40
codegen_flags: <defaults>
</compile_context>

<pallas_src>
import functools

import jax
import jax.numpy as jnp
import numpy as np
from jax.experimental import pallas as pl
from jax.experimental.pallas import tpu as pltpu

_ACT_DTYPE = jnp.bfloat16
_VMEM_LIMIT = 32 * 1024 * 1024

_GROUPS = ((0, 0), (0, 1), (1, 0), (1, 1))   # slab row-offset groups (di, dj)


def _round_up(x, m):
    return ((x + m - 1) // m) * m


def _pick_tb(n):
    """Images per conv grid step (amortizes ~0.35us/step + per-step DMAs)."""
    return n if n <= 8 else 8


# ---------------- fused conv(2x2,'same') + bias + ReLU + maxpool(2) --------- #

def _conv_block_kernel(x_ref, w_ref, b_ref, o_ref, *, row_stride, ro, cout):
    """One batch block (TB images) per grid step.

    x_ref: (1, Rp, 4*Cin)  phase-interleaved slab, rows ordered (i, n, j) where
           phase (a,b) channels hold padded pixel (2i+a, 2j+b) of image n.
    w_ref: (4, 4*Cin, 4*Cout) tap-merged weights; group g = 2*di+dj selects the
           slab row offset di*row_stride+dj, output columns q*Cout:(q+1)*Cout
           hold the conv result for pooling offset q = 2*dh+dw.
    b_ref: (1, Cout) bias.
    o_ref: (1, Ro, Cout) pooled output, rows ordered (ph, n, pw); the column
           pw == Wh is garbage and is dropped / zeroed by the wrapper glue.
    """
    acc = None
    for g, (di, dj) in enumerate(_GROUPS):
        off = di * row_stride + dj
        a = x_ref[0, off:off + ro, :]                       # (Ro, 4*Cin)
        d = jnp.dot(a, w_ref[g], preferred_element_type=jnp.float32)
        acc = d if acc is None else acc + d                 # (Ro, 4*Cout)
    m = jnp.maximum(jnp.maximum(acc[:, 0:cout], acc[:, cout:2 * cout]),
                    jnp.maximum(acc[:, 2 * cout:3 * cout], acc[:, 3 * cout:]))
    # relu(conv + b) then max  ==  relu(max(conv) + b)   (monotone epilogue)
    o_ref[0, :, :] = jnp.maximum(m + b_ref[...], 0.0).astype(o_ref.dtype)


def _conv_block(slab, wc, b, *, tb, hh, wh1, cout):
    """slab (NB, (hh+2)*tb*wh1, 4*Cin) -> pooled (NB, hh*tb*wh1, Cout) bf16."""
    nb, rp, k4 = slab.shape
    ro = hh * tb * wh1
    return pl.pallas_call(
        functools.partial(_conv_block_kernel, row_stride=tb * wh1, ro=ro,
                          cout=cout),
        grid=(nb,),
        in_specs=[
            pl.BlockSpec((1, rp, k4), lambda n: (n, 0, 0)),
            pl.BlockSpec(wc.shape, lambda n: (0, 0, 0)),
            pl.BlockSpec((1, cout), lambda n: (0, 0)),
        ],
        out_specs=pl.BlockSpec((1, ro, cout), lambda n: (n, 0, 0)),
        out_shape=jax.ShapeDtypeStruct((nb, ro, cout), _ACT_DTYPE),
        compiler_params=pltpu.CompilerParams(
            dimension_semantics=("parallel",),
            vmem_limit_bytes=_VMEM_LIMIT),
    )(slab, wc, b)


# ------------------------- XLA glue: slab construction ---------------------- #

def _first_slab(x_nhwc, tb):
    """(N, H, W, C) NHWC -> batch-interleaved phase slab (NB, (Hh+2)*tb*(Wh+1), 4C)."""
    n, h, w, c = x_nhwc.shape
    nb = n // tb
    # PyTorch 'same' for k=2 pads 0 top/left, 1 bottom/right; extra margin rows/
    # cols are only ever read by garbage output rows/columns.
    xp = jnp.pad(x_nhwc, ((0, 0), (0, 4), (0, 2), (0, 0)))
    phases = [xp[:, a::2, b::2, :] for a in (0, 1) for b in (0, 1)]
    slab = jnp.concatenate(phases, axis=-1)              # (N, Hh+2, Wh+1, 4C)
    hh2, wh1 = h // 2 + 2, w // 2 + 1
    slab = slab.reshape(nb, tb, hh2, wh1, 4 * c).transpose(0, 2, 1, 3, 4)
    return slab.reshape(nb, hh2 * tb * wh1, 4 * c)


def _reslab(y, *, tb, hh, wh, c):
    """Pooled blocks (NB, hh*tb*(wh+1), c), rows (ph, n, pw), -> next layer's
    phase slab (NB, (hh//2+2)*tb*(wh//2+1), 4c).  Drops the garbage column
    pw == wh and applies the next layer's 'same'-conv zero margins."""
    nb = y.shape[0]
    y5 = y.reshape(nb, hh, tb, wh + 1, c)[:, :, :, :wh, :]
    yp = jnp.pad(y5, ((0, 0), (0, 4), (0, 0), (0, 2), (0, 0)))
    phases = [yp[:, a::2, :, b::2, :] for a in (0, 1) for b in (0, 1)]
    slab = jnp.concatenate(phases, axis=-1)    # (NB, hh//2+2, tb, wh//2+1, 4c)
    return slab.reshape(nb, -1, 4 * c)


def _to_features(y3, *, tb, n):
    """conv3 pooled blocks (NB, 4*tb*5, 64) -> fc input (n, 1024), NHWC order."""
    nb = y3.shape[0]
    f = y3.reshape(nb, 4, tb, 5, 64)[:, :, :, :4, :]
    f = f.transpose(0, 2, 1, 3, 4).reshape(nb * tb, 4 * 4 * 64)
    return f[:n]


# --------------------------- fused fc1+ReLU+fc2 ----------------------------- #

def _mlp_kernel(x_ref, w1_ref, b1_ref, w2_ref, b2_ref, o_ref):
    h = jnp.dot(x_ref[...], w1_ref[...], preferred_element_type=jnp.float32)
    h = jnp.maximum(h + b1_ref[...], 0.0)
    y = jnp.dot(h.astype(w2_ref.dtype), w2_ref[...],
                preferred_element_type=jnp.float32)
    o_ref[...] = (y + b2_ref[...]).astype(o_ref.dtype)


def _mlp_head(x, w1, b1, w2, b2):
    n, k = x.shape
    hf = w1.shape[1]
    o = w2.shape[1]
    # >=2 grid blocks whenever the batch allows it (both v7x TensorCores busy),
    # capped at 256 rows per block.
    tm = min(256, _round_up(max((n + 1) // 2, 1), 8))
    n_rows = _round_up(n, tm)
    xp = jnp.pad(x.astype(_ACT_DTYPE), ((0, n_rows - n), (0, 0)))
    out = pl.pallas_call(
        _mlp_kernel,
        grid=(n_rows // tm,),
        in_specs=[
            pl.BlockSpec((tm, k), lambda i: (i, 0)),
            pl.BlockSpec((k, hf), lambda i: (0, 0)),
            pl.BlockSpec((1, hf), lambda i: (0, 0)),
            pl.BlockSpec((hf, o), lambda i: (0, 0)),
            pl.BlockSpec((1, o), lambda i: (0, 0)),
        ],
        out_specs=pl.BlockSpec((tm, o), lambda i: (i, 0)),
        out_shape=jax.ShapeDtypeStruct((n_rows, o), jnp.float32),
        compiler_params=pltpu.CompilerParams(
            dimension_semantics=("parallel",),
            vmem_limit_bytes=_VMEM_LIMIT),
    )(xp, w1, b1, w2, b2)
    return out[:n]


# -------------------------------- parameters -------------------------------- #

def init_params(key):
    """Synthetic parameters in PyTorch-like layout, matching Simple_cnn_v2."""
    def conv_p(k, cout, cin):
        k1, k2 = jax.random.split(k)
        fan = cin * 2 * 2
        w = jax.random.uniform(k1, (cout, cin, 2, 2), jnp.float32, -1.0, 1.0) / jnp.sqrt(fan)
        b = jax.random.uniform(k2, (cout,), jnp.float32, -1.0, 1.0) / jnp.sqrt(fan)
        return w, b

    def lin_p(k, fin, fout):
        k1, k2 = jax.random.split(k)
        w = jax.random.uniform(k1, (fin, fout), jnp.float32, -1.0, 1.0) / jnp.sqrt(fin)
        b = jax.random.uniform(k2, (fout,), jnp.float32, -1.0, 1.0) / jnp.sqrt(fin)
        return w, b

    ks = jax.random.split(key, 5)
    return {
        "conv1": conv_p(ks[0], 16, 3),
        "conv2": conv_p(ks[1], 32, 16),
        "conv3": conv_p(ks[2], 64, 32),
        "fc1": lin_p(ks[3], 1024, 500),
        "fc2": lin_p(ks[4], 500, 10),
    }


def _combine_conv_weight(w):
    """(Cout, Cin, 2, 2) PyTorch conv weight -> (4, 4*Cin, 4*Cout) tap-merged
    group weights.  Group g = 2*di+dj (slab row offset); row block p = 2*a+b is
    the input phase, column block q = 2*dh+dw is the pooling offset; each block
    holds conv tap w[:, :, kh, kw] with kh = 2*di+a-dh, kw = 2*dj+b-dw when that
    tap exists, else zero."""
    cout, cin = w.shape[0], w.shape[1]
    wt = np.transpose(np.asarray(w, np.float32), (2, 3, 1, 0))   # (kh,kw,Cin,Cout)
    wc = np.zeros((4, 4 * cin, 4 * cout), np.float32)
    for di in (0, 1):
        for dj in (0, 1):
            g = 2 * di + dj
            for a in (0, 1):
                for b in (0, 1):
                    p = 2 * a + b
                    for dh in (0, 1):
                        for dw in (0, 1):
                            q = 2 * dh + dw
                            kh = 2 * di + a - dh
                            kw = 2 * dj + b - dw
                            if 0 <= kh <= 1 and 0 <= kw <= 1:
                                wc[g, p * cin:(p + 1) * cin,
                                   q * cout:(q + 1) * cout] = wt[kh, kw]
    return jnp.asarray(wc, _ACT_DTYPE)


def prepare_params(p):
    """One-time layout plumbing, all folded into weights: tap-merged conv
    weights (bf16), fc1 rows permuted NCHW-flatten -> NHWC order and padded
    500 -> 512, biases as (1, C) f32."""
    out = {}
    for name in ("conv1", "conv2", "conv3"):
        w, b = p[name]
        out[name] = (_combine_conv_weight(w),
                     jnp.asarray(b, jnp.float32).reshape(1, -1))
    c, hq, wq = 64, 4, 4
    hh, ww, cc = jnp.meshgrid(jnp.arange(hq), jnp.arange(wq), jnp.arange(c),
                              indexing="ij")
    perm = (cc * (hq * wq) + hh * wq + ww).reshape(-1)               # (1024,)
    w1, b1 = p["fc1"]
    w1 = jnp.pad(w1[perm, :], ((0, 0), (0, 12))).astype(_ACT_DTYPE)  # (1024,512)
    b1 = jnp.pad(b1, (0, 12)).astype(jnp.float32).reshape(1, -1)     # (1,512)
    w2, b2 = p["fc2"]
    w2 = jnp.pad(w2, ((0, 12), (0, 0))).astype(_ACT_DTYPE)           # (512,10)
    b2 = b2.astype(jnp.float32).reshape(1, -1)                       # (1,10)
    out["fc1"] = (w1, b1)
    out["fc2"] = (w2, b2)
    return out


# --------------------------------- forward ---------------------------------- #

@jax.jit
def simple_cnn_v2_forward(params, x_nchw):
    n = x_nchw.shape[0]
    tb = _pick_tb(n)
    n_pad = _round_up(n, tb)
    x = jnp.transpose(x_nchw, (0, 2, 3, 1)).astype(_ACT_DTYPE)       # NHWC bf16
    x = jnp.pad(x, ((0, n_pad - n), (0, 0), (0, 0), (0, 0)))

    slab = _first_slab(x, tb)                                        # (NB, 18*tb*17, 12)
    y = _conv_block(slab, *params["conv1"], tb=tb, hh=16, wh1=17, cout=16)
    slab = _reslab(y, tb=tb, hh=16, wh=16, c=16)                     # (NB, 10*tb*9, 64)
    y = _conv_block(slab, *params["conv2"], tb=tb, hh=8, wh1=9, cout=32)
    slab = _reslab(y, tb=tb, hh=8, wh=8, c=32)                       # (NB, 6*tb*5, 128)
    y = _conv_block(slab, *params["conv3"], tb=tb, hh=4, wh1=5, cout=64)
    # TODO(synk): Dropout(0.3)/Dropout(0.4) are identity in eval mode; not applied.
    feats = _to_features(y, tb=tb, n=n)                              # (N, 1024) bf16
    return _mlp_head(feats, *params["fc1"], *params["fc2"])          # (N, 10) f32


# -------------------------- pure-JAX f32 reference --------------------------- #

def reference_forward(raw, x_nchw):
    hi = jax.lax.Precision.HIGHEST

    def conv_layer(x, w, b):
        y = jax.lax.conv_general_dilated(
            x, w, window_strides=(1, 1), padding=((0, 1), (0, 1)),
            dimension_numbers=("NCHW", "OIHW", "NCHW"), precision=hi)
        y = jnp.maximum(y + b[None, :, None, None], 0.0)
        return jax.lax.reduce_window(y, -jnp.inf, jax.lax.max,
                                     (1, 1, 2, 2), (1, 1, 2, 2), "VALID")

    x = conv_layer(x_nchw, *raw["conv1"])
    x = conv_layer(x, *raw["conv2"])
    x = conv_layer(x, *raw["conv3"])
    x = x.reshape(x.shape[0], -1)                 # NCHW flatten, like torch
    w1, b1 = raw["fc1"]
    w2, b2 = raw["fc2"]
    h = jnp.maximum(jnp.dot(x, w1, precision=hi) + b1, 0.0)
    return jnp.dot(h, w2, precision=hi) + b2


if __name__ == "__main__":
    key = jax.random.PRNGKey(0)
    kx, kp = jax.random.split(key)
    x = jax.random.normal(kx, (2, 3, 32, 32), jnp.float32)   # NCHW like PyTorch
    raw = init_params(kp)
    params = prepare_params(raw)
    out = simple_cnn_v2_forward(params, x)
    out = jax.block_until_ready(out)
    assert out.shape == (2, 10) and out.dtype == jnp.float32
    ref = reference_forward(raw, x)
    err = float(jnp.max(jnp.abs(out - ref)))
    assert err < 0.05, f"max abs error vs f32 reference too large: {err}"
    print("KERNEL_OK")
</pallas_src>

<mosaic_0001>
module attributes {stable_mosaic.version = 11 : i64} {
  func.func @_conv_block_kernel(%arg0: i32, %arg1: memref<1x612x12xbf16, #tpu.memory_space<vmem>>, %arg2: memref<4x12x64xbf16, #tpu.memory_space<vmem>>, %arg3: memref<1x16xf32, #tpu.memory_space<vmem>>, %arg4: memref<1x544x16xbf16, #tpu.memory_space<vmem>>) attributes {dimension_semantics = [#tpu.dimension_semantics<parallel>], iteration_bounds = array<i64: 1>, scalar_prefetch = 0 : i64, scratch_operands = 0 : i64, tpu.core_type = #tpu.core_type<tc>, window_params = [{transform_indices = @transform_0, window_bounds = array<i64: 1, 612, 12>}, {pipeline_mode = #tpu.pipeline_mode<synchronous>, transform_indices = @transform_1, window_bounds = array<i64: 4, 12, 64>}, {pipeline_mode = #tpu.pipeline_mode<synchronous>, transform_indices = @transform_2, window_bounds = array<i64: 1, 16>}, {transform_indices = @transform_3, window_bounds = array<i64: 1, 544, 16>}]} {
    %c0 = arith.constant 0 : index
    %c0_0 = arith.constant 0 : index
    %c0_1 = arith.constant 0 : index
    %0 = vector.load %arg1[%c0, %c0_0, %c0_1] : memref<1x612x12xbf16, #tpu.memory_space<vmem>>, vector<1x544x12xbf16>
    %1 = vector.shape_cast %0 : vector<1x544x12xbf16> to vector<544x12xbf16>
    %c0_2 = arith.constant 0 : index
    %c0_3 = arith.constant 0 : index
    %c0_4 = arith.constant 0 : index
    %2 = vector.load %arg2[%c0_2, %c0_3, %c0_4] : memref<4x12x64xbf16, #tpu.memory_space<vmem>>, vector<1x12x64xbf16>
    %3 = vector.shape_cast %2 : vector<1x12x64xbf16> to vector<12x64xbf16>
    %cst = arith.constant dense<0.000000e+00> : vector<544x64xf32>
    %4 = tpu.matmul %1, %3, %cst {dimension_numbers = #tpu.dot_dimension_numbers<[1], [0], [0], [1], [0, 0, 1, 1], [], []>} : vector<544x12xbf16>, vector<12x64xbf16>, vector<544x64xf32> -> vector<544x64xf32>
    %c0_5 = arith.constant 0 : index
    %c1 = arith.constant 1 : index
    %c0_6 = arith.constant 0 : index
    %5 = vector.load %arg1[%c0_5, %c1, %c0_6] : memref<1x612x12xbf16, #tpu.memory_space<vmem>>, vector<1x544x12xbf16>
    %6 = vector.shape_cast %5 : vector<1x544x12xbf16> to vector<544x12xbf16>
    %c1_7 = arith.constant 1 : index
    %c0_8 = arith.constant 0 : index
    %c0_9 = arith.constant 0 : index
    %7 = vector.load %arg2[%c1_7, %c0_8, %c0_9] : memref<4x12x64xbf16, #tpu.memory_space<vmem>>, vector<1x12x64xbf16>
    %8 = vector.shape_cast %7 : vector<1x12x64xbf16> to vector<12x64xbf16>
    %cst_10 = arith.constant dense<0.000000e+00> : vector<544x64xf32>
    %9 = tpu.matmul %6, %8, %cst_10 {dimension_numbers = #tpu.dot_dimension_numbers<[1], [0], [0], [1], [0, 0, 1, 1], [], []>} : vector<544x12xbf16>, vector<12x64xbf16>, vector<544x64xf32> -> vector<544x64xf32>
    %10 = arith.addf %4, %9 : vector<544x64xf32>
    %c0_11 = arith.constant 0 : index
    %c34 = arith.constant 34 : index
    %c0_12 = arith.constant 0 : index
    %11 = vector.load %arg1[%c0_11, %c34, %c0_12] : memref<1x612x12xbf16, #tpu.memory_space<vmem>>, vector<1x544x12xbf16>
    %12 = vector.shape_cast %11 : vector<1x544x12xbf16> to vector<544x12xbf16>
    %c2 = arith.constant 2 : index
    %c0_13 = arith.constant 0 : index
    %c0_14 = arith.constant 0 : index
    %13 = vector.load %arg2[%c2, %c0_13, %c0_14] : memref<4x12x64xbf16, #tpu.memory_space<vmem>>, vector<1x12x64xbf16>
    %14 = vector.shape_cast %13 : vector<1x12x64xbf16> to vector<12x64xbf16>
    %cst_15 = arith.constant dense<0.000000e+00> : vector<544x64xf32>
    %15 = tpu.matmul %12, %14, %cst_15 {dimension_numbers = #tpu.dot_dimension_numbers<[1], [0], [0], [1], [0, 0, 1, 1], [], []>} : vector<544x12xbf16>, vector<12x64xbf16>, vector<544x64xf32> -> vector<544x64xf32>
    %16 = arith.addf %10, %15 : vector<544x64xf32>
    %c0_16 = arith.constant 0 : index
    %c35 = arith.constant 35 : index
    %c0_17 = arith.constant 0 : index
    %17 = vector.load %arg1[%c0_16, %c35, %c0_17] : memref<1x612x12xbf16, #tpu.memory_space<vmem>>, vector<1x544x12xbf16>
    %18 = vector.shape_cast %17 : vector<1x544x12xbf16> to vector<544x12xbf16>
    %c3 = arith.constant 3 : index
    %c0_18 = arith.constant 0 : index
    %c0_19 = arith.constant 0 : index
    %19 = vector.load %arg2[%c3, %c0_18, %c0_19] : memref<4x12x64xbf16, #tpu.memory_space<vmem>>, vector<1x12x64xbf16>
    %20 = vector.shape_cast %19 : vector<1x12x64xbf16> to vector<12x64xbf16>
    %cst_20 = arith.constant dense<0.000000e+00> : vector<544x64xf32>
    %21 = tpu.matmul %18, %20, %cst_20 {dimension_numbers = #tpu.dot_dimension_numbers<[1], [0], [0], [1], [0, 0, 1, 1], [], []>} : vector<544x12xbf16>, vector<12x64xbf16>, vector<544x64xf32> -> vector<544x64xf32>
    %22 = arith.addf %16, %21 : vector<544x64xf32>
    %23 = vector.extract_strided_slice %22 {offsets = [0, 0], sizes = [544, 16], strides = [1, 1]} : vector<544x64xf32> to vector<544x16xf32>
    %24 = vector.extract_strided_slice %22 {offsets = [0, 16], sizes = [544, 16], strides = [1, 1]} : vector<544x64xf32> to vector<544x16xf32>
    %25 = arith.maximumf %23, %24 : vector<544x16xf32>
    %26 = vector.extract_strided_slice %22 {offsets = [0, 32], sizes = [544, 16], strides = [1, 1]} : vector<544x64xf32> to vector<544x16xf32>
    %27 = vector.extract_strided_slice %22 {offsets = [0, 48], sizes = [544, 16], strides = [1, 1]} : vector<544x64xf32> to vector<544x16xf32>
    %28 = arith.maximumf %26, %27 : vector<544x16xf32>
    %29 = arith.maximumf %25, %28 : vector<544x16xf32>
    %c0_21 = arith.constant 0 : index
    %c0_22 = arith.constant 0 : index
    %30 = vector.load %arg3[%c0_21, %c0_22] : memref<1x16xf32, #tpu.memory_space<vmem>>, vector<1x16xf32>
    %31 = vector.broadcast %30 : vector<1x16xf32> to vector<544x16xf32>
    %32 = arith.addf %29, %31 : vector<544x16xf32>
    %cst_23 = arith.constant 0.000000e+00 : f32
    %33 = vector.broadcast %cst_23 : f32 to vector<544x16xf32>
    %34 = arith.maximumf %32, %33 : vector<544x16xf32>
    %35 = arith.truncf %34 : vector<544x16xf32> to vector<544x16xbf16>
    %c0_24 = arith.constant 0 : index
    %c0_25 = arith.constant 0 : index
    %c0_26 = arith.constant 0 : index
    %36 = vector.load %arg4[%c0_24, %c0_25, %c0_26] : memref<1x544x16xbf16, #tpu.memory_space<vmem>>, vector<1x544x16xbf16>
    %37 = vector.shape_cast %36 : vector<1x544x16xbf16> to vector<544x16xbf16>
    %38 = vector.shape_cast %35 : vector<544x16xbf16> to vector<1x544x16xbf16>
    tpu.vector_store %arg4[%c0_24, %c0_25, %c0_26], %38 {strides = array<i32>} : memref<1x544x16xbf16, #tpu.memory_space<vmem>>, vector<1x544x16xbf16>,
    return
  }
  func.func @transform_0(%arg0: i32) -> (i32, i32, i32) {
    %c0_i32 = arith.constant 0 : i32
    %c0_i32_0 = arith.constant 0 : i32
    %c0_i32_1 = arith.constant 0 : i32
    return %arg0, %c0_i32, %c0_i32_0 : i32, i32, i32
  }
  func.func @transform_1(%arg0: i32) -> (i32, i32, i32) {
    %c0_i32 = arith.constant 0 : i32
    %c0_i32_0 = arith.constant 0 : i32
    %c0_i32_1 = arith.constant 0 : i32
    %c0_i32_2 = arith.constant 0 : i32
    return %c0_i32, %c0_i32_0, %c0_i32_1 : i32, i32, i32
  }
  func.func @transform_2(%arg0: i32) -> (i32, i32) {
    %c0_i32 = arith.constant 0 : i32
    %c0_i32_0 = arith.constant 0 : i32
    %c0_i32_1 = arith.constant 0 : i32
    return %c0_i32, %c0_i32_0 : i32, i32
  }
  func.func @transform_3(%arg0: i32) -> (i32, i32, i32) {
    %c0_i32 = arith.constant 0 : i32
    %c0_i32_0 = arith.constant 0 : i32
    %c0_i32_1 = arith.constant 0 : i32
    return %arg0, %c0_i32, %c0_i32_0 : i32, i32, i32
  }
}

module attributes {stable_mosaic.version = 11 : i64} {
  func.func @_conv_block_kernel(%arg0: i32, %arg1: memref<1x180x64xbf16, #tpu.memory_space<vmem>>, %arg2: memref<4x64x128xbf16, #tpu.memory_space<vmem>>, %arg3: memref<1x32xf32, #tpu.memory_space<vmem>>, %arg4: memref<1x144x32xbf16, #tpu.memory_space<vmem>>) attributes {dimension_semantics = [#tpu.dimension_semantics<parallel>], iteration_bounds = array<i64: 1>, scalar_prefetch = 0 : i64, scratch_operands = 0 : i64, tpu.core_type = #tpu.core_type<tc>, window_params = [{transform_indices = @transform_0, window_bounds = array<i64: 1, 180, 64>}, {pipeline_mode = #tpu.pipeline_mode<synchronous>, transform_indices = @transform_1, window_bounds = array<i64: 4, 64, 128>}, {pipeline_mode = #tpu.pipeline_mode<synchronous>, transform_indices = @transform_2, window_bounds = array<i64: 1, 32>}, {transform_indices = @transform_3, window_bounds = array<i64: 1, 144, 32>}]} {
    %c0 = arith.constant 0 : index
    %c0_0 = arith.constant 0 : index
    %c0_1 = arith.constant 0 : index
    %0 = vector.load %arg1[%c0, %c0_0, %c0_1] : memref<1x180x64xbf16, #tpu.memory_space<vmem>>, vector<1x144x64xbf16>
    %1 = vector.shape_cast %0 : vector<1x144x64xbf16> to vector<144x64xbf16>
    %c0_2 = arith.constant 0 : index
    %c0_3 = arith.constant 0 : index
    %c0_4 = arith.constant 0 : index
    %2 = vector.load %arg2[%c0_2, %c0_3, %c0_4] : memref<4x64x128xbf16, #tpu.memory_space<vmem>>, vector<1x64x128xbf16>
    %3 = vector.shape_cast %2 : vector<1x64x128xbf16> to vector<64x128xbf16>
    %cst = arith.constant dense<0.000000e+00> : vector<144x128xf32>
    %4 = tpu.matmul %1, %3, %cst {dimension_numbers = #tpu.dot_dimension_numbers<[1], [0], [0], [1], [0, 0, 1, 1], [], []>} : vector<144x64xbf16>, vector<64x128xbf16>, vector<144x128xf32> -> vector<144x128xf32>
    %c0_5 = arith.constant 0 : index
    %c1 = arith.constant 1 : index
    %c0_6 = arith.constant 0 : index
    %5 = vector.load %arg1[%c0_5, %c1, %c0_6] : memref<1x180x64xbf16, #tpu.memory_space<vmem>>, vector<1x144x64xbf16>
    %6 = vector.shape_cast %5 : vector<1x144x64xbf16> to vector<144x64xbf16>
    %c1_7 = arith.constant 1 : index
    %c0_8 = arith.constant 0 : index
    %c0_9 = arith.constant 0 : index
    %7 = vector.load %arg2[%c1_7, %c0_8, %c0_9] : memref<4x64x128xbf16, #tpu.memory_space<vmem>>, vector<1x64x128xbf16>
    %8 = vector.shape_cast %7 : vector<1x64x128xbf16> to vector<64x128xbf16>
    %cst_10 = arith.constant dense<0.000000e+00> : vector<144x128xf32>
    %9 = tpu.matmul %6, %8, %cst_10 {dimension_numbers = #tpu.dot_dimension_numbers<[1], [0], [0], [1], [0, 0, 1, 1], [], []>} : vector<144x64xbf16>, vector<64x128xbf16>, vector<144x128xf32> -> vector<144x128xf32>
    %10 = arith.addf %4, %9 : vector<144x128xf32>
    %c0_11 = arith.constant 0 : index
    %c18 = arith.constant 18 : index
    %c0_12 = arith.constant 0 : index
    %11 = vector.load %arg1[%c0_11, %c18, %c0_12] : memref<1x180x64xbf16, #tpu.memory_space<vmem>>, vector<1x144x64xbf16>
    %12 = vector.shape_cast %11 : vector<1x144x64xbf16> to vector<144x64xbf16>
    %c2 = arith.constant 2 : index
    %c0_13 = arith.constant 0 : index
    %c0_14 = arith.constant 0 : index
    %13 = vector.load %arg2[%c2, %c0_13, %c0_14] : memref<4x64x128xbf16, #tpu.memory_space<vmem>>, vector<1x64x128xbf16>
    %14 = vector.shape_cast %13 : vector<1x64x128xbf16> to vector<64x128xbf16>
    %cst_15 = arith.constant dense<0.000000e+00> : vector<144x128xf32>
    %15 = tpu.matmul %12, %14, %cst_15 {dimension_numbers = #tpu.dot_dimension_numbers<[1], [0], [0], [1], [0, 0, 1, 1], [], []>} : vector<144x64xbf16>, vector<64x128xbf16>, vector<144x128xf32> -> vector<144x128xf32>
    %16 = arith.addf %10, %15 : vector<144x128xf32>
    %c0_16 = arith.constant 0 : index
    %c19 = arith.constant 19 : index
    %c0_17 = arith.constant 0 : index
    %17 = vector.load %arg1[%c0_16, %c19, %c0_17] : memref<1x180x64xbf16, #tpu.memory_space<vmem>>, vector<1x144x64xbf16>
    %18 = vector.shape_cast %17 : vector<1x144x64xbf16> to vector<144x64xbf16>
    %c3 = arith.constant 3 : index
    %c0_18 = arith.constant 0 : index
    %c0_19 = arith.constant 0 : index
    %19 = vector.load %arg2[%c3, %c0_18, %c0_19] : memref<4x64x128xbf16, #tpu.memory_space<vmem>>, vector<1x64x128xbf16>
    %20 = vector.shape_cast %19 : vector<1x64x128xbf16> to vector<64x128xbf16>
    %cst_20 = arith.constant dense<0.000000e+00> : vector<144x128xf32>
    %21 = tpu.matmul %18, %20, %cst_20 {dimension_numbers = #tpu.dot_dimension_numbers<[1], [0], [0], [1], [0, 0, 1, 1], [], []>} : vector<144x64xbf16>, vector<64x128xbf16>, vector<144x128xf32> -> vector<144x128xf32>
    %22 = arith.addf %16, %21 : vector<144x128xf32>
    %23 = vector.extract_strided_slice %22 {offsets = [0, 0], sizes = [144, 32], strides = [1, 1]} : vector<144x128xf32> to vector<144x32xf32>
    %24 = vector.extract_strided_slice %22 {offsets = [0, 32], sizes = [144, 32], strides = [1, 1]} : vector<144x128xf32> to vector<144x32xf32>
    %25 = arith.maximumf %23, %24 : vector<144x32xf32>
    %26 = vector.extract_strided_slice %22 {offsets = [0, 64], sizes = [144, 32], strides = [1, 1]} : vector<144x128xf32> to vector<144x32xf32>
    %27 = vector.extract_strided_slice %22 {offsets = [0, 96], sizes = [144, 32], strides = [1, 1]} : vector<144x128xf32> to vector<144x32xf32>
    %28 = arith.maximumf %26, %27 : vector<144x32xf32>
    %29 = arith.maximumf %25, %28 : vector<144x32xf32>
    %c0_21 = arith.constant 0 : index
    %c0_22 = arith.constant 0 : index
    %30 = vector.load %arg3[%c0_21, %c0_22] : memref<1x32xf32, #tpu.memory_space<vmem>>, vector<1x32xf32>
    %31 = vector.broadcast %30 : vector<1x32xf32> to vector<144x32xf32>
    %32 = arith.addf %29, %31 : vector<144x32xf32>
    %cst_23 = arith.constant 0.000000e+00 : f32
    %33 = vector.broadcast %cst_23 : f32 to vector<144x32xf32>
    %34 = arith.maximumf %32, %33 : vector<144x32xf32>
    %35 = arith.truncf %34 : vector<144x32xf32> to vector<144x32xbf16>
    %c0_24 = arith.constant 0 : index
    %c0_25 = arith.constant 0 : index
    %c0_26 = arith.constant 0 : index
    %36 = vector.load %arg4[%c0_24, %c0_25, %c0_26] : memref<1x144x32xbf16, #tpu.memory_space<vmem>>, vector<1x144x32xbf16>
    %37 = vector.shape_cast %36 : vector<1x144x32xbf16> to vector<144x32xbf16>
    %38 = vector.shape_cast %35 : vector<144x32xbf16> to vector<1x144x32xbf16>
    tpu.vector_store %arg4[%c0_24, %c0_25, %c0_26], %38 {strides = array<i32>} : memref<1x144x32xbf16, #tpu.memory_space<vmem>>, vector<1x144x32xbf16>,
    return
  }
  func.func @transform_0(%arg0: i32) -> (i32, i32, i32) {
    %c0_i32 = arith.constant 0 : i32
    %c0_i32_0 = arith.constant 0 : i32
    %c0_i32_1 = arith.constant 0 : i32
    return %arg0, %c0_i32, %c0_i32_0 : i32, i32, i32
  }
  func.func @transform_1(%arg0: i32) -> (i32, i32, i32) {
    %c0_i32 = arith.constant 0 : i32
    %c0_i32_0 = arith.constant 0 : i32
    %c0_i32_1 = arith.constant 0 : i32
    %c0_i32_2 = arith.constant 0 : i32
    return %c0_i32, %c0_i32_0, %c0_i32_1 : i32, i32, i32
  }
  func.func @transform_2(%arg0: i32) -> (i32, i32) {
    %c0_i32 = arith.constant 0 : i32
    %c0_i32_0 = arith.constant 0 : i32
    %c0_i32_1 = arith.constant 0 : i32
    return %c0_i32, %c0_i32_0 : i32, i32
  }
  func.func @transform_3(%arg0: i32) -> (i32, i32, i32) {
    %c0_i32 = arith.constant 0 : i32
    %c0_i32_0 = arith.constant 0 : i32
    %c0_i32_1 = arith.constant 0 : i32
    return %arg0, %c0_i32, %c0_i32_0 : i32, i32, i32
  }
}

module attributes {stable_mosaic.version = 11 : i64} {
  func.func @_conv_block_kernel(%arg0: i32, %arg1: memref<1x60x128xbf16, #tpu.memory_space<vmem>>, %arg2: memref<4x128x256xbf16, #tpu.memory_space<vmem>>, %arg3: memref<1x64xf32, #tpu.memory_space<vmem>>, %arg4: memref<1x40x64xbf16, #tpu.memory_space<vmem>>) attributes {dimension_semantics = [#tpu.dimension_semantics<parallel>], iteration_bounds = array<i64: 1>, scalar_prefetch = 0 : i64, scratch_operands = 0 : i64, tpu.core_type = #tpu.core_type<tc>, window_params = [{transform_indices = @transform_0, window_bounds = array<i64: 1, 60, 128>}, {pipeline_mode = #tpu.pipeline_mode<synchronous>, transform_indices = @transform_1, window_bounds = array<i64: 4, 128, 256>}, {pipeline_mode = #tpu.pipeline_mode<synchronous>, transform_indices = @transform_2, window_bounds = array<i64: 1, 64>}, {transform_indices = @transform_3, window_bounds = array<i64: 1, 40, 64>}]} {
    %c0 = arith.constant 0 : index
    %c0_0 = arith.constant 0 : index
    %c0_1 = arith.constant 0 : index
    %0 = vector.load %arg1[%c0, %c0_0, %c0_1] : memref<1x60x128xbf16, #tpu.memory_space<vmem>>, vector<1x40x128xbf16>
    %1 = vector.shape_cast %0 : vector<1x40x128xbf16> to vector<40x128xbf16>
    %c0_2 = arith.constant 0 : index
    %c0_3 = arith.constant 0 : index
    %c0_4 = arith.constant 0 : index
    %2 = vector.load %arg2[%c0_2, %c0_3, %c0_4] : memref<4x128x256xbf16, #tpu.memory_space<vmem>>, vector<1x128x256xbf16>
    %3 = vector.shape_cast %2 : vector<1x128x256xbf16> to vector<128x256xbf16>
    %cst = arith.constant dense<0.000000e+00> : vector<40x256xf32>
    %4 = tpu.matmul %1, %3, %cst {dimension_numbers = #tpu.dot_dimension_numbers<[1], [0], [0], [1], [0, 0, 1, 1], [], []>} : vector<40x128xbf16>, vector<128x256xbf16>, vector<40x256xf32> -> vector<40x256xf32>
    %c0_5 = arith.constant 0 : index
    %c1 = arith.constant 1 : index
    %c0_6 = arith.constant 0 : index
    %5 = vector.load %arg1[%c0_5, %c1, %c0_6] : memref<1x60x128xbf16, #tpu.memory_space<vmem>>, vector<1x40x128xbf16>
    %6 = vector.shape_cast %5 : vector<1x40x128xbf16> to vector<40x128xbf16>
    %c1_7 = arith.constant 1 : index
    %c0_8 = arith.constant 0 : index
    %c0_9 = arith.constant 0 : index
    %7 = vector.load %arg2[%c1_7, %c0_8, %c0_9] : memref<4x128x256xbf16, #tpu.memory_space<vmem>>, vector<1x128x256xbf16>
    %8 = vector.shape_cast %7 : vector<1x128x256xbf16> to vector<128x256xbf16>
    %cst_10 = arith.constant dense<0.000000e+00> : vector<40x256xf32>
    %9 = tpu.matmul %6, %8, %cst_10 {dimension_numbers = #tpu.dot_dimension_numbers<[1], [0], [0], [1], [0, 0, 1, 1], [], []>} : vector<40x128xbf16>, vector<128x256xbf16>, vector<40x256xf32> -> vector<40x256xf32>
    %10 = arith.addf %4, %9 : vector<40x256xf32>
    %c0_11 = arith.constant 0 : index
    %c10 = arith.constant 10 : index
    %c0_12 = arith.constant 0 : index
    %11 = vector.load %arg1[%c0_11, %c10, %c0_12] : memref<1x60x128xbf16, #tpu.memory_space<vmem>>, vector<1x40x128xbf16>
    %12 = vector.shape_cast %11 : vector<1x40x128xbf16> to vector<40x128xbf16>
    %c2 = arith.constant 2 : index
    %c0_13 = arith.constant 0 : index
    %c0_14 = arith.constant 0 : index
    %13 = vector.load %arg2[%c2, %c0_13, %c0_14] : memref<4x128x256xbf16, #tpu.memory_space<vmem>>, vector<1x128x256xbf16>
    %14 = vector.shape_cast %13 : vector<1x128x256xbf16> to vector<128x256xbf16>
    %cst_15 = arith.constant dense<0.000000e+00> : vector<40x256xf32>
    %15 = tpu.matmul %12, %14, %cst_15 {dimension_numbers = #tpu.dot_dimension_numbers<[1], [0], [0], [1], [0, 0, 1, 1], [], []>} : vector<40x128xbf16>, vector<128x256xbf16>, vector<40x256xf32> -> vector<40x256xf32>
    %16 = arith.addf %10, %15 : vector<40x256xf32>
    %c0_16 = arith.constant 0 : index
    %c11 = arith.constant 11 : index
    %c0_17 = arith.constant 0 : index
    %17 = vector.load %arg1[%c0_16, %c11, %c0_17] : memref<1x60x128xbf16, #tpu.memory_space<vmem>>, vector<1x40x128xbf16>
    %18 = vector.shape_cast %17 : vector<1x40x128xbf16> to vector<40x128xbf16>
    %c3 = arith.constant 3 : index
    %c0_18 = arith.constant 0 : index
    %c0_19 = arith.constant 0 : index
    %19 = vector.load %arg2[%c3, %c0_18, %c0_19] : memref<4x128x256xbf16, #tpu.memory_space<vmem>>, vector<1x128x256xbf16>
    %20 = vector.shape_cast %19 : vector<1x128x256xbf16> to vector<128x256xbf16>
    %cst_20 = arith.constant dense<0.000000e+00> : vector<40x256xf32>
    %21 = tpu.matmul %18, %20, %cst_20 {dimension_numbers = #tpu.dot_dimension_numbers<[1], [0], [0], [1], [0, 0, 1, 1], [], []>} : vector<40x128xbf16>, vector<128x256xbf16>, vector<40x256xf32> -> vector<40x256xf32>
    %22 = arith.addf %16, %21 : vector<40x256xf32>
    %23 = vector.extract_strided_slice %22 {offsets = [0, 0], sizes = [40, 64], strides = [1, 1]} : vector<40x256xf32> to vector<40x64xf32>
    %24 = vector.extract_strided_slice %22 {offsets = [0, 64], sizes = [40, 64], strides = [1, 1]} : vector<40x256xf32> to vector<40x64xf32>
    %25 = arith.maximumf %23, %24 : vector<40x64xf32>
    %26 = vector.extract_strided_slice %22 {offsets = [0, 128], sizes = [40, 64], strides = [1, 1]} : vector<40x256xf32> to vector<40x64xf32>
    %27 = vector.extract_strided_slice %22 {offsets = [0, 192], sizes = [40, 64], strides = [1, 1]} : vector<40x256xf32> to vector<40x64xf32>
    %28 = arith.maximumf %26, %27 : vector<40x64xf32>
    %29 = arith.maximumf %25, %28 : vector<40x64xf32>
    %c0_21 = arith.constant 0 : index
    %c0_22 = arith.constant 0 : index
    %30 = vector.load %arg3[%c0_21, %c0_22] : memref<1x64xf32, #tpu.memory_space<vmem>>, vector<1x64xf32>
    %31 = vector.broadcast %30 : vector<1x64xf32> to vector<40x64xf32>
    %32 = arith.addf %29, %31 : vector<40x64xf32>
    %cst_23 = arith.constant 0.000000e+00 : f32
    %33 = vector.broadcast %cst_23 : f32 to vector<40x64xf32>
    %34 = arith.maximumf %32, %33 : vector<40x64xf32>
    %35 = arith.truncf %34 : vector<40x64xf32> to vector<40x64xbf16>
    %c0_24 = arith.constant 0 : index
    %c0_25 = arith.constant 0 : index
    %c0_26 = arith.constant 0 : index
    %36 = vector.load %arg4[%c0_24, %c0_25, %c0_26] : memref<1x40x64xbf16, #tpu.memory_space<vmem>>, vector<1x40x64xbf16>
    %37 = vector.shape_cast %36 : vector<1x40x64xbf16> to vector<40x64xbf16>
    %38 = vector.shape_cast %35 : vector<40x64xbf16> to vector<1x40x64xbf16>
    tpu.vector_store %arg4[%c0_24, %c0_25, %c0_26], %38 {strides = array<i32>} : memref<1x40x64xbf16, #tpu.memory_space<vmem>>, vector<1x40x64xbf16>,
    return
  }
  func.func @transform_0(%arg0: i32) -> (i32, i32, i32) {
    %c0_i32 = arith.constant 0 : i32
    %c0_i32_0 = arith.constant 0 : i32
    %c0_i32_1 = arith.constant 0 : i32
    return %arg0, %c0_i32, %c0_i32_0 : i32, i32, i32
  }
  func.func @transform_1(%arg0: i32) -> (i32, i32, i32) {
    %c0_i32 = arith.constant 0 : i32
    %c0_i32_0 = arith.constant 0 : i32
    %c0_i32_1 = arith.constant 0 : i32
    %c0_i32_2 = arith.constant 0 : i32
    return %c0_i32, %c0_i32_0, %c0_i32_1 : i32, i32, i32
  }
  func.func @transform_2(%arg0: i32) -> (i32, i32) {
    %c0_i32 = arith.constant 0 : i32
    %c0_i32_0 = arith.constant 0 : i32
    %c0_i32_1 = arith.constant 0 : i32
    return %c0_i32, %c0_i32_0 : i32, i32
  }
  func.func @transform_3(%arg0: i32) -> (i32, i32, i32) {
    %c0_i32 = arith.constant 0 : i32
    %c0_i32_0 = arith.constant 0 : i32
    %c0_i32_1 = arith.constant 0 : i32
    return %arg0, %c0_i32, %c0_i32_0 : i32, i32, i32
  }
}

module attributes {stable_mosaic.version = 11 : i64} {
  func.func @_mlp_kernel(%arg0: i32, %arg1: memref<8x1024xbf16, #tpu.memory_space<vmem>>, %arg2: memref<1024x512xbf16, #tpu.memory_space<vmem>>, %arg3: memref<1x512xf32, #tpu.memory_space<vmem>>, %arg4: memref<512x10xbf16, #tpu.memory_space<vmem>>, %arg5: memref<1x10xf32, #tpu.memory_space<vmem>>, %arg6: memref<8x10xf32, #tpu.memory_space<vmem>>) attributes {dimension_semantics = [#tpu.dimension_semantics<parallel>], iteration_bounds = array<i64: 1>, scalar_prefetch = 0 : i64, scratch_operands = 0 : i64, tpu.core_type = #tpu.core_type<tc>, window_params = [{transform_indices = @transform_0, window_bounds = array<i64: 8, 1024>}, {pipeline_mode = #tpu.pipeline_mode<synchronous>, transform_indices = @transform_1, window_bounds = array<i64: 1024, 512>}, {pipeline_mode = #tpu.pipeline_mode<synchronous>, transform_indices = @transform_2, window_bounds = array<i64: 1, 512>}, {pipeline_mode = #tpu.pipeline_mode<synchronous>, transform_indices = @transform_3, window_bounds = array<i64: 512, 10>}, {pipeline_mode = #tpu.pipeline_mode<synchronous>, transform_indices = @transform_4, window_bounds = array<i64: 1, 10>}, {transform_indices = @transform_5, window_bounds = array<i64: 8, 10>}]} {
    %c0 = arith.constant 0 : index
    %c0_0 = arith.constant 0 : index
    %0 = vector.load %arg1[%c0, %c0_0] : memref<8x1024xbf16, #tpu.memory_space<vmem>>, vector<8x1024xbf16>
    %c0_1 = arith.constant 0 : index
    %c0_2 = arith.constant 0 : index
    %1 = vector.load %arg2[%c0_1, %c0_2] : memref<1024x512xbf16, #tpu.memory_space<vmem>>, vector<1024x512xbf16>
    %cst = arith.constant dense<0.000000e+00> : vector<8x512xf32>
    %2 = tpu.matmul %0, %1, %cst {dimension_numbers = #tpu.dot_dimension_numbers<[1], [0], [0], [1], [0, 0, 1, 1], [], []>} : vector<8x1024xbf16>, vector<1024x512xbf16>, vector<8x512xf32> -> vector<8x512xf32>
    %c0_3 = arith.constant 0 : index
    %c0_4 = arith.constant 0 : index
    %3 = vector.load %arg3[%c0_3, %c0_4] : memref<1x512xf32, #tpu.memory_space<vmem>>, vector<1x512xf32>
    %4 = vector.broadcast %3 : vector<1x512xf32> to vector<8x512xf32>
    %5 = arith.addf %2, %4 : vector<8x512xf32>
    %cst_5 = arith.constant 0.000000e+00 : f32
    %6 = vector.broadcast %cst_5 : f32 to vector<8x512xf32>
    %7 = arith.maximumf %5, %6 : vector<8x512xf32>
    %8 = arith.truncf %7 : vector<8x512xf32> to vector<8x512xbf16>
    %c0_6 = arith.constant 0 : index
    %c0_7 = arith.constant 0 : index
    %9 = vector.load %arg4[%c0_6, %c0_7] : memref<512x10xbf16, #tpu.memory_space<vmem>>, vector<512x10xbf16>
    %cst_8 = arith.constant dense<0.000000e+00> : vector<8x10xf32>
    %10 = tpu.matmul %8, %9, %cst_8 {dimension_numbers = #tpu.dot_dimension_numbers<[1], [0], [0], [1], [0, 0, 1, 1], [], []>} : vector<8x512xbf16>, vector<512x10xbf16>, vector<8x10xf32> -> vector<8x10xf32>
    %c0_9 = arith.constant 0 : index
    %c0_10 = arith.constant 0 : index
    %11 = vector.load %arg5[%c0_9, %c0_10] : memref<1x10xf32, #tpu.memory_space<vmem>>, vector<1x10xf32>
    %12 = vector.broadcast %11 : vector<1x10xf32> to vector<8x10xf32>
    %13 = arith.addf %10, %12 : vector<8x10xf32>
    %c0_11 = arith.constant 0 : index
    %c0_12 = arith.constant 0 : index
    %14 = vector.load %arg6[%c0_11, %c0_12] : memref<8x10xf32, #tpu.memory_space<vmem>>, vector<8x10xf32>
    tpu.vector_store %arg6[%c0_11, %c0_12], %13 {strides = array<i32>} : memref<8x10xf32, #tpu.memory_space<vmem>>, vector<8x10xf32>,
    return
  }
  func.func @transform_0(%arg0: i32) -> (i32, i32) {
    %c0_i32 = arith.constant 0 : i32
    %c0_i32_0 = arith.constant 0 : i32
    return %arg0, %c0_i32 : i32, i32
  }
  func.func @transform_1(%arg0: i32) -> (i32, i32) {
    %c0_i32 = arith.constant 0 : i32
    %c0_i32_0 = arith.constant 0 : i32
    %c0_i32_1 = arith.constant 0 : i32
    return %c0_i32, %c0_i32_0 : i32, i32
  }
  func.func @transform_2(%arg0: i32) -> (i32, i32) {
    %c0_i32 = arith.constant 0 : i32
    %c0_i32_0 = arith.constant 0 : i32
    %c0_i32_1 = arith.constant 0 : i32
    return %c0_i32, %c0_i32_0 : i32, i32
  }
  func.func @transform_3(%arg0: i32) -> (i32, i32) {
    %c0_i32 = arith.constant 0 : i32
    %c0_i32_0 = arith.constant 0 : i32
    %c0_i32_1 = arith.constant 0 : i32
    return %c0_i32, %c0_i32_0 : i32, i32
  }
  func.func @transform_4(%arg0: i32) -> (i32, i32) {
    %c0_i32 = arith.constant 0 : i32
    %c0_i32_0 = arith.constant 0 : i32
    %c0_i32_1 = arith.constant 0 : i32
    return %c0_i32, %c0_i32_0 : i32, i32
  }
  func.func @transform_5(%arg0: i32) -> (i32, i32) {
    %c0_i32 = arith.constant 0 : i32
    %c0_i32_0 = arith.constant 0 : i32
    return %arg0, %c0_i32 : i32, i32
  }
}

</mosaic_0001>

<bundles_post_ra>
// kernel: simple_cnn_v2_forward.4
= control target key start
LH: loop header
LB: loop body
LE: loop exit
PB: predicated region body
PF: predicated region fallthrough
CT: control target
= control target key end

     0   :  { %vm647_vm0 = vcmask 1045504   ;;  %vm544_vm1 = vcmask 97280   ;;  %vm1582_vm2 = vcmask 1046528   ;;  %vm262_vm3 = vsmask.f32 7424  ;;  %s5195_s20 = smov 96   ;;  %s7105_s1 = inlined_call_operand.vmem [shape: bf16[4,12,64], index: 1, kind: input, shape index: {}]   ;;  %s7106_s0 = inlined_call_operand.vmem [shape: bf16[1,612,12], index: 0, kind: input, shape index: {}]   ;;  %s7107_s2 = inlined_call_operand.vmem [shape: f32[1,16], index: 2, kind: input, shape index: {}]   ;;  %s7108_s3 = inlined_call_operand.vmem [shape: bf16[1,544,16], index: 3, kind: output, shape index: {}]  }
   0x1   :  { %v5092_v0 = vld [vmem:[%s7105_s1 + $0x10] sm:$0x3f]   ;;  %v5093_v1 = vld [vmem:[%s7105_s1 + $0x8] sm:$0x3f]   ;;  %v5227_v3 = vld [vmem:[%s7106_s0 + $0x18] sm:$0xff]   ;;  %vm4035_vm5 = vcmask 125952  }
   0x2   :  { %5088 = vmatprep.subr.msk.bf16.mxu0 %vm647_vm0, %v5092_v0  ;;  %v1760_v2 = vsel %vm647_vm0, %v5092_v0, 0  ;;  %5086 = vmatprep.subr.msk.bf16.mxu1 %vm647_vm0, %v5093_v1  ;;  %v5233_v4 = vld [vmem:[%s7106_s0 + $0x10] sm:$0xfe]   ;;  %v1584_v5 = vrot.slane %v5227_v3, 1  ;;  %v649_v6 = vsel %vm647_vm0, %v5093_v1, 0  ;;  %v5241_v8 = vld [vmem:[%s7106_s0 + $0x20] sm:$0xff]  }
   0x3   :  { %4743 = vmatpush3.bf16.msra.mxu0 %v1760_v2  ;;  %v1583_v7 = vrot.slane %v5233_v4, 1  ;;  %4603 = vmatpush3.bf16.msra.mxu1 %v649_v6  ;;  %v5097_v9 = vld [vmem:[%s7106_s0] sm:$0xff]   ;;  %v1586_v11 = vrot.slane %v5241_v8, 1  ;;  %v5098_v12 = vld [vmem:[%s7106_s0 + $0x8] sm:$0xff]   ;;  %v5100_v19 = vld [vmem:[%s7105_s1 + $0x18] sm:$0x3f]  }
   0x4   :  { %v264_v13 = vshrl.u32 %v5097_v9, 16  ;;  %v266_v14 = vshll.u32 %v5097_v9, 16  ;;  %v5099_v15 = vld [vmem:[%s7105_s1] sm:$0x3f]   ;;  %v271_v17 = vshll.u32 %v5098_v12, 16  ;;  %v275_v18 = vshrl.u32 %v5098_v12, 16  ;;  %5089 = vmatprep.subr.msk.bf16.mxu0 %vm647_vm0, %v5100_v19 }
   0x5   :  { %v1585_v10 = vsel %vm1582_vm2, %v1583_v7, %v1584_v5  ;;  %v1587_v16 = vsel %vm1582_vm2, %v1584_v5, %v1586_v11  ;;  %5087 = vmatprep.subr.msk.bf16.mxu1 %vm647_vm0, %v5099_v15  ;;  %v5101_v21 = vld [vmem:[%s7106_s0 + $0x10] sm:$0xff]   ;;  %v1030_v23 = vsel %vm647_vm0, %v5099_v15, 0  ;;  %v2565_v24 = vsel %vm647_vm0, %v5100_v19, 0  ;;  %v5270_v25 = vld [vmem:[%s7106_s0 + $0x28] sm:$0xff]   ;;  %v5104_v31 = vld [vmem:[%s7106_s0 + $0x18] sm:$0xff]  }
   0x6   :  { %4744 = vmatprep.mubr.msk.bf16.mxu0 %vm544_vm1, %v1585_v10  ;;  %v268_v20 = vrot.slane %v266_v14, 1  ;;  %v273_v22 = vrot.slane %v271_v17, 1  ;;  %v279_v27 = vshll.u32 %v5101_v21, 16  ;;  %v5103_v28 = vld [vmem:[%s7106_s0 + $0x30] sm:$0xff]   ;;  %v1588_v30 = vrot.slane %v5270_v25, 1  ;;  %v5105_v36 = vld [vmem:[%s7106_s0 + $0x20] sm:$0xff]  }
   0x7   :  { %4745 = vmatmul.mubr.msk.bf16.vlgmr.msra.gmra.mrb[0].mxu0 %vm544_vm1, %v1587_v16  ;;  %v1590_v34 = vrot.slane %v5103_v28, 1  ;;  %v283_v35 = vshrl.u32 %v5101_v21, 16  ;;  %v287_v38 = vshll.u32 %v5104_v31, 16  ;;  %v291_v39 = vshrl.u32 %v5104_v31, 16  ;;  %v5106_v44 = vld [vmem:[%s7106_s0 + $0x38] sm:$0xff]   ;;  %v5107_v46 = vld [vmem:[%s7106_s0 + $0x40] sm:$0xff]  }
   0x8   :  { %v269_v26 = vor.u32 %v268_v20, %v264_v13  ;;  %4813 = vmatpush3.bf16.msra.mxu0 %v2565_v24  ;;  %v277_v29 = vor.u32 %v275_v18, %v273_v22  ;;  %v281_v33 = vrot.slane %v279_v27, 1  ;;  %v1589_v37 = vsel %vm1582_vm2, %v1586_v11, %v1588_v30  ;;  %v5108_v52 = vld [vmem:[%s7106_s0 + $0x28] sm:$0xff]   ;;  %v5109_v54 = vld [vmem:[%s7106_s0 + $0x30] sm:$0xff]   ;;  %v5112_v62 = vld [vmem:[%s7106_s0 + $0x38] sm:$0xff]  }
   0x9   :  { %4748 = vmatprep.mubr.msk.bf16.mxu0 %vm544_vm1, %v1589_v37  ;;  %v1591_v41 = vsel %vm1582_vm2, %v1588_v30, %v1590_v34  ;;  %v295_v43 = vshll.u32 %v5105_v36, 16  ;;  %v289_v45 = vrot.slane %v287_v38, 1  ;;  %v1592_v48 = vrot.slane %v5106_v44, 1  ;;  %v5110_v58 = vld [vmem:[%s7106_s0 + $0x48] sm:$0xff]   ;;  %v5111_v2 = vld [vmem:[%s7106_s0 + $0x50] sm:$0xff]   ;;  %v5113_v7 = vld [vmem:[%s7106_s0 + $0x40] sm:$0xff]  }
   0xa   :  { %v274_v32 = vsel %vm262_vm3, %v269_v26, %v273_v22  ;;  %v282_v40 = vsel %vm262_vm3, %v277_v29, %v281_v33  ;;  %v285_v42 = vor.u32 %v283_v35, %v281_v33  ;;  %v1594_v51 = vrot.slane %v5107_v46, 1  ;;  %v5114_v12 = vld [vmem:[%s7106_s0 + $0x58] sm:$0xff]   ;;  %v5116_v19 = vld [vmem:[%s7106_s0 + $0x48] sm:$0xff]   ;;  %v5115_v22 = vld [vmem:[%s7106_s0 + $0x60] sm:$0xff]  }
   0xb   :  { %4604 = vmatprep.mubr.msk.bf16.mxu1 %vm544_vm1, %v274_v32  ;;  %v297_v47 = vrot.slane %v295_v43, 1  ;;  %v293_v50 = vor.u32 %v291_v39, %v289_v45  ;;  %v299_v53 = vshrl.u32 %v5105_v36, 16  ;;  %v1593_v55 = vsel %vm1582_vm2, %v1590_v34, %v1592_v48  ;;  %v5118_v29 = vld [vmem:[%s7106_s0 + $0x68] sm:$0xff]   ;;  %v5117_v31 = vld [vmem:[%s7106_s0 + $0x50] sm:$0xff]   ;;  %v5120_v36 = vld [vmem:[%s7106_s0 + $0x58] sm:$0xff]  }
   0xc   :  { %4605 = vmatmul.mubr.msk.bf16.vlgmr.msra.gmra.mrb[0].mxu1 %vm544_vm1, %v282_v40  ;;  %v290_v49 = vsel %vm262_vm3, %v285_v42, %v289_v45  ;;  %v303_v57 = vshll.u32 %v5108_v52, 16  ;;  %v307_v60 = vshrl.u32 %v5108_v52, 16  ;;  %v311_v61 = vshll.u32 %v5109_v54, 16  ;;  %v5122_v46 = vld [vmem:[%s7106_s0 + $0x78] sm:$0xff]  }
   0xd   :  { %4673 = vmatpush3.bf16.msra.mxu1 %v1030_v23  ;;  %4608 = vmatprep.mubr.msk.bf16.mxu1 %vm544_vm1, %v290_v49  ;;  %v301_v56 = vor.u32 %v299_v53, %v297_v47  ;;  %v298_v59 = vsel %vm262_vm3, %v293_v50, %v297_v47  ;;  %v1595_v63 = vsel %vm1582_vm2, %v1592_v48, %v1594_v51  ;;  %v1596_v1 = vrot.slane %v5110_v58, 1  ;;  %v5121_v49 = vld [vmem:[%s7106_s0 + $0x60] sm:$0xff]  }
   0xe   :  { %v305_v0 = vrot.slane %v303_v57, 1  ;;  %v315_v5 = vshrl.u32 %v5109_v54, 16  ;;  %v319_v6 = vshll.u32 %v5112_v62, 16  ;;  %v313_v10 = vrot.slane %v311_v61, 1  ;;  %v5124_v54 = vld [vmem:[%s7106_s0 + $0x68] sm:$0xff]  }
   0xf   :  { %4749 = vmatmul.mubr.msk.bf16.gmra.mrb[4].mxu0 %vm544_vm1, %v1591_v41  ;;  %v1597_v11 = vsel %vm1582_vm2, %v1594_v51, %v1596_v1  ;;  %v1598_v14 = vrot.slane %v5111_v2, 1  ;;  %v327_v17 = vshll.u32 %v5113_v7, 16  ;;  %v1600_v18 = vrot.slane %v5114_v12, 1  ;;  %v5119_v41 = vld [vmem:[%s7106_s0 + $0x70] sm:$0xff]  }
  0x10   :  { %4752 = vmatprep.mubr.msk.bf16.mxu0 %vm544_vm1, %v1593_v55  ;;  %v306_v9 = vsel %vm262_vm3, %v301_v56, %v305_v0  ;;  %v309_v13 = vor.u32 %v307_v60, %v305_v0  ;;  %v317_v15 = vor.u32 %v315_v5, %v313_v10  ;;  %v321_v16 = vrot.slane %v319_v6, 1  ;;  %v5125_v5 = vld [vmem:[%s7106_s0 + $0x70] sm:$0xff]  }
  0x11   :  { %v323_v21 = vshrl.u32 %v5112_v62, 16  ;;  %v1599_v23 = vsel %vm1582_vm2, %v1596_v1, %v1598_v14  ;;  %v331_v26 = vshrl.u32 %v5113_v7, 16  ;;  %v335_v27 = vshll.u32 %v5116_v19, 16  ;;  %v5384_v1 = vld [vmem:[%s7106_s0 + $0x88] sm:$0xff]  }
  0x12   :  { %v314_v20 = vsel %vm262_vm3, %v309_v13, %v313_v10  ;;  %v322_v24 = vsel %vm262_vm3, %v317_v15, %v321_v16  ;;  %v1601_v28 = vsel %vm1582_vm2, %v1598_v14, %v1600_v18  ;;  %v329_v30 = vrot.slane %v327_v17, 1 }
  0x13   :  { %v325_v32 = vor.u32 %v323_v21, %v321_v16  ;;  %v1602_v33 = vrot.slane %v5115_v22, 1  ;;  %v337_v35 = vrot.slane %v335_v27, 1  ;;  %v1604_v37 = vrot.slane %v5118_v29, 1  ;;  %v5402_v16 = vld [vmem:[%s7106_s0 + $0x90] sm:$0xff]   ;;  %v5410_v22 = vld [vmem:[%s7106_s0 + $0x98] sm:$0xff]   ;;  %v5423_v27 = vld [vmem:[%s7106_s0 + $0x88] sm:$0xff]  }
  0x14   :  { %4609 = vmatmul.mubr.msk.bf16.gmra.mrb[4].mxu1 %vm544_vm1, %v298_v59  ;;  %v333_v34 = vor.u32 %v331_v26, %v329_v30  ;;  %v343_v38 = vshll.u32 %v5117_v31, 16  ;;  %v339_v40 = vshrl.u32 %v5116_v19, 16  ;;  %v347_v44 = vshrl.u32 %v5117_v31, 16  ;;  %v5376_v59 = vld [vmem:[%s7106_s0 + $0x80] sm:$0xff]  }
  0x15   :  { %4612 = vmatprep.mubr.msk.bf16.mxu1 %vm544_vm1, %v306_v9  ;;  %v330_v39 = vsel %vm262_vm3, %v325_v32, %v329_v30  ;;  %v1603_v42 = vsel %vm1582_vm2, %v1600_v18, %v1602_v33  ;;  %v351_v45 = vshll.u32 %v5120_v36, 16  ;;  %v1605_v47 = vsel %vm1582_vm2, %v1602_v33, %v1604_v37  ;;  %v5432_v33 = vld [vmem:[%s7106_s0 + $0xa0] sm:$0xff]  }
  0x16   :  { %v338_v43 = vsel %vm262_vm3, %v333_v34, %v337_v35  ;;  %v345_v48 = vrot.slane %v343_v38, 1  ;;  %v341_v50 = vor.u32 %v339_v40, %v337_v35  ;;  %v1606_v51 = vrot.slane %v5119_v41, 1  ;;  %v5443_v41 = vld [vmem:[%s7106_s0 + $0xa8] sm:$0xff]  }
  0x17   :  { %4753 = vmatmul.mubr.msk.bf16.gmra.mrb[8].mxu0 %vm544_vm1, %v1595_v63  ;;  %v353_v53 = vrot.slane %v351_v45, 1  ;;  %v1608_v55 = vrot.slane %v5122_v46, 1  ;;  %v359_v56 = vshll.u32 %v5121_v49, 16  ;;  %v355_v58 = vshrl.u32 %v5120_v36, 16 }
  0x18   :  { %4756 = vmatprep.mubr.msk.bf16.mxu0 %vm544_vm1, %v1597_v11  ;;  %v349_v52 = vor.u32 %v347_v44, %v345_v48  ;;  %v346_v57 = vsel %vm262_vm3, %v341_v50, %v345_v48  ;;  %v1607_v60 = vsel %vm1582_vm2, %v1604_v37, %v1606_v51  ;;  %v363_v62 = vshrl.u32 %v5121_v49, 16  ;;  %v5128_v11 = vld [vmem:[%s7106_s0 + $0x78] sm:$0xff]   ;;  %v5450_v44 = vld [vmem:[%s7106_s0 + $0x90] sm:$0xff]  }
  0x19   :  { %v367_v63 = vshll.u32 %v5124_v54, 16  ;;  %v1609_v0 = vsel %vm1582_vm2, %v1606_v51, %v1608_v55  ;;  %v361_v2 = vrot.slane %v359_v56, 1  ;;  %v357_v6 = vor.u32 %v355_v58, %v353_v53 }
  0x1a   :  { %v354_v61 = vsel %vm262_vm3, %v349_v52, %v353_v53  ;;  %v1610_v7 = vrot.slane %v5376_v59, 1  ;;  %v1612_v12 = vrot.slane %v5384_v1, 1  ;;  %v375_v13 = vshll.u32 %v5125_v5, 16  ;;  %v5467_v53 = vld [vmem:[%s7106_s0 + $0xb0] sm:$0xff]  }
  0x1b   :  { %v365_v9 = vor.u32 %v363_v62, %v361_v2  ;;  %v369_v10 = vrot.slane %v367_v63, 1  ;;  %v362_v14 = vsel %vm262_vm3, %v357_v6, %v361_v2  ;;  %v371_v15 = vshrl.u32 %v5124_v54, 16  ;;  %v5483_v62 = vld [vmem:[%s7106_s0 + $0xa0] sm:$0xff]   ;;  %v5492_v6 = vld [vmem:[%s7106_s0 + $0xa8] sm:$0xff]  }
  0x1c   :  { %4613 = vmatmul.mubr.msk.bf16.gmra.mrb[8].mxu1 %vm544_vm1, %v314_v20  ;;  %v1611_v17 = vsel %vm1582_vm2, %v1608_v55, %v1610_v7  ;;  %v379_v19 = vshrl.u32 %v5125_v5, 16  ;;  %v383_v20 = vshll.u32 %v5128_v11, 16  ;;  %v1613_v21 = vsel %vm1582_vm2, %v1610_v7, %v1612_v12 }
  0x1d   :  { %4616 = vmatprep.mubr.msk.bf16.mxu1 %vm544_vm1, %v322_v24  ;;  %v370_v18 = vsel %vm262_vm3, %v365_v9, %v369_v10  ;;  %v5416_v24 = vld [vmem:[%s7106_s0 + $0x80] sm:$0xff]   ;;  %v373_v26 = vor.u32 %v371_v15, %v369_v10  ;;  %v1616_v31 = vrot.slane %v5410_v22, 1  ;;  %v387_v35 = vshrl.u32 %v5128_v11, 16 }
  0x1e   :  { %v385_v30 = vrot.slane %v383_v20, 1  ;;  %v391_v32 = vshll.u32 %v5416_v24, 16  ;;  %v399_v36 = vshll.u32 %v5423_v27, 16  ;;  %v1620_v49 = vrot.slane %v5443_v41, 1 }
  0x1f   :  { %4757 = vmatmul.mubr.msk.bf16.gmra.mrb[12].mxu0 %vm544_vm1, %v1599_v23  ;;  %v377_v23 = vrot.slane %v375_v13, 1  ;;  %v407_v50 = vshll.u32 %v5450_v44, 16  ;;  %v403_v52 = vshrl.u32 %v5423_v27, 16  ;;  %v411_v56 = vshrl.u32 %v5450_v44, 16 }
  0x20   :  { %4760 = vmatprep.mubr.msk.bf16.mxu0 %vm544_vm1, %v1601_v28  ;;  %v1614_v28 = vrot.slane %v5402_v16, 1  ;;  %v389_v45 = vor.u32 %v387_v35, %v385_v30  ;;  %v401_v46 = vrot.slane %v399_v36, 1  ;;  %v423_v9 = vshll.u32 %v5483_v62, 16 }
  0x21   :  { %v381_v29 = vor.u32 %v379_v19, %v377_v23  ;;  %v378_v34 = vsel %vm262_vm3, %v373_v26, %v377_v23  ;;  %v427_v15 = vshrl.u32 %v5483_v62, 16  ;;  %v5511_v19 = vld [vmem:[%s7106_s0 + $0xc8] sm:$0xff]   ;;  %v435_v35 = vshrl.u32 %v5492_v6, 16 }
  0x22   :  { %v1615_v37 = vsel %vm1582_vm2, %v1612_v12, %v1614_v28  ;;  %v1617_v40 = vsel %vm1582_vm2, %v1614_v28, %v1616_v31  ;;  %v405_v63 = vor.u32 %v403_v52, %v401_v46  ;;  %v5501_v12 = vld [vmem:[%s7106_s0 + $0xc0] sm:$0xff]   ;;  %v425_v20 = vrot.slane %v423_v9, 1  ;;  %v5588_v9 = vld [vmem:[%s7106_s0 + $0xe8] sm:$0xff]  }
  0x23   :  { %v386_v38 = vsel %vm262_vm3, %v381_v29, %v385_v30  ;;  %v1626_v26 = vrot.slane %v5501_v12, 1  ;;  %v5526_v30 = vld [vmem:[%s7106_s0 + $0xb8] sm:$0xff]   ;;  %vm2142_vm4 = vsmask.f32 6400 }
  0x24   :  { %4617 = vmatmul.mubr.msk.bf16.gmra.mrb[12].mxu1 %vm544_vm1, %v330_v39  ;;  %v395_v39 = vshrl.u32 %v5416_v24, 16  ;;  %v429_v28 = vor.u32 %v427_v15, %v425_v20 }
  0x25   :  { %4620 = vmatprep.mubr.msk.bf16.mxu1 %vm544_vm1, %v338_v43  ;;  %v1618_v43 = vrot.slane %v5432_v33, 1 }
  0x27   :  { %4761 = vmatmul.mubr.msk.bf16.gmra.mrb[16].mxu0 %vm544_vm1, %v1603_v42  ;;  %v393_v42 = vrot.slane %v391_v32, 1  ;;  %v1619_v54 = vsel %vm1582_vm2, %v1616_v31, %v1618_v43  ;;  %v1621_v58 = vsel %vm1582_vm2, %v1618_v43, %v1620_v49  ;;  %v1628_v31 = vrot.slane %v5511_v19, 1  ;;  %v5545_v43 = vld [vmem:[%s7106_s0 + $0xc0] sm:$0xff]  }
  0x28   :  { %4764 = vmatprep.mubr.msk.bf16.mxu0 %vm544_vm1, %v1605_v47  ;;  %v5457_v47 = vld [vmem:[%s7106_s0 + $0x98] sm:$0xff]   ;;  %7151 = vst [vmem:[#allocation2_spill] sm:$0xff] %v5545_v43 }
  0x29   :  { %v397_v48 = vor.u32 %v395_v39, %v393_v42  ;;  %v394_v51 = vsel %vm262_vm3, %v389_v45, %v393_v42  ;;  %v419_v11 = vshrl.u32 %v5457_v47, 16  ;;  %v1629_v42 = vsel %vm1582_vm2, %v1626_v26, %v1628_v31  ;;  %v5550_v45 = vld [vmem:[%s7106_s0 + $0xd8] sm:$0xff]  }
  0x2b   :  { %v402_v55 = vsel %vm262_vm3, %v397_v48, %v401_v46  ;;  %v5556_v48 = vld [vmem:[%s7106_s0 + $0xc8] sm:$0xff]  }
  0x2c   :  { %4621 = vmatmul.mubr.msk.bf16.gmra.mrb[16].mxu1 %vm544_vm1, %v346_v57  ;;  %v415_v57 = vshll.u32 %v5457_v47, 16  ;;  %7152 = vst [vmem:[#allocation3_spill] sm:$0xff] %v5556_v48 }
  0x2d   :  { %4624 = vmatprep.mubr.msk.bf16.mxu1 %vm544_vm1, %v354_v61  ;;  %v409_v61 = vrot.slane %v407_v50, 1 }
  0x2e   :  { %v417_v5 = vrot.slane %v415_v57, 1  ;;  %v451_v57 = vshrl.u32 %v5526_v30, 16 }
  0x2f   :  { %4765 = vmatmul.mubr.msk.bf16.gmra.mrb[20].mxu0 %vm544_vm1, %v1607_v60  ;;  %v5477_v60 = vld [vmem:[%s7106_s0 + $0xb8] sm:$0xff]   ;;  %v413_v2 = vor.u32 %v411_v56, %v409_v61  ;;  %v410_v10 = vsel %vm262_vm3, %v405_v63, %v409_v61  ;;  %v5567_v56 = vld [vmem:[%s7106_s0 + $0xe0] sm:$0xff]   ;;  %v5574_v61 = vld [vmem:[%s7106_s0 + $0xd0] sm:$0xff]  }
  0x30   :  { %4768 = vmatprep.mubr.msk.bf16.mxu0 %vm544_vm1, %v1609_v0  ;;  %v1622_v0 = vrot.slane %v5467_v53, 1  ;;  %v1624_v7 = vrot.slane %v5477_v60, 1  ;;  %v421_v23 = vor.u32 %v419_v11, %v417_v5  ;;  %7153 = vst [vmem:[#allocation4_spill] sm:$0xff] %v5574_v61 }
  0x32   :  { %v1623_v13 = vsel %vm1582_vm2, %v1620_v49, %v1622_v0  ;;  %v1627_v36 = vsel %vm1582_vm2, %v1624_v7, %v1626_v26  ;;  %v5610_v26 = vld [vmem:[%s7106_s0 + $0xf0] sm:$0xff]  }
  0x34   :  { %4625 = vmatmul.mubr.msk.bf16.gmra.mrb[20].mxu1 %vm544_vm1, %v362_v14  ;;  %v418_v14 = vsel %vm262_vm3, %v413_v2, %v417_v5 }
  0x35   :  { %4628 = vmatprep.mubr.msk.bf16.mxu1 %vm544_vm1, %v370_v18  ;;  %v1625_v18 = vsel %vm1582_vm2, %v1622_v0, %v1624_v7  ;;  %v5580_v0 = vld [vmem:[%s7106_s0 + $0xd8] sm:$0xff]   ;;  %v459_v7 = vshrl.u32 %v5545_v43, 16 }
  0x36   :  { %7154 = vst [vmem:[#allocation5_spill] sm:$0xff] %v5580_v0 }
  0x37   :  { %4769 = vmatmul.mubr.msk.bf16.gmra.mrb[24].mxu0 %vm544_vm1, %v1611_v17  ;;  %v431_v17 = vshll.u32 %v5492_v6, 16 }
  0x38   :  { %4772 = vmatprep.mubr.msk.bf16.mxu0 %vm544_vm1, %v1613_v21  ;;  %v5517_v21 = vld [vmem:[%s7106_s0 + $0xb0] sm:$0xff]  }
  0x39   :  { %v433_v29 = vrot.slane %v431_v17, 1  ;;  %v439_v32 = vshll.u32 %v5517_v21, 16  ;;  %v443_v39 = vshrl.u32 %v5517_v21, 16 }
  0x3b   :  { %v441_v46 = vrot.slane %v439_v32, 1  ;;  %v437_v49 = vor.u32 %v435_v35, %v433_v29  ;;  %v1636_v32 = vrot.slane %v5588_v9, 1 }
  0x3c   :  { %4629 = vmatmul.mubr.msk.bf16.gmra.mrb[24].mxu1 %vm544_vm1, %v378_v34  ;;  %v426_v34 = vsel %vm262_vm3, %v421_v23, %v425_v20  ;;  %v471_v20 = vshll.u32 %v5574_v61, 16  ;;  %v5603_v23 = vld [vmem:[%s7106_s0 + $0xe0] sm:$0xff]  }
  0x3d   :  { %4632 = vmatprep.mubr.msk.bf16.mxu1 %vm544_vm1, %v386_v38  ;;  %v5537_v38 = vld [vmem:[%s7106_s0 + $0xd0] sm:$0xff]   ;;  %v442_v63 = vsel %vm262_vm3, %v437_v49, %v441_v46  ;;  %7156 = vst [vmem:[#allocation7_spill] sm:$0xff] %v5603_v23  ;;  %v487_v49 = vshll.u32 %v5603_v23, 16 }
  0x3e   :  { %v1630_v50 = vrot.slane %v5537_v38, 1 }
  0x3f   :  { %4773 = vmatmul.mubr.msk.bf16.gmra.mrb[28].mxu0 %vm544_vm1, %v1615_v37  ;;  %v434_v37 = vsel %vm262_vm3, %v429_v28, %v433_v29  ;;  %v479_v28 = vshll.u32 %v5580_v0, 16  ;;  %v5616_v29 = vld [vmem:[%s7106_s0 + $0xf8] sm:$0xff]  }
  0x40   :  { %4776 = vmatprep.mubr.msk.bf16.mxu0 %vm544_vm1, %v1617_v40  ;;  %v447_v40 = vshll.u32 %v5526_v30, 16  ;;  %v1631_v2 = vsel %vm1582_vm2, %v1628_v31, %v1630_v50 }
  0x42   :  { %v449_v52 = vrot.slane %v447_v40, 1 }
  0x44   :  { %4633 = vmatmul.mubr.msk.bf16.gmra.mrb[28].mxu1 %vm544_vm1, %v394_v51  ;;  %v445_v51 = vor.u32 %v443_v39, %v441_v46  ;;  %v453_v15 = vor.u32 %v451_v57, %v449_v52  ;;  %v5631_v39 = vld [vmem:[%s7106_s0 + $0xf0] sm:$0xff]   ;;  %v473_v46 = vrot.slane %v471_v20, 1 }
  0x45   :  { %4636 = vmatprep.mubr.msk.bf16.mxu1 %vm544_vm1, %v402_v55  ;;  %v1632_v55 = vrot.slane %v5550_v45, 1  ;;  %7158 = vst [vmem:[#allocation9_spill] sm:$0xff] %v5631_v39 }
  0x46   :  { %v450_v5 = vsel %vm262_vm3, %v445_v51, %v449_v52  ;;  %v1638_v51 = vrot.slane %v5610_v26, 1  ;;  %v481_v52 = vrot.slane %v479_v28, 1  ;;  %v5665_v28 = vld [vmem:[%s7106_s0 + $0x110] sm:$0xff]  }
  0x47   :  { %4777 = vmatmul.mubr.msk.bf16.gmra.mrb[32].mxu0 %vm544_vm1, %v1619_v54  ;;  %v455_v54 = vshll.u32 %v5545_v43, 16  ;;  %v1633_v11 = vsel %vm1582_vm2, %v1630_v50, %v1632_v55  ;;  %v5638_v50 = vld [vmem:[%s7106_s0 + $0x100] sm:$0xff]   ;;  %v5702_v43 = vld [vmem:[%s7106_s0 + $0x110] ss:$0 sps:$4 sm:$0x11]  }
  0x48   :  { %4780 = vmatprep.mubr.msk.bf16.mxu0 %vm544_vm1, %v1621_v58  ;;  %v463_v58 = vshll.u32 %v5556_v48, 16  ;;  %v1642_v20 = vrot.slane %v5638_v50, 1 }
  0x4a   :  { %v465_v17 = vrot.slane %v463_v58, 1 }
  0x4c   :  { %4637 = vmatmul.mubr.msk.bf16.gmra.mrb[32].mxu1 %vm544_vm1, %v410_v10  ;;  %v457_v10 = vrot.slane %v455_v54, 1  ;;  %v483_v54 = vshrl.u32 %v5580_v0, 16 }
  0x4d   :  { %4640 = vmatprep.mubr.msk.bf16.mxu1 %vm544_vm1, %v418_v14  ;;  %v5595_v14 = vld [vmem:[%s7106_s0 + $0xe8] sm:$0xff]  }
  0x4e   :  { %7155 = vst [vmem:[#allocation6_spill] sm:$0xff] %v5595_v14  ;;  %v461_v31 = vor.u32 %v459_v7, %v457_v10  ;;  %v458_v40 = vsel %vm262_vm3, %v453_v15, %v457_v10  ;;  %v503_v15 = vshll.u32 %v5631_v39, 16 }
  0x4f   :  { %4781 = vmatmul.mubr.msk.bf16.gmra.mrb[36].mxu0 %vm544_vm1, %v1623_v13  ;;  %v1634_v13 = vrot.slane %v5567_v56, 1 }
  0x50   :  { %4784 = vmatprep.mubr.msk.bf16.mxu0 %vm544_vm1, %v1625_v18  ;;  %v467_v18 = vshrl.u32 %v5556_v48, 16  ;;  %v466_v57 = vsel %vm262_vm3, %v461_v31, %v465_v17  ;;  %v5670_v31 = vld [vmem:[%s7106_s0 + $0x108] sm:$0xff]  }
  0x51   :  { %v1635_v35 = vsel %vm1582_vm2, %v1632_v55, %v1634_v13  ;;  %v1640_v55 = vrot.slane %v5616_v29, 1  ;;  %v1637_v58 = vsel %vm1582_vm2, %v1634_v13, %v1636_v32 }
  0x54   :  { %4641 = vmatmul.mubr.msk.bf16.gmra.mrb[36].mxu1 %vm544_vm1, %v426_v34  ;;  %v5623_v34 = vld [vmem:[%s7106_s0 + $0xf8] sm:$0xff]  }
  0x55   :  { %4644 = vmatprep.mubr.msk.bf16.mxu1 %vm544_vm1, %v434_v37  ;;  %7157 = vst [vmem:[#allocation8_spill] sm:$0xff] %v5623_v34  ;;  %v495_v37 = vshll.u32 %v5595_v14, 16 }
  0x57   :  { %4785 = vmatmul.mubr.msk.bf16.gmra.mrb[40].mxu0 %vm544_vm1, %v1627_v36  ;;  %v475_v36 = vshrl.u32 %v5574_v61, 16  ;;  %v497_v10 = vrot.slane %v495_v37, 1  ;;  %v485_v37 = vor.u32 %v483_v54, %v481_v52 }
  0x58   :  { %4788 = vmatprep.mubr.msk.bf16.mxu0 %vm544_vm1, %v1629_v42  ;;  %v469_v42 = vor.u32 %v467_v18, %v465_v17  ;;  %v5657_v17 = vld [vmem:[%s7106_s0 + $0x108] sm:$0xff]   ;;  %v489_v18 = vrot.slane %v487_v49, 1 }
  0x59   :  { %v477_v7 = vor.u32 %v475_v36, %v473_v46  ;;  %v1639_v36 = vsel %vm1582_vm2, %v1636_v32, %v1638_v51 }
  0x5a   :  { %v474_v13 = vsel %vm262_vm3, %v469_v42, %v473_v46  ;;  %v507_v42 = vshrl.u32 %v5631_v39, 16  ;;  %v1643_v39 = vsel %vm1582_vm2, %v1640_v55, %v1642_v20  ;;  %v490_v0 = vsel %vm262_vm3, %v485_v37, %v489_v18 }
  0x5b   :  { %v482_v32 = vsel %vm262_vm3, %v477_v7, %v481_v52  ;;  %v2144_v52 = vshrl.u32 %v5233_v4, 16  ;;  %v2147_v7 = vshll.u32 %v5233_v4, 16  ;;  %v2152_v37 = vshrl.u32 %v5227_v3, 16 }
  0x5c   :  { %4645 = vmatmul.mubr.msk.bf16.gmra.mrb[40].mxu1 %vm544_vm1, %v442_v63  ;;  %v491_v63 = vshrl.u32 %v5603_v23, 16  ;;  %v2155_v4 = vshll.u32 %v5227_v3, 16  ;;  %v2161_v3 = vshrl.u32 %v5241_v8, 16 }
  0x5d   :  { %4648 = vmatprep.mubr.msk.bf16.mxu1 %vm544_vm1, %v450_v5  ;;  %v5650_v5 = vld [vmem:[%s7106_s0 + $0x100] sm:$0xff]  }
  0x5e   :  { %7159 = vst [vmem:[#allocation10_spill] sm:$0xff] %v5650_v5  ;;  %v493_v46 = vor.u32 %v491_v63, %v489_v18  ;;  %v519_v23 = vshll.u32 %v5650_v5, 16  ;;  %v5163_v63 = vld [vmem:[%s7106_s0 + $0x120] ss:$0 sps:$4 sm:$0x11]  }
  0x5f   :  { %4789 = vmatmul.mubr.msk.bf16.gmra.mrb[44].mxu0 %vm544_vm1, %v1631_v2  ;;  %v511_v2 = vshll.u32 %v5623_v34, 16 }
  0x60   :  { %4792 = vmatprep.mubr.msk.bf16.mxu0 %vm544_vm1, %v1633_v11  ;;  %v499_v11 = vshrl.u32 %v5595_v14, 16  ;;  %v515_v14 = vshrl.u32 %v5623_v34, 16  ;;  %v527_v34 = vshll.u32 %v5670_v31, 16 }
  0x61   :  { %v513_v49 = vrot.slane %v511_v2, 1  ;;  %v523_v2 = vshrl.u32 %v5650_v5, 16 }
  0x62   :  { %v501_v54 = vor.u32 %v499_v11, %v497_v10  ;;  %v498_v11 = vsel %vm262_vm3, %v493_v46, %v497_v10 }
  0x64   :  { %4649 = vmatmul.mubr.msk.bf16.gmra.mrb[44].mxu1 %vm544_vm1, %v458_v40  ;;  %v1641_v40 = vsel %vm1582_vm2, %v1638_v51, %v1640_v55  ;;  %v1644_v51 = vrot.slane %v5657_v17, 1  ;;  %v517_v55 = vor.u32 %v515_v14, %v513_v49 }
  0x65   :  { %4652 = vmatprep.mubr.msk.bf16.mxu1 %vm544_vm1, %v466_v57  ;;  %v505_v57 = vrot.slane %v503_v15, 1  ;;  %v521_v15 = vrot.slane %v519_v23, 1  ;;  %v1650_v23 = vrot.slane %v5163_v63, 1  ;;  %v2170_v63 = vshrl.u32 %v5270_v25, 16 }
  0x66   :  { %v1645_v18 = vsel %vm1582_vm2, %v1642_v20, %v1644_v51  ;;  %v5721_v20 = vrot.slane %v2144_v52, 1 }
  0x67   :  { %4793 = vmatmul.mubr.msk.bf16.gmra.mrb[48].mxu0 %vm544_vm1, %v1635_v35  ;;  %v5683_v35 = vld [vmem:[%s7106_s0 + $0x118] sm:$0xff]   ;;  %v509_v61 = vor.u32 %v507_v42, %v505_v57  ;;  %v5705_v5 = vsel %vm262_vm3, %v501_v54, %v505_v57  ;;  %v525_v10 = vor.u32 %v523_v2, %v521_v15  ;;  %v5714_v42 = vrot.slane %v527_v34, 1  ;;  %v5167_v57 = vld [vmem:[%s7106_s0 + $0x20] sm:$0xff]  }
  0x68   :  { %4796 = vmatprep.mubr.msk.bf16.mxu0 %vm544_vm1, %v1637_v58  ;;  %v1646_v58 = vrot.slane %v5665_v28, 1  ;;  %v1648_v48 = vrot.slane %v5683_v35, 1  ;;  %v5723_v54 = vrot.slane %v2147_v7, 2  ;;  %v2164_v8 = vshll.u32 %v5167_v57, 16 }
  0x69   :  { %v5719_v46 = vsel %vm262_vm3, %v509_v61, %v513_v49  ;;  %v2154_v61 = vrot.slane %v2152_v37, 1  ;;  %v2157_v49 = vrot.slane %v2155_v4, 2  ;;  %v2326_v2 = vshll.u32 %v5467_v53, 16 }
  0x6a   :  { %v5712_v14 = vsel %vm1582_vm2, %v1644_v51, %v1646_v58  ;;  %v5731_v34 = vsel %vm1582_vm2, %v1646_v58, %v1648_v48  ;;  %v5740_v51 = vsel %vm1582_vm2, %v1648_v48, %v1650_v23  ;;  %v5744_v58 = vsel %vm262_vm3, %v525_v10, %v5714_v42 }
  0x6b   :  { %v2150_v52 = vor.u32 %v5723_v54, %v5721_v20  ;;  %v5750_v7 = vrot.slane %v2161_v3, 1  ;;  %v2328_v48 = vrot.slane %v2326_v2, 2  ;;  %v2335_v4 = vshll.u32 %v5477_v60, 16  ;;  %v5168_v20 = vld [vmem:[%s7106_s0 + $0x30] sm:$0xff]  }
  0x6c   :  { %4653 = vmatmul.mubr.msk.bf16.gmra.mrb[48].mxu1 %vm544_vm1, %v474_v13  ;;  %v5728_v13 = vsel %vm262_vm3, %v517_v55, %v521_v15  ;;  %v2173_v55 = vshll.u32 %v5270_v25, 16  ;;  %v2332_v15 = vshrl.u32 %v5477_v60, 16  ;;  %v2341_v23 = vshrl.u32 %v5501_v12, 16 }
  0x6d   :  { %4656 = vmatprep.mubr.msk.bf16.mxu1 %vm544_vm1, %v482_v32  ;;  %v5756_v10 = vor.u32 %v2157_v49, %v2154_v61  ;;  %v5758_v57 = vrot.slane %v2164_v8, 2  ;;  %v2344_v32 = vshll.u32 %v5501_v12, 16  ;;  %v5762_v3 = vrot.slane %v2170_v63, 1 }
  0x6e   :  { %v2337_v25 = vrot.slane %v2335_v4, 2  ;;  %v5767_v60 = vrot.slane %v2173_v55, 2  ;;  %v2353_v49 = vshll.u32 %v5511_v19, 16  ;;  %v2359_v8 = vshrl.u32 %v5537_v38, 16 }
  0x6f   :  { %4797 = vmatmul.mubr.msk.bf16.gmra.mrb[52].mxu0 %vm544_vm1, %v1639_v36  ;;  %v2343_v36 = vrot.slane %v2341_v23, 1  ;;  %v2346_v61 = vrot.slane %v2344_v32, 2  ;;  %v2362_v2 = vshll.u32 %v5537_v38, 16  ;;  %v2371_v55 = vshll.u32 %v5550_v45, 16 }
  0x70   :  { %4800 = vmatprep.mubr.msk.bf16.mxu0 %vm544_vm1, %v1641_v40  ;;  %v2323_v40 = vshrl.u32 %v5467_v53, 16  ;;  %v2334_v53 = vrot.slane %v2332_v15, 1  ;;  %v2355_v4 = vrot.slane %v2353_v49, 2  ;;  %v2380_v38 = vshll.u32 %v5567_v56, 16 }
  0x71   :  { %v2347_v15 = vor.u32 %v2346_v61, %v2343_v36  ;;  %v2179_v54 = vshrl.u32 %v5168_v20, 16 }
  0x72   :  { %v2325_v37 = vrot.slane %v2323_v40, 1  ;;  %v2350_v40 = vshrl.u32 %v5511_v19, 16  ;;  %v2364_v19 = vrot.slane %v2362_v2, 2  ;;  %v2382_v49 = vrot.slane %v2380_v38, 2 }
  0x73   :  { %v2398_v2 = vshll.u32 %v5610_v26, 16 }
  0x74   :  { %4657 = vmatmul.mubr.msk.bf16.gmra.mrb[52].mxu1 %vm544_vm1, %v490_v0  ;;  %v5772_v12 = vor.u32 %v2328_v48, %v2325_v37  ;;  %v2338_v0 = vor.u32 %v2337_v25, %v2334_v53  ;;  %v2352_v63 = vrot.slane %v2350_v40, 1  ;;  %v2373_v53 = vrot.slane %v2371_v55, 2 }
  0x75   :  { %4660 = vmatprep.mubr.msk.bf16.mxu1 %vm544_vm1, %v498_v11  ;;  %v2368_v11 = vshrl.u32 %v5550_v45, 16  ;;  %v2386_v40 = vshrl.u32 %v5588_v9, 16  ;;  %v2389_v45 = vshll.u32 %v5588_v9, 16 }
  0x76   :  { %v5778_v32 = vsel %vm2142_vm4, %v5772_v12, %v2338_v0  ;;  %v5783_v37 = vsel %vm2142_vm4, %v2338_v0, %v2347_v15  ;;  %v2356_v48 = vor.u32 %v2355_v4, %v2352_v63 }
  0x77   :  { %4801 = vmatmul.mubr.msk.bf16.gmra.mrb[56].mxu0 %vm544_vm1, %v1643_v39  ;;  %v2361_v39 = vrot.slane %v2359_v8, 1  ;;  %v2370_v23 = vrot.slane %v2368_v11, 1  ;;  %v2395_v8 = vshrl.u32 %v5610_v26, 16  ;;  %v2388_v63 = vrot.slane %v2386_v40, 1 }
  0x78   :  { %4804 = vmatprep.mubr.msk.bf16.mxu0 %vm544_vm1, %v1645_v18  ;;  %v2377_v18 = vshrl.u32 %v5567_v56, 16  ;;  %v5788_v61 = vsel %vm2142_vm4, %v2347_v15, %v2356_v48  ;;  %v2391_v9 = vrot.slane %v2389_v45, 2  ;;  %v2400_v11 = vrot.slane %v2398_v2, 2 }
  0x79   :  { %v2365_v36 = vor.u32 %v2364_v19, %v2361_v39  ;;  %v2374_v56 = vor.u32 %v2373_v53, %v2370_v23  ;;  %v2397_v4 = vrot.slane %v2395_v8, 1  ;;  %v2404_v39 = vshrl.u32 %v5616_v29, 16 }
  0x7a   :  { %v2379_v25 = vrot.slane %v2377_v18, 1  ;;  %v2407_v26 = vshll.u32 %v5616_v29, 16  ;;  %v2413_v19 = vshrl.u32 %v5638_v50, 16  ;;  %v2416_v18 = vshll.u32 %v5638_v50, 16 }
  0x7b   :  { %v5795_v0 = vsel %vm2142_vm4, %v2356_v48, %v2365_v36  ;;  %v2406_v55 = vrot.slane %v2404_v39, 1  ;;  %v2401_v48 = vor.u32 %v2400_v11, %v2397_v4  ;;  %v2425_v29 = vshll.u32 %v5657_v17, 16 }
  0x7c   :  { %4661 = vmatmul.mubr.msk.bf16.gmra.mrb[56].mxu1 %vm544_vm1, %v5705_v5  ;;  %v2383_v15 = vor.u32 %v2382_v49, %v2379_v25  ;;  %v5806_v5 = vsel %vm2142_vm4, %v2365_v36, %v2374_v56  ;;  %v2409_v23 = vrot.slane %v2407_v26, 2  ;;  %v2415_v38 = vrot.slane %v2413_v19, 1 }
  0x7d   :  { %4664 = vmatprep.mubr.msk.bf16.mxu1 %vm544_vm1, %v5719_v46  ;;  %v2392_v46 = vor.u32 %v2391_v9, %v2388_v63  ;;  %v2418_v53 = vrot.slane %v2416_v18, 2  ;;  %v2431_v25 = vshrl.u32 %v5665_v28, 16  ;;  %v2434_v50 = vshll.u32 %v5665_v28, 16 }
  0x7e   :  { %v2410_v49 = vor.u32 %v2409_v23, %v2406_v55  ;;  %v2159_v8 = vsel %vm2142_vm4, %v2150_v52, %v5756_v10  ;;  %v2427_v63 = vrot.slane %v2425_v29, 2  ;;  %v7161_v9 = vshll.u32 %v5702_v43, 16  ;;  %v5166_v55 = vld [vmem:[%s7106_s0 + $0x120] ss:$0 sps:$4 sm:$0x33]  }
  0x7f   :  { %4805 = vmatmul.mubr.msk.bf16.gmra.mrb[60].mxu0 %vm544_vm1, %v5712_v14  ;;  %v5811_v14 = vsel %vm2142_vm4, %v2374_v56, %v2383_v15  ;;  %v5816_v36 = vsel %vm2142_vm4, %v2383_v15, %v2392_v46  ;;  %v5821_v40 = vsel %vm2142_vm4, %v2392_v46, %v2401_v48  ;;  %v2419_v56 = vor.u32 %v2418_v53, %v2415_v38 }
  0x80   :  { %4808 = vmatprep.mubr.msk.bf16.mxu0 %vm544_vm1, %v5731_v34  ;;  %v2422_v34 = vshrl.u32 %v5657_v17, 16  ;;  %v2433_v2 = vrot.slane %v2431_v25, 1  ;;  %v7160_v17 = vshrl.u32 %v5670_v31, 16  ;;  %v537_v4 = vrot.slane %v7161_v9, 1 }
  0x81   :  { %v5837_v28 = vsel %vm2142_vm4, %v2401_v48, %v2410_v49  ;;  %v2436_v39 = vrot.slane %v2434_v50, 2  ;;  %v2167_v52 = vor.u32 %v5758_v57, %v5750_v7  ;;  %v2176_v26 = vor.u32 %v5767_v60, %v5762_v3 }
  0x82   :  { %v2424_v45 = vrot.slane %v2422_v34, 1  ;;  %v533_v15 = vor.u32 %v7160_v17, %v5714_v42  ;;  %v5847_v42 = vsel %vm2142_vm4, %v2410_v49, %v2419_v56  ;;  %v2440_v57 = vshrl.u32 %v5683_v35, 16 }
  0x83   :  { %v2437_v11 = vor.u32 %v2436_v39, %v2433_v2  ;;  %v2443_v48 = vshll.u32 %v5683_v35, 16  ;;  %v2181_v23 = vrot.slane %v2179_v54, 1  ;;  %v2449_v3 = vshrl.u32 %v5166_v55, 16  ;;  %v5170_v35 = vld [vmem:[%s7106_s0] sm:$0xff]   ;;  %v5172_v39 = vld [vmem:[%s7106_s0 + $0x48] sm:$0xff]  }
  0x84   :  { %4665 = vmatmul.mubr.msk.bf16.gmra.mrb[60].mxu1 %vm544_vm1, %v5728_v13  ;;  %v2182_v13 = vshll.u32 %v5168_v20, 16  ;;  %v2428_v43 = vor.u32 %v2427_v63, %v2424_v45  ;;  %v538_v18 = vsel %vm262_vm3, %v533_v15, %v537_v4  ;;  %v2452_v60 = vshll.u32 %v5166_v55, 16  ;;  %v5171_v2 = vld [vmem:[%s7106_s0 + $0x40] sm:$0xff]  }
  0x85   :  { %4668 = vmatprep.mubr.msk.bf16.mxu1 %vm544_vm1, %v5744_v58  ;;  %v2168_v34 = vsel %vm2142_vm4, %v5756_v10, %v2167_v52  ;;  %v2442_v29 = vrot.slane %v2440_v57, 1  ;;  %v2445_v25 = vrot.slane %v2443_v48, 2  ;;  %v2177_v49 = vsel %vm2142_vm4, %v2167_v52, %v2176_v26  ;;  %v5175_v57 = vld [vmem:[%s7106_s0 + $0x50] sm:$0xff]  }
  0x86   :  { %v5858_v46 = vsel %vm2142_vm4, %v2419_v56, %v2428_v43  ;;  %v5865_v7 = vsel %vm2142_vm4, %v2428_v43, %v2437_v11  ;;  %v2184_v38 = vrot.slane %v2182_v13, 2  ;;  %v2451_v50 = vrot.slane %v2449_v3, 1  ;;  %v5176_v3 = vld [vmem:[%s7106_s0 + $0x58] sm:$0xff]  }
  0x87   :  { %4809 = vmatmul.mubr.msk.bf16.gmra.mrb[64].mxu0 %vm544_vm1, %v5740_v51  ;;  %v5169_v51 = vld [vmem:[%s7106_s0 + $0x38] sm:$0xff]   ;;  %v2446_v56 = vor.u32 %v2445_v25, %v2442_v29  ;;  %v2197_v17 = vshrl.u32 %v5171_v2, 16  ;;  %v2200_v15 = vshll.u32 %v5171_v2, 16  ;;  %v2206_v20 = vshrl.u32 %v5172_v39, 16 }
  0x88   :  { %4814 = vmatprep.mubr.msk.bf16.mxu0 %vm544_vm1, %v2159_v8  ;;  %v2188_v58 = vshrl.u32 %v5169_v51, 16  ;;  %v2191_v19 = vshll.u32 %v5169_v51, 16  ;;  %v2454_v8 = vrot.slane %v2452_v60, 2  ;;  %v2185_v63 = vor.u32 %v2184_v38, %v2181_v23 }
  0x89   :  { %v5883_v9 = vsel %vm2142_vm4, %v2437_v11, %v2446_v56  ;;  %v2209_v54 = vshll.u32 %v5172_v39, 16  ;;  %v2199_v52 = vrot.slane %v2197_v17, 1  ;;  %v2202_v51 = vrot.slane %v2200_v15, 2  ;;  %v5173_v11 = vld [vmem:[%s7106_s0 + $0x8] sm:$0xff]  }
  0x8a   :  { %v2190_v53 = vrot.slane %v2188_v58, 1  ;;  %v2193_v45 = vrot.slane %v2191_v19, 2  ;;  %v2455_v10 = vor.u32 %v2454_v8, %v2451_v50  ;;  %v2186_v43 = vsel %vm2142_vm4, %v2176_v26, %v2185_v63  ;;  %v5177_v8 = vld [vmem:[%s7106_s0 + $0x18] sm:$0xff]   ;;  %v5180_v15 = vld [vmem:[%s7106_s0 + $0x68] sm:$0xff]  }
  0x8b   :  { %v2208_v19 = vrot.slane %v2206_v20, 1  ;;  %v2211_v55 = vrot.slane %v2209_v54, 2  ;;  %v2203_v26 = vor.u32 %v2202_v51, %v2199_v52  ;;  %v2215_v48 = vshrl.u32 %v5175_v57, 16 }
  0x8c   :  { %4669 = vmatmul.mubr.msk.bf16.gmra.mrb[64].mxu1 %vm544_vm1, %v538_v18  ;;  %v2194_v4 = vor.u32 %v2193_v45, %v2190_v53  ;;  %v5889_v13 = vsel %vm2142_vm4, %v2446_v56, %v2455_v10  ;;  %v5174_v18 = vld [vmem:[%s7106_s0 + $0x10] sm:$0xff]   ;;  %v2218_v23 = vshll.u32 %v5175_v57, 16  ;;  %v2224_v60 = vshrl.u32 %v5176_v3, 16  ;;  %v5178_v56 = vld [vmem:[%s7106_s0 + $0x20] sm:$0xff]  }
  0x8d   :  { %4674 = vmatprep.mubr.msk.bf16.mxu1 %vm544_vm1, %v5170_v35  ;;  %v2212_v38 = vor.u32 %v2211_v55, %v2208_v19  ;;  %v2217_v29 = vrot.slane %v2215_v48, 1  ;;  %v5179_v10 = vld [vmem:[%s7106_s0 + $0x60] sm:$0xff]   ;;  %v2245_v39 = vshll.u32 %v5180_v15, 16  ;;  %v5181_v19 = vld [vmem:[%s7106_s0 + $0x28] sm:$0xff]   ;;  %v5182_v55 = vld [vmem:[%s7106_s0 + $0x30] sm:$0xff]  }
  0x8e   :  { %v2195_v58 = vsel %vm2142_vm4, %v2185_v63, %v2194_v4  ;;  %v2204_v53 = vsel %vm2142_vm4, %v2194_v4, %v2203_v26  ;;  %v2220_v25 = vrot.slane %v2218_v23, 2  ;;  %v2226_v45 = vrot.slane %v2224_v60, 1  ;;  %v5184_v23 = vld [vmem:[%s7106_s0 + $0x78] sm:$0xff]  }
  0x8f   :  { %4815 = vmatmul.mubr.msk.bf16.vlgmr.msra.gmra.mrb[0].mxu0 %vm544_vm1, %v2168_v34  ;;  %v2227_v34 = vshll.u32 %v5176_v3, 16  ;;  %v2233_v63 = vshrl.u32 %v5179_v10, 16  ;;  %v2236_v2 = vshll.u32 %v5179_v10, 16  ;;  %v2242_v4 = vshrl.u32 %v5180_v15, 16 }
  0x90   :  { %4818 = vmatprep.mubr.msk.bf16.mxu0 %vm544_vm1, %v2177_v49  ;;  %v2213_v49 = vsel %vm2142_vm4, %v2203_v26, %v2212_v38  ;;  %v2221_v35 = vor.u32 %v2220_v25, %v2217_v29  ;;  %v2263_v3 = vshll.u32 %v5184_v23, 16 }
  0x91   :  { %v2229_v50 = vrot.slane %v2227_v34, 2  ;;  %v2235_v54 = vrot.slane %v2233_v63, 1  ;;  %v2244_v51 = vrot.slane %v2242_v4, 1  ;;  %v2278_v63 = vshrl.u32 %v5384_v1, 16 }
  0x92   :  { %v2222_v20 = vsel %vm2142_vm4, %v2212_v38, %v2221_v35  ;;  %v2260_v38 = vshrl.u32 %v5184_v23, 16 }
  0x93   :  { %v2230_v17 = vor.u32 %v2229_v50, %v2226_v45  ;;  %v5185_v45 = vld [vmem:[%s7106_s0 + $0x38] sm:$0xff]   ;;  %v5186_v50 = vld [vmem:[%s7106_s0 + $0x40] sm:$0xff]  }
  0x94   :  { %4675 = vmatmul.mubr.msk.bf16.vlgmr.msra.gmra.mrb[0].mxu1 %vm544_vm1, %v5173_v11  ;;  %v2262_v25 = vrot.slane %v2260_v38, 1  ;;  %v5189_v38 = vld [vmem:[%s7106_s0 + $0x58] sm:$0xff]  }
  0x95   :  { %4678 = vmatprep.mubr.msk.bf16.mxu1 %vm544_vm1, %v5174_v18  ;;  %v2231_v52 = vsel %vm2142_vm4, %v2221_v35, %v2230_v17  ;;  %v5183_v18 = vld [vmem:[%s7106_s0 + $0x70] sm:$0xff]   ;;  %v2272_v35 = vshll.u32 %v5376_v59, 16 }
  0x96   :  { %v2251_v26 = vshrl.u32 %v5183_v18, 16  ;;  %v2254_v57 = vshll.u32 %v5183_v18, 16 }
  0x97   :  { %4819 = vmatmul.mubr.msk.bf16.gmra.mrb[4].mxu0 %vm544_vm1, %v2186_v43  ;;  %v2238_v43 = vrot.slane %v2236_v2, 2  ;;  %v2281_v2 = vshll.u32 %v5384_v1, 16  ;;  %v2274_v4 = vrot.slane %v2272_v35, 2  ;;  %v5191_v35 = vld [vmem:[%s7106_s0 + $0x68] sm:$0xff]  }
  0x98   :  { %4822 = vmatprep.mubr.msk.bf16.mxu0 %vm544_vm1, %v2195_v58  ;;  %v2247_v58 = vrot.slane %v2245_v39, 2  ;;  %v2253_v34 = vrot.slane %v2251_v26, 1 }
  0x99   :  { %v2239_v11 = vor.u32 %v2238_v43, %v2235_v54  ;;  %v2283_v54 = vrot.slane %v2281_v2, 2  ;;  %v5187_v43 = vld [vmem:[%s7106_s0 + $0x48] sm:$0xff]  }
  0x9a   :  { %v2248_v48 = vor.u32 %v2247_v58, %v2244_v51  ;;  %v2290_v51 = vshll.u32 %v5402_v16, 16 }
  0x9b   :  { %v2240_v60 = vsel %vm2142_vm4, %v2230_v17, %v2239_v11 }
  0x9c   :  { %4679 = vmatmul.mubr.msk.bf16.gmra.mrb[4].mxu1 %vm544_vm1, %v5177_v8  ;;  %v2249_v29 = vsel %vm2142_vm4, %v2239_v11, %v2248_v48  ;;  %v2292_v26 = vrot.slane %v2290_v51, 2 }
  0x9d   :  { %4682 = vmatprep.mubr.msk.bf16.mxu1 %vm544_vm1, %v5178_v56  ;;  %v2269_v56 = vshrl.u32 %v5376_v59, 16  ;;  %v5188_v59 = vld [vmem:[%s7106_s0 + $0x50] sm:$0xff]  }
  0x9f   :  { %4823 = vmatmul.mubr.msk.bf16.gmra.mrb[8].mxu0 %vm544_vm1, %v2204_v53  ;;  %v2256_v53 = vrot.slane %v2254_v57, 2  ;;  %v2271_v15 = vrot.slane %v2269_v56, 1 }
  0xa0   :  { %4826 = vmatprep.mubr.msk.bf16.mxu0 %vm544_vm1, %v2213_v49  ;;  %v2265_v49 = vrot.slane %v2263_v3, 2  ;;  %v2305_v3 = vshrl.u32 %v5432_v33, 16 }
  0xa1   :  { %v2257_v8 = vor.u32 %v2256_v53, %v2253_v34  ;;  %v2275_v1 = vor.u32 %v2274_v4, %v2271_v15  ;;  %v2314_v53 = vshrl.u32 %v5443_v41, 16 }
  0xa2   :  { %v2266_v10 = vor.u32 %v2265_v49, %v2262_v25  ;;  %v2307_v49 = vrot.slane %v2305_v3, 1 }
  0xa3   :  { %v2258_v17 = vsel %vm2142_vm4, %v2248_v48, %v2257_v8 }
  0xa4   :  { %4683 = vmatmul.mubr.msk.bf16.gmra.mrb[8].mxu1 %vm544_vm1, %v5181_v19  ;;  %v2267_v39 = vsel %vm2142_vm4, %v2257_v8, %v2266_v10  ;;  %v2296_v19 = vshrl.u32 %v5410_v22, 16  ;;  %v2276_v11 = vsel %vm2142_vm4, %v2266_v10, %v2275_v1  ;;  %v2316_v8 = vrot.slane %v2314_v53, 1 }
  0xa5   :  { %4686 = vmatprep.mubr.msk.bf16.mxu1 %vm544_vm1, %v5182_v55  ;;  %v2299_v55 = vshll.u32 %v5410_v22, 16 }
  0xa6   :  { %v2298_v48 = vrot.slane %v2296_v19, 1 }
  0xa7   :  { %4827 = vmatmul.mubr.msk.bf16.gmra.mrb[12].mxu0 %vm544_vm1, %v2222_v20  ;;  %v2280_v20 = vrot.slane %v2278_v63, 1  ;;  %v2301_v23 = vrot.slane %v2299_v55, 2 }
  0xa8   :  { %4830 = vmatprep.mubr.msk.bf16.mxu0 %vm544_vm1, %v2231_v52  ;;  %v2287_v52 = vshrl.u32 %v5402_v16, 16  ;;  %v5190_v16 = vld [vmem:[%s7106_s0 + $0x60] sm:$0xff]  }
  0xa9   :  { %v2284_v58 = vor.u32 %v2283_v54, %v2280_v20  ;;  %v2302_v34 = vor.u32 %v2301_v23, %v2298_v48 }
  0xaa   :  { %v2289_v18 = vrot.slane %v2287_v52, 1 }
  0xab   :  { %v2285_v57 = vsel %vm2142_vm4, %v2275_v1, %v2284_v58 }
  0xac   :  { %4687 = vmatmul.mubr.msk.bf16.gmra.mrb[12].mxu1 %vm544_vm1, %v5185_v45  ;;  %v2293_v22 = vor.u32 %v2292_v26, %v2289_v18 }
  0xad   :  { %4690 = vmatprep.mubr.msk.bf16.mxu1 %vm544_vm1, %v5186_v50 }
  0xae   :  { %v2294_v25 = vsel %vm2142_vm4, %v2284_v58, %v2293_v22  ;;  %v2303_v50 = vsel %vm2142_vm4, %v2293_v22, %v2302_v34 }
  0xaf   :  { %4831 = vmatmul.mubr.msk.bf16.gmra.mrb[16].mxu0 %vm544_vm1, %v2240_v60  ;;  %v2308_v60 = vshll.u32 %v5432_v33, 16  ;;  %v5192_v33 = vld [vmem:[%s7106_s0 + $0x70] sm:$0xff]  }
  0xb0   :  { %4834 = vmatprep.mubr.msk.bf16.mxu0 %vm544_vm1, %v2249_v29  ;;  %v2317_v29 = vshll.u32 %v5443_v41, 16 }
  0xb1   :  { %v2310_v45 = vrot.slane %v2308_v60, 2 }
  0xb2   :  { %v2319_v56 = vrot.slane %v2317_v29, 2 }
  0xb3   :  { %v2311_v41 = vor.u32 %v2310_v45, %v2307_v49 }
  0xb4   :  { %4691 = vmatmul.mubr.msk.bf16.gmra.mrb[16].mxu1 %vm544_vm1, %v5187_v43  ;;  %v2320_v10 = vor.u32 %v2319_v56, %v2316_v8 }
  0xb5   :  { %4694 = vmatprep.mubr.msk.bf16.mxu1 %vm544_vm1, %v5188_v59  ;;  %v2312_v63 = vsel %vm2142_vm4, %v2302_v34, %v2311_v41 }
  0xb6   :  { %v2321_v2 = vsel %vm2142_vm4, %v2311_v41, %v2320_v10  ;;  %v2330_v15 = vsel %vm2142_vm4, %v2320_v10, %v5772_v12  ;;  %v7170_v12 = vld [vmem:[#allocation10_spill] sm:$0xff] }
  0xb7   :  { %4835 = vmatmul.mubr.msk.bf16.gmra.mrb[20].mxu0 %vm544_vm1, %v2258_v17  ;;  %v5193_v17 = vld [vmem:[%s7106_s0 + $0x78] sm:$0xff]   ;;  %s5194_s0 = smov 112  }
  0xb8   :  { %4838 = vmatprep.mubr.msk.bf16.mxu0 %vm544_vm1, %v2267_v39 }
  0xbc   :  { %4695 = vmatmul.mubr.msk.bf16.gmra.mrb[20].mxu1 %vm544_vm1, %v5189_v38 }
  0xbd   :  { %4698 = vmatprep.mubr.msk.bf16.mxu1 %vm544_vm1, %v5190_v16 }
  0xbf   :  { %4839 = vmatmul.mubr.msk.bf16.gmra.mrb[24].mxu0 %vm544_vm1, %v2276_v11 }
  0xc0   :  { %4842 = vmatprep.mubr.msk.bf16.mxu0 %vm544_vm1, %v2285_v57 }
  0xc4   :  { %4699 = vmatmul.mubr.msk.bf16.gmra.mrb[24].mxu1 %vm544_vm1, %v5191_v35 }
  0xc5   :  { %4702 = vmatprep.mubr.msk.bf16.mxu1 %vm544_vm1, %v5192_v33 }
  0xc7   :  { %4843 = vmatmul.mubr.msk.bf16.gmra.mrb[28].mxu0 %vm544_vm1, %v2294_v25 }
  0xc8   :  { %4846 = vmatprep.mubr.msk.bf16.mxu0 %vm544_vm1, %v2303_v50 }
  0xcc   :  { %4703 = vmatmul.mubr.msk.bf16.gmra.mrb[28].mxu1 %vm544_vm1, %v5193_v17 }
  0xcd   :  { %4706 = vmatprep.mubr.msk.bf16.mxu1 %vm544_vm1, %v5416_v24  ;;  %v7162_v24 = vld [vmem:[#allocation2_spill] sm:$0xff] }
  0xcf   :  { %4847 = vmatmul.mubr.msk.bf16.gmra.mrb[32].mxu0 %vm544_vm1, %v2312_v63 }
  0xd0   :  { %4850 = vmatprep.mubr.msk.bf16.mxu0 %vm544_vm1, %v2321_v2 }
  0xd4   :  { %4707 = vmatmul.mubr.msk.bf16.gmra.mrb[32].mxu1 %vm544_vm1, %v5423_v27  ;;  %v7163_v27 = vld [vmem:[#allocation3_spill] sm:$0xff] }
  0xd5   :  { %4710 = vmatprep.mubr.msk.bf16.mxu1 %vm544_vm1, %v5450_v44  ;;  %v7164_v44 = vld [vmem:[#allocation4_spill] sm:$0xff] }
  0xd7   :  { %4851 = vmatmul.mubr.msk.bf16.gmra.mrb[36].mxu0 %vm544_vm1, %v2330_v15 }
  0xd8   :  { %4854 = vmatprep.mubr.msk.bf16.mxu0 %vm544_vm1, %v5778_v32 }
  0xdc   :  { %4711 = vmatmul.mubr.msk.bf16.gmra.mrb[36].mxu1 %vm544_vm1, %v5457_v47  ;;  %v7165_v47 = vld [vmem:[#allocation5_spill] sm:$0xff] }
  0xdd   :  { %4714 = vmatprep.mubr.msk.bf16.mxu1 %vm544_vm1, %v5483_v62  ;;  %v7166_v62 = vld [vmem:[#allocation7_spill] sm:$0xff] }
  0xdf   :  { %4855 = vmatmul.mubr.msk.bf16.gmra.mrb[40].mxu0 %vm544_vm1, %v5783_v37 }
  0xe0   :  { %4858 = vmatprep.mubr.msk.bf16.mxu0 %vm544_vm1, %v5788_v61 }
  0xe4   :  { %4715 = vmatmul.mubr.msk.bf16.gmra.mrb[40].mxu1 %vm544_vm1, %v5492_v6  ;;  %v7167_v6 = vld [vmem:[#allocation6_spill] sm:$0xff] }
  0xe5   :  { %4718 = vmatprep.mubr.msk.bf16.mxu1 %vm544_vm1, %v5517_v21  ;;  %v7168_v21 = vld [vmem:[#allocation9_spill] sm:$0xff] }
  0xe7   :  { %4859 = vmatmul.mubr.msk.bf16.gmra.mrb[44].mxu0 %vm544_vm1, %v5795_v0 }
  0xe8   :  { %4862 = vmatprep.mubr.msk.bf16.mxu0 %vm544_vm1, %v5806_v5 }
  0xec   :  { %4719 = vmatmul.mubr.msk.bf16.gmra.mrb[44].mxu1 %vm544_vm1, %v5526_v30  ;;  %v7169_v30 = vld [vmem:[#allocation8_spill] sm:$0xff] }
  0xed   :  { %4722 = vmatprep.mubr.msk.bf16.mxu1 %vm544_vm1, %v7162_v24 }
  0xef   :  { %4863 = vmatmul.mubr.msk.bf16.gmra.mrb[48].mxu0 %vm544_vm1, %v5811_v14 }
  0xf0   :  { %4866 = vmatprep.mubr.msk.bf16.mxu0 %vm544_vm1, %v5816_v36 }
  0xf4   :  { %4723 = vmatmul.mubr.msk.bf16.gmra.mrb[48].mxu1 %vm544_vm1, %v7163_v27 }
  0xf5   :  { %4726 = vmatprep.mubr.msk.bf16.mxu1 %vm544_vm1, %v7164_v44 }
  0xf7   :  { %4867 = vmatmul.mubr.msk.bf16.gmra.mrb[52].mxu0 %vm544_vm1, %v5821_v40 }
  0xf8   :  { %4870 = vmatprep.mubr.msk.bf16.mxu0 %vm544_vm1, %v5837_v28 }
  0xfc   :  { %4727 = vmatmul.mubr.msk.bf16.gmra.mrb[52].mxu1 %vm544_vm1, %v7165_v47 }
  0xfd   :  { %4730 = vmatprep.mubr.msk.bf16.mxu1 %vm544_vm1, %v7166_v62 }
  0xff   :  { %4871 = vmatmul.mubr.msk.bf16.gmra.mrb[56].mxu0 %vm544_vm1, %v5847_v42 }
 0x100   :  { %4874 = vmatprep.mubr.msk.bf16.mxu0 %vm544_vm1, %v5858_v46 }
 0x104   :  { %4731 = vmatmul.mubr.msk.bf16.gmra.mrb[56].mxu1 %vm544_vm1, %v7167_v6 }
 0x105   :  { %4734 = vmatprep.mubr.msk.bf16.mxu1 %vm544_vm1, %v7168_v21 }
 0x107   :  { %4875 = vmatmul.mubr.msk.bf16.gmra.mrb[60].mxu0 %vm544_vm1, %v5865_v7 }
 0x108   :  { %4878 = vmatprep.mubr.msk.bf16.mxu0 %vm544_vm1, %v5883_v9 }
 0x10c   :  { %4735 = vmatmul.mubr.msk.bf16.gmra.mrb[60].mxu1 %vm544_vm1, %v7169_v30 }
 0x10d   :  { %4738 = vmatprep.mubr.msk.bf16.mxu1 %vm544_vm1, %v7170_v12 }
 0x10f   :  { %4879 = vmatmul.mubr.msk.bf16.gmra.mrb[64].mxu0 %vm544_vm1, %v5889_v13 }
 0x114   :  { %4739 = vmatmul.mubr.msk.bf16.gmra.mrb[64].mxu1 %vm544_vm1, %v5670_v31 }
 0x162   :  { %v4816_v32 = vpop.f32.mrb[0].mxu0 }
 0x163   :  { %v2601_v37 = vpop.f32.mrb[1].mxu0 }
 0x164   :  { %v4817_v61 = vpop.f32.mrb[2].mxu0 }
 0x165   :  { %v2604_v0 = vpop.f32.mrb[3].mxu0 }
 0x167   :  { %v4676_v5 = vpop.f32.mrb[0].mxu1 }
 0x168   :  { %v6080_v14 = vadd.f32 %v4816_v32, %v4676_v5  ;;  %v1066_v36 = vpop.f32.mrb[1].mxu1 }
 0x169   :  { %v6082_v28 = vadd.f32 %v2601_v37, %v1066_v36  ;;  %v4677_v42 = vpop.f32.mrb[2].mxu1 }
 0x16a   :  { %v4820_v40 = vpop.f32.mrb[4].mxu0  ;;  %v6084_v7 = vadd.f32 %v4817_v61, %v4677_v42  ;;  %3012 = vrot.lane.b32.xlu1 %v6080_v14, %s5194_s0  ;;  %v1069_v31 = vpop.f32.mrb[3].mxu1 }
 0x16b   :  { %v2617_v46 = vpop.f32.mrb[5].mxu0  ;;  %v6088_v13 = vadd.f32 %v2604_v0, %v1069_v31  ;;  %3008 = vrot.lane.b32.xlu0 %v6082_v28, %s5194_s0 }
 0x16c   :  { %v4821_v9 = vpop.f32.mrb[6].mxu0 }
 0x16d   :  { %v2620_v4 = vpop.f32.mrb[7].mxu0 }
 0x16e   :  { %3014 = vrot.lane.b32.xlu1 %v6084_v7, %s5194_s0 }
 0x16f   :  { %3010 = vrot.lane.b32.xlu0 %v6088_v13, %s5194_s0  ;;  %v4680_v39 = vpop.f32.mrb[4].mxu1 }
 0x170   :  { %v6096_v20 = vadd.f32 %v4820_v40, %v4680_v39  ;;  %v1082_v54 = vpop.f32.mrb[5].mxu1 }
 0x171   :  { %v6098_v59 = vadd.f32 %v2617_v46, %v1082_v54  ;;  %v4681_v1 = vpop.f32.mrb[6].mxu1 }
 0x172   :  { %v4824_v43 = vpop.f32.mrb[8].mxu0  ;;  %v6100_v51 = vadd.f32 %v4821_v9, %v4681_v1  ;;  %v1085_v58 = vpop.f32.mrb[7].mxu1 }
 0x173   :  { %v2633_v52 = vpop.f32.mrb[9].mxu0  ;;  %v6102_v55 = vadd.f32 %v2620_v4, %v1085_v58  ;;  %3020 = vrot.lane.b32.xlu0 %v6096_v20, %s5194_s0 }
 0x174   :  { %v4825_v19 = vpop.f32.mrb[10].mxu0  ;;  %3022 = vrot.lane.b32.xlu1 %v6100_v51, %s5194_s0 }
 0x175   :  { %v2636_v11 = vpop.f32.mrb[11].mxu0 }
 0x177   :  { %3016 = vrot.lane.b32.xlu0 %v6098_v59, %s5194_s0  ;;  %v4684_v18 = vpop.f32.mrb[8].mxu1 }
 0x178   :  { %v6110_v26 = vadd.f32 %v4824_v43, %v4684_v18  ;;  %3018 = vrot.lane.b32.xlu1 %v6102_v55, %s5194_s0  ;;  %v1098_v57 = vpop.f32.mrb[9].mxu1 }
 0x179   :  { %v6114_v23 = vadd.f32 %v2633_v52, %v1098_v57  ;;  %v4685_v38 = vpop.f32.mrb[10].mxu1 }
 0x17a   :  { %v4828_v48 = vpop.f32.mrb[12].mxu0  ;;  %v6116_v22 = vadd.f32 %v4825_v19, %v4685_v38  ;;  %v1101_v3 = vpop.f32.mrb[11].mxu1 }
 0x17b   :  { %v2649_v16 = vpop.f32.mrb[13].mxu0  ;;  %v6118_v34 = vadd.f32 %v2636_v11, %v1101_v3  ;;  %3028 = vrot.lane.b32.xlu0 %v6110_v26, %s5194_s0 }
 0x17c   :  { %v4829_v60 = vpop.f32.mrb[14].mxu0  ;;  %3030 = vrot.lane.b32.xlu1 %v6116_v22, %s5194_s0 }
 0x17d   :  { %v2652_v53 = vpop.f32.mrb[15].mxu0 }
 0x17f   :  { %3024 = vrot.lane.b32.xlu0 %v6114_v23, %s5194_s0  ;;  %v4688_v29 = vpop.f32.mrb[12].mxu1 }
 0x180   :  { %v6126_v25 = vadd.f32 %v4828_v48, %v4688_v29  ;;  %3026 = vrot.lane.b32.xlu1 %v6118_v34, %s5194_s0  ;;  %v1114_v49 = vpop.f32.mrb[13].mxu1 }
 0x181   :  { %v6130_v50 = vadd.f32 %v2649_v16, %v1114_v49  ;;  %v4689_v8 = vpop.f32.mrb[14].mxu1 }
 0x182   :  { %v4832_v45 = vpop.f32.mrb[16].mxu0  ;;  %v6132_v35 = vadd.f32 %v4829_v60, %v4689_v8  ;;  %v1117_v33 = vpop.f32.mrb[15].mxu1 }
 0x183   :  { %v2665_v56 = vpop.f32.mrb[17].mxu0  ;;  %v6134_v10 = vadd.f32 %v2652_v53, %v1117_v33  ;;  %3036 = vrot.lane.b32.xlu0 %v6126_v25, %s5194_s0 }
 0x184   :  { %v4833_v41 = vpop.f32.mrb[18].mxu0  ;;  %3038 = vrot.lane.b32.xlu1 %v6132_v35, %s5194_s0 }
 0x185   :  { %v2668_v63 = vpop.f32.mrb[19].mxu0 }
 0x187   :  { %3032 = vrot.lane.b32.xlu0 %v6130_v50, %s5194_s0  ;;  %v4692_v2 = vpop.f32.mrb[16].mxu1 }
 0x188   :  { %v6142_v17 = vadd.f32 %v4832_v45, %v4692_v2  ;;  %3034 = vrot.lane.b32.xlu1 %v6134_v10, %s5194_s0  ;;  %v1130_v15 = vpop.f32.mrb[17].mxu1 }
 0x189   :  { %v6146_v27 = vadd.f32 %v2665_v56, %v1130_v15  ;;  %v4693_v44 = vpop.f32.mrb[18].mxu1 }
 0x18a   :  { %v4836_v24 = vpop.f32.mrb[20].mxu0  ;;  %v6148_v62 = vadd.f32 %v4833_v41, %v4693_v44  ;;  %v1133_v6 = vpop.f32.mrb[19].mxu1 }
 0x18b   :  { %v2681_v47 = vpop.f32.mrb[21].mxu0  ;;  %v6150_v30 = vadd.f32 %v2668_v63, %v1133_v6  ;;  %3044 = vrot.lane.b32.xlu0 %v6142_v17, %s5194_s0 }
 0x18c   :  { %v4837_v21 = vpop.f32.mrb[22].mxu0  ;;  %3046 = vrot.lane.b32.xlu1 %v6148_v62, %s5194_s0 }
 0x18d   :  { %v2684_v12 = vpop.f32.mrb[23].mxu0 }
 0x18f   :  { %3040 = vrot.lane.b32.xlu0 %v6146_v27, %s5194_s0  ;;  %v4696_v32 = vpop.f32.mrb[20].mxu1 }
 0x190   :  { %v6158_v37 = vadd.f32 %v4836_v24, %v4696_v32  ;;  %3042 = vrot.lane.b32.xlu1 %v6150_v30, %s5194_s0  ;;  %v1146_v61 = vpop.f32.mrb[21].mxu1 }
 0x191   :  { %v6162_v5 = vadd.f32 %v2681_v47, %v1146_v61  ;;  %v4697_v36 = vpop.f32.mrb[22].mxu1 }
 0x192   :  { %v4840_v0 = vpop.f32.mrb[24].mxu0  ;;  %v6164_v42 = vadd.f32 %v4837_v21, %v4697_v36  ;;  %v1149_v46 = vpop.f32.mrb[23].mxu1 }
 0x193   :  { %v2697_v40 = vpop.f32.mrb[25].mxu0  ;;  %v6166_v9 = vadd.f32 %v2684_v12, %v1149_v46  ;;  %3052 = vrot.lane.b32.xlu0 %v6158_v37, %s5194_s0 }
 0x194   :  { %v4841_v31 = vpop.f32.mrb[26].mxu0  ;;  %3054 = vrot.lane.b32.xlu1 %v6164_v42, %s5194_s0 }
 0x195   :  { %v2700_v4 = vpop.f32.mrb[27].mxu0 }
 0x197   :  { %3048 = vrot.lane.b32.xlu0 %v6162_v5, %s5194_s0  ;;  %v4700_v39 = vpop.f32.mrb[24].mxu1 }
 0x198   :  { %v6174_v54 = vadd.f32 %v4840_v0, %v4700_v39  ;;  %3050 = vrot.lane.b32.xlu1 %v6166_v9, %s5194_s0  ;;  %v1162_v43 = vpop.f32.mrb[25].mxu1 }
 0x199   :  { %v6178_v52 = vadd.f32 %v2697_v40, %v1162_v43  ;;  %v4701_v58 = vpop.f32.mrb[26].mxu1 }
 0x19a   :  { %v4844_v1 = vpop.f32.mrb[28].mxu0  ;;  %v6180_v11 = vadd.f32 %v4841_v31, %v4701_v58  ;;  %v1165_v18 = vpop.f32.mrb[27].mxu1 }
 0x19b   :  { %v2713_v19 = vpop.f32.mrb[29].mxu0  ;;  %v6182_v48 = vadd.f32 %v2700_v4, %v1165_v18  ;;  %3060 = vrot.lane.b32.xlu0 %v6174_v54, %s5194_s0 }
 0x19c   :  { %v4845_v57 = vpop.f32.mrb[30].mxu0  ;;  %3062 = vrot.lane.b32.xlu1 %v6180_v11, %s5194_s0 }
 0x19d   :  { %v2716_v38 = vpop.f32.mrb[31].mxu0 }
 0x19f   :  { %3056 = vrot.lane.b32.xlu0 %v6178_v52, %s5194_s0  ;;  %v4704_v16 = vpop.f32.mrb[28].mxu1 }
 0x1a0   :  { %v6190_v3 = vadd.f32 %v4844_v1, %v4704_v16  ;;  %3058 = vrot.lane.b32.xlu1 %v6182_v48, %s5194_s0  ;;  %v1178_v60 = vpop.f32.mrb[29].mxu1 }
 0x1a1   :  { %v6194_v29 = vadd.f32 %v2713_v19, %v1178_v60  ;;  %v4705_v49 = vpop.f32.mrb[30].mxu1 }
 0x1a2   :  { %v4848_v53 = vpop.f32.mrb[32].mxu0  ;;  %v6196_v8 = vadd.f32 %v4845_v57, %v4705_v49  ;;  %v1181_v56 = vpop.f32.mrb[31].mxu1 }
 0x1a3   :  { %v2729_v45 = vpop.f32.mrb[33].mxu0  ;;  %v6198_v41 = vadd.f32 %v2716_v38, %v1181_v56  ;;  %3068 = vrot.lane.b32.xlu0 %v6190_v3, %s5194_s0 }
 0x1a4   :  { %v4849_v33 = vpop.f32.mrb[34].mxu0  ;;  %3070 = vrot.lane.b32.xlu1 %v6196_v8, %s5194_s0 }
 0x1a5   :  { %v2732_v63 = vpop.f32.mrb[35].mxu0 }
 0x1a7   :  { %3064 = vrot.lane.b32.xlu0 %v6194_v29, %s5194_s0  ;;  %v4708_v2 = vpop.f32.mrb[32].mxu1 }
 0x1a8   :  { %v6206_v15 = vadd.f32 %v4848_v53, %v4708_v2  ;;  %3066 = vrot.lane.b32.xlu1 %v6198_v41, %s5194_s0  ;;  %v1194_v24 = vpop.f32.mrb[33].mxu1 }
 0x1a9   :  { %v6210_v47 = vadd.f32 %v2729_v45, %v1194_v24  ;;  %v4709_v6 = vpop.f32.mrb[34].mxu1 }
 0x1aa   :  { %v4852_v44 = vpop.f32.mrb[36].mxu0  ;;  %v6212_v12 = vadd.f32 %v4849_v33, %v4709_v6  ;;  %v1197_v32 = vpop.f32.mrb[35].mxu1 }
 0x1ab   :  { %v2745_v21 = vpop.f32.mrb[37].mxu0  ;;  %v6214_v0 = vadd.f32 %v2732_v63, %v1197_v32  ;;  %3076 = vrot.lane.b32.xlu0 %v6206_v15, %s5194_s0 }
 0x1ac   :  { %v4853_v61 = vpop.f32.mrb[38].mxu0  ;;  %3078 = vrot.lane.b32.xlu1 %v6212_v12, %s5194_s0 }
 0x1ad   :  { %v2748_v36 = vpop.f32.mrb[39].mxu0 }
 0x1af   :  { %3072 = vrot.lane.b32.xlu0 %v6210_v47, %s5194_s0  ;;  %v4712_v40 = vpop.f32.mrb[36].mxu1 }
 0x1b0   :  { %v6222_v46 = vadd.f32 %v4852_v44, %v4712_v40  ;;  %3074 = vrot.lane.b32.xlu1 %v6214_v0, %s5194_s0  ;;  %v1210_v31 = vpop.f32.mrb[37].mxu1 }
 0x1b1   :  { %v6226_v39 = vadd.f32 %v2745_v21, %v1210_v31  ;;  %v4713_v43 = vpop.f32.mrb[38].mxu1 }
 0x1b2   :  { %v4856_v4 = vpop.f32.mrb[40].mxu0  ;;  %v6228_v58 = vadd.f32 %v4853_v61, %v4713_v43  ;;  %v1213_v19 = vpop.f32.mrb[39].mxu1 }
 0x1b3   :  { %v2761_v1 = vpop.f32.mrb[41].mxu0  ;;  %v6230_v57 = vadd.f32 %v2748_v36, %v1213_v19  ;;  %3084 = vrot.lane.b32.xlu0 %v6222_v46, %s5194_s0 }
 0x1b4   :  { %v4857_v18 = vpop.f32.mrb[42].mxu0  ;;  %3086 = vrot.lane.b32.xlu1 %v6228_v58, %s5194_s0 }
 0x1b5   :  { %v2764_v38 = vpop.f32.mrb[43].mxu0 }
 0x1b7   :  { %3080 = vrot.lane.b32.xlu0 %v6226_v39, %s5194_s0  ;;  %v4716_v16 = vpop.f32.mrb[40].mxu1 }
 0x1b8   :  { %v6238_v60 = vadd.f32 %v4856_v4, %v4716_v16  ;;  %3082 = vrot.lane.b32.xlu1 %v6230_v57, %s5194_s0  ;;  %v1226_v53 = vpop.f32.mrb[41].mxu1 }
 0x1b9   :  { %v6242_v45 = vadd.f32 %v2761_v1, %v1226_v53  ;;  %v4717_v56 = vpop.f32.mrb[42].mxu1 }
 0x1ba   :  { %v4860_v49 = vpop.f32.mrb[44].mxu0  ;;  %v6244_v63 = vadd.f32 %v4857_v18, %v4717_v56  ;;  %v1229_v2 = vpop.f32.mrb[43].mxu1 }
 0x1bb   :  { %v2777_v33 = vpop.f32.mrb[45].mxu0  ;;  %v6246_v44 = vadd.f32 %v2764_v38, %v1229_v2  ;;  %3092 = vrot.lane.b32.xlu0 %v6238_v60, %s5194_s0 }
 0x1bc   :  { %v4861_v24 = vpop.f32.mrb[46].mxu0  ;;  %3094 = vrot.lane.b32.xlu1 %v6244_v63, %s5194_s0 }
 0x1bd   :  { %v2780_v6 = vpop.f32.mrb[47].mxu0 }
 0x1bf   :  { %3088 = vrot.lane.b32.xlu0 %v6242_v45, %s5194_s0  ;;  %v4720_v21 = vpop.f32.mrb[44].mxu1 }
 0x1c0   :  { %v6254_v32 = vadd.f32 %v4860_v49, %v4720_v21  ;;  %3090 = vrot.lane.b32.xlu1 %v6246_v44, %s5194_s0  ;;  %v1242_v61 = vpop.f32.mrb[45].mxu1 }
 0x1c1   :  { %v6258_v40 = vadd.f32 %v2777_v33, %v1242_v61  ;;  %v4721_v31 = vpop.f32.mrb[46].mxu1 }
 0x1c2   :  { %v4864_v36 = vpop.f32.mrb[48].mxu0  ;;  %v6260_v43 = vadd.f32 %v4861_v24, %v4721_v31  ;;  %v1245_v1 = vpop.f32.mrb[47].mxu1 }
 0x1c3   :  { %7171 = vst [vmem:[#allocation2_spill] sm:$0xff] %v6258_v40  ;;  %v2793_v4 = vpop.f32.mrb[49].mxu0  ;;  %v6262_v18 = vadd.f32 %v2780_v6, %v1245_v1  ;;  %3100 = vrot.lane.b32.xlu0 %v6254_v32, %s5194_s0 }
 0x1c4   :  { %v4865_v19 = vpop.f32.mrb[50].mxu0  ;;  %3102 = vrot.lane.b32.xlu1 %v6260_v43, %s5194_s0 }
 0x1c5   :  { %7172 = vst [vmem:[#allocation3_spill] sm:$0xff] %v6262_v18  ;;  %v2796_v38 = vpop.f32.mrb[51].mxu0 }
 0x1c7   :  { %3096 = vrot.lane.b32.xlu0 %v6258_v40, %s5194_s0  ;;  %v4724_v16 = vpop.f32.mrb[48].mxu1 }
 0x1c8   :  { %v6270_v53 = vadd.f32 %v4864_v36, %v4724_v16  ;;  %3098 = vrot.lane.b32.xlu1 %v6262_v18, %s5194_s0  ;;  %v1258_v49 = vpop.f32.mrb[49].mxu1 }
 0x1c9   :  { %v6274_v33 = vadd.f32 %v2793_v4, %v1258_v49  ;;  %v4725_v2 = vpop.f32.mrb[50].mxu1 }
 0x1ca   :  { %7173 = vst [vmem:[#allocation4_spill] sm:$0xff] %v6270_v53  ;;  %v4868_v56 = vpop.f32.mrb[52].mxu0  ;;  %v6276_v6 = vadd.f32 %v4865_v19, %v4725_v2  ;;  %v1261_v21 = vpop.f32.mrb[51].mxu1 }
 0x1cb   :  { %7174 = vst [vmem:[#allocation5_spill] sm:$0xff] %v6274_v33  ;;  %v2809_v24 = vpop.f32.mrb[53].mxu0  ;;  %v6278_v31 = vadd.f32 %v2796_v38, %v1261_v21  ;;  %3108 = vrot.lane.b32.xlu0 %v6270_v53, %s5194_s0 }
 0x1cc   :  { %7175 = vst [vmem:[#allocation7_spill] sm:$0xff] %v6276_v6  ;;  %v4869_v61 = vpop.f32.mrb[54].mxu0  ;;  %3110 = vrot.lane.b32.xlu1 %v6276_v6, %s5194_s0 }
 0x1cd   :  { %7176 = vst [vmem:[#allocation6_spill] sm:$0xff] %v6278_v31  ;;  %v2812_v36 = vpop.f32.mrb[55].mxu0 }
 0x1cf   :  { %3104 = vrot.lane.b32.xlu0 %v6274_v33, %s5194_s0  ;;  %v4728_v4 = vpop.f32.mrb[52].mxu1 }
 0x1d0   :  { %v6286_v1 = vadd.f32 %v4868_v56, %v4728_v4  ;;  %3106 = vrot.lane.b32.xlu1 %v6278_v31, %s5194_s0  ;;  %v1274_v19 = vpop.f32.mrb[53].mxu1 }
 0x1d1   :  { %v6290_v38 = vadd.f32 %v2809_v24, %v1274_v19  ;;  %v4729_v49 = vpop.f32.mrb[54].mxu1 }
 0x1d2   :  { %7177 = vst [vmem:[#allocation9_spill] sm:$0xff] %v6286_v1  ;;  %v4872_v16 = vpop.f32.mrb[56].mxu0  ;;  %v6292_v21 = vadd.f32 %v4869_v61, %v4729_v49  ;;  %v1277_v53 = vpop.f32.mrb[55].mxu1 }
 0x1d3   :  { %7178 = vst [vmem:[#allocation8_spill] sm:$0xff] %v6290_v38  ;;  %v2825_v2 = vpop.f32.mrb[57].mxu0  ;;  %v6294_v6 = vadd.f32 %v2812_v36, %v1277_v53  ;;  %3116 = vrot.lane.b32.xlu0 %v6286_v1, %s5194_s0 }
 0x1d4   :  { %7179 = vst [vmem:[#allocation10_spill] sm:$0xff] %v6292_v21  ;;  %v4873_v18 = vpop.f32.mrb[58].mxu0  ;;  %3118 = vrot.lane.b32.xlu1 %v6292_v21, %s5194_s0 }
 0x1d5   :  { %7180 = vst [vmem:[#allocation11_spill] sm:$0xff] %v6294_v6  ;;  %v2828_v56 = vpop.f32.mrb[59].mxu0 }
 0x1d7   :  { %3112 = vrot.lane.b32.xlu0 %v6290_v38, %s5194_s0  ;;  %v4732_v24 = vpop.f32.mrb[56].mxu1 }
 0x1d8   :  { %v6302_v4 = vadd.f32 %v4872_v16, %v4732_v24  ;;  %3114 = vrot.lane.b32.xlu1 %v6294_v6, %s5194_s0  ;;  %v1290_v61 = vpop.f32.mrb[57].mxu1 }
 0x1d9   :  { %v6306_v53 = vadd.f32 %v2825_v2, %v1290_v61  ;;  %v4733_v36 = vpop.f32.mrb[58].mxu1 }
 0x1da   :  { %7181 = vst [vmem:[#allocation12_spill] sm:$0xff] %v6302_v4  ;;  %v4876_v19 = vpop.f32.mrb[60].mxu0  ;;  %v6308_v1 = vadd.f32 %v4873_v18, %v4733_v36  ;;  %v1293_v31 = vpop.f32.mrb[59].mxu1 }
 0x1db   :  { %7182 = vst [vmem:[#allocation13_spill] sm:$0xff] %v6306_v53  ;;  %v2841_v49 = vpop.f32.mrb[61].mxu0  ;;  %v6310_v21 = vadd.f32 %v2828_v56, %v1293_v31  ;;  %3124 = vrot.lane.b32.xlu0 %v6302_v4, %s5194_s0 }
 0x1dc   :  { %7183 = vst [vmem:[#allocation14_spill] sm:$0xff] %v6308_v1  ;;  %v4877_v33 = vpop.f32.mrb[62].mxu0  ;;  %v3013_v24 = vpop.permute.xlu1 %3012  ;;  %3126 = vrot.lane.b32.xlu1 %v6308_v1, %s5194_s0 }
 0x1dd   :  { %7184 = vst [vmem:[#allocation15_spill] sm:$0xff] %v6310_v21  ;;  %v2844_v16 = vpop.f32.mrb[63].mxu0  ;;  %v3009_v6 = vpop.permute.xlu0 %3008  ;;  %v6323_v56 = vmax.f32 %v6080_v14, %v3013_v24 }
 0x1df   :  { %3120 = vrot.lane.b32.xlu0 %v6306_v53, %s5194_s0  ;;  %v4736_v2 = vpop.f32.mrb[60].mxu1  ;;  %7185 = vst [vmem:[#allocation16_spill] sm:$0xff] %v6323_v56 }
 0x1e0   :  { %v6318_v61 = vadd.f32 %v4876_v19, %v4736_v2  ;;  %v3015_v18 = vpop.permute.xlu1 %3014  ;;  %3122 = vrot.lane.b32.xlu1 %v6310_v21, %s5194_s0  ;;  %v1306_v31 = vpop.f32.mrb[61].mxu1 }
 0x1e1   :  { %v6326_v36 = vmax.f32 %v6084_v7, %v3015_v18  ;;  %v6328_v4 = vadd.f32 %v2841_v49, %v1306_v31  ;;  %v3011_v1 = vpop.permute.xlu0 %3010  ;;  %v4737_v38 = vpop.f32.mrb[62].mxu1  ;;  %v6339_v7 = vmax.f32 %v6082_v28, %v3009_v6 }
 0x1e2   :  { %v6330_v40 = vadd.f32 %v4877_v33, %v4737_v38  ;;  %v1309_v53 = vpop.f32.mrb[63].mxu1  ;;  %v4880_v19 = vpop.f32.mrb[64].mxu0  ;;  %v6342_v33 = vmax.f32 %v6088_v13, %v3011_v1 }
 0x1e3   :  { %7186 = vst [vmem:[#allocation17_spill] sm:$0xff] %v6326_v36  ;;  %7187 = vst [vmem:[#allocation18_spill] sm:$0xff] %v6328_v4  ;;  %v6332_v2 = vadd.f32 %v2844_v16, %v1309_v53  ;;  %3352 = vrot.lane.b32.xlu0 %v6323_v56, %s5195_s20  ;;  %v2857_v21 = vpop.f32.mrb[65].mxu0 }
 0x1e4   :  { %3354 = vrot.lane.b32.xlu1 %v6326_v36, %s5195_s20  ;;  %v4881_v14 = vpop.f32.mrb[66].mxu0 }
 0x1e5   :  { %7188 = vst [vmem:[#allocation19_spill] sm:$0xff] %v6332_v2  ;;  %v3021_v49 = vpop.permute.xlu0 %3020  ;;  %v2860_v24 = vpop.f32.mrb[67].mxu0 }
 0x1e6   :  { %v3023_v38 = vpop.permute.xlu1 %3022 }
 0x1e7   :  { %3348 = vrot.lane.b32.xlu0 %v6339_v7, %s5195_s20  ;;  %v4740_v53 = vpop.f32.mrb[64].mxu1 }
 0x1e8   :  { %v6346_v16 = vadd.f32 %v4880_v19, %v4740_v53  ;;  %3350 = vrot.lane.b32.xlu1 %v6342_v33, %s5195_s20  ;;  %v1322_v18 = vpop.f32.mrb[65].mxu1 }
 0x1e9   :  { %v6350_v31 = vadd.f32 %v2857_v21, %v1322_v18  ;;  %v3017_v28 = vpop.permute.xlu0 %3016  ;;  %v4741_v6 = vpop.f32.mrb[66].mxu1  ;;  %v6365_v21 = vmax.f32 %v6096_v20, %v3021_v49 }
 0x1ea   :  { %7189 = vst [vmem:[#allocation20_spill] sm:$0xff] %v6346_v16  ;;  %v6352_v36 = vadd.f32 %v4881_v14, %v4741_v6  ;;  %v3019_v56 = vpop.permute.xlu1 %3018  ;;  %v1325_v13 = vpop.f32.mrb[67].mxu1  ;;  %v6375_v6 = vmax.f32 %v6098_v59, %v3017_v28 }
 0x1eb   :  { %v6354_v1 = vadd.f32 %v2860_v24, %v1325_v13  ;;  %3132 = vrot.lane.b32.xlu0 %v6318_v61, %s5194_s0  ;;  %v6368_v24 = vmax.f32 %v6100_v51, %v3023_v38 }
 0x1ec   :  { %7190 = vst [vmem:[#allocation21_spill] sm:$0xff] %v6352_v36  ;;  %3134 = vrot.lane.b32.xlu1 %v6330_v40, %s5194_s0 }
 0x1ed   :  { %7191 = vst [vmem:[#allocation22_spill] sm:$0xff] %v6354_v1  ;;  %v3029_v19 = vpop.permute.xlu0 %3028 }
 0x1ee   :  { %v3031_v53 = vpop.permute.xlu1 %3030 }
 0x1ef   :  { %3128 = vrot.lane.b32.xlu0 %v6328_v4, %s5194_s0  ;;  %v6396_v28 = vmax.f32 %v6116_v22, %v3031_v53 }
 0x1f0   :  { %3130 = vrot.lane.b32.xlu1 %v6332_v2, %s5194_s0  ;;  %v6378_v2 = vmax.f32 %v6102_v55, %v3019_v56  ;;  %v6393_v55 = vmax.f32 %v6110_v26, %v3029_v19 }
 0x1f1   :  { %v3025_v14 = vpop.permute.xlu0 %3024 }
 0x1f2   :  { %v3027_v18 = vpop.permute.xlu1 %3026 }
 0x1f3   :  { %3360 = vrot.lane.b32.xlu0 %v6365_v21, %s5195_s20 }
 0x1f4   :  { %3362 = vrot.lane.b32.xlu1 %v6368_v24, %s5195_s20 }
 0x1f5   :  { %v3037_v13 = vpop.permute.xlu0 %3036 }
 0x1f6   :  { %v3039_v20 = vpop.permute.xlu1 %3038  ;;  %v6413_v22 = vmax.f32 %v6126_v25, %v3037_v13 }
 0x1f7   :  { %3356 = vrot.lane.b32.xlu0 %v6375_v6, %s5195_s20  ;;  %v6416_v53 = vmax.f32 %v6132_v35, %v3039_v20 }
 0x1f8   :  { %3358 = vrot.lane.b32.xlu1 %v6378_v2, %s5195_s20 }
 0x1f9   :  { %v3033_v51 = vpop.permute.xlu0 %3032 }
 0x1fa   :  { %v3035_v49 = vpop.permute.xlu1 %3034 }
 0x1fb   :  { %3140 = vrot.lane.b32.xlu0 %v6346_v16, %s5194_s0 }
 0x1fc   :  { %3142 = vrot.lane.b32.xlu1 %v6352_v36, %s5194_s0  ;;  %v6403_v36 = vmax.f32 %v6114_v23, %v3025_v14 }
 0x1fd   :  { %v3045_v59 = vpop.permute.xlu0 %3044 }
 0x1fe   :  { %v3047_v38 = vpop.permute.xlu1 %3046  ;;  %v6433_v35 = vmax.f32 %v6142_v17, %v3045_v59 }
 0x1ff   :  { %3136 = vrot.lane.b32.xlu0 %v6350_v31, %s5194_s0  ;;  %v6436_v20 = vmax.f32 %v6148_v62, %v3047_v38 }
 0x200   :  { %3138 = vrot.lane.b32.xlu1 %v6354_v1, %s5194_s0  ;;  %v6406_v1 = vmax.f32 %v6118_v34, %v3027_v18  ;;  %v6423_v34 = vmax.f32 %v6130_v50, %v3033_v51  ;;  %v6426_v18 = vmax.f32 %v6134_v10, %v3035_v49 }
 0x201   :  { %v3041_v56 = vpop.permute.xlu0 %3040 }
 0x202   :  { %v3043_v4 = vpop.permute.xlu1 %3042  ;;  %v6443_v10 = vmax.f32 %v6146_v27, %v3041_v56 }
 0x203   :  { %3368 = vrot.lane.b32.xlu0 %v6393_v55, %s5195_s20  ;;  %v6446_v49 = vmax.f32 %v6150_v30, %v3043_v4 }
 0x204   :  { %3370 = vrot.lane.b32.xlu1 %v6396_v28, %s5195_s20 }
 0x205   :  { %v3053_v16 = vpop.permute.xlu0 %3052 }
 0x206   :  { %v3055_v26 = vpop.permute.xlu1 %3054  ;;  %v6453_v62 = vmax.f32 %v6158_v37, %v3053_v16 }
 0x207   :  { %3364 = vrot.lane.b32.xlu0 %v6403_v36, %s5195_s20  ;;  %v6456_v38 = vmax.f32 %v6164_v42, %v3055_v26 }
 0x208   :  { %3366 = vrot.lane.b32.xlu1 %v6406_v1, %s5195_s20 }
 0x209   :  { %v3049_v19 = vpop.permute.xlu0 %3048 }
 0x20a   :  { %v3051_v23 = vpop.permute.xlu1 %3050  ;;  %v6463_v30 = vmax.f32 %v6162_v5, %v3049_v19 }
 0x20b   :  { %3376 = vrot.lane.b32.xlu0 %v6413_v22, %s5195_s20  ;;  %v6466_v56 = vmax.f32 %v6166_v9, %v3051_v23 }
 0x20c   :  { %3378 = vrot.lane.b32.xlu1 %v6416_v53, %s5195_s20 }
 0x20d   :  { %v3061_v14 = vpop.permute.xlu0 %3060 }
 0x20e   :  { %v3063_v25 = vpop.permute.xlu1 %3062  ;;  %v6473_v42 = vmax.f32 %v6174_v54, %v3061_v14 }
 0x20f   :  { %3372 = vrot.lane.b32.xlu0 %v6423_v34, %s5195_s20  ;;  %v6476_v26 = vmax.f32 %v6180_v11, %v3063_v25 }
 0x210   :  { %3374 = vrot.lane.b32.xlu1 %v6426_v18, %s5195_s20 }
 0x211   :  { %v3057_v13 = vpop.permute.xlu0 %3056 }
 0x212   :  { %v3059_v50 = vpop.permute.xlu1 %3058  ;;  %v6483_v9 = vmax.f32 %v6178_v52, %v3057_v13 }
 0x213   :  { %3384 = vrot.lane.b32.xlu0 %v6433_v35, %s5195_s20  ;;  %v6486_v23 = vmax.f32 %v6182_v48, %v3059_v50 }
 0x214   :  { %3386 = vrot.lane.b32.xlu1 %v6436_v20, %s5195_s20 }
 0x215   :  { %v3069_v51 = vpop.permute.xlu0 %3068 }
 0x216   :  { %v3071_v17 = vpop.permute.xlu1 %3070  ;;  %v6493_v11 = vmax.f32 %v6190_v3, %v3069_v51 }
 0x217   :  { %3380 = vrot.lane.b32.xlu0 %v6443_v10, %s5195_s20  ;;  %v6496_v25 = vmax.f32 %v6196_v8, %v3071_v17 }
 0x218   :  { %3382 = vrot.lane.b32.xlu1 %v6446_v49, %s5195_s20 }
 0x219   :  { %v3065_v59 = vpop.permute.xlu0 %3064 }
 0x21a   :  { %v3067_v27 = vpop.permute.xlu1 %3066  ;;  %v6503_v48 = vmax.f32 %v6194_v29, %v3065_v59 }
 0x21b   :  { %3392 = vrot.lane.b32.xlu0 %v6453_v62, %s5195_s20  ;;  %v6506_v50 = vmax.f32 %v6198_v41, %v3067_v27 }
 0x21c   :  { %3394 = vrot.lane.b32.xlu1 %v6456_v38, %s5195_s20 }
 0x21d   :  { %v3077_v4 = vpop.permute.xlu0 %3076 }
 0x21e   :  { %v3079_v37 = vpop.permute.xlu1 %3078  ;;  %v6513_v8 = vmax.f32 %v6206_v15, %v3077_v4 }
 0x21f   :  { %3388 = vrot.lane.b32.xlu0 %v6463_v30, %s5195_s20  ;;  %v6516_v17 = vmax.f32 %v6212_v12, %v3079_v37 }
 0x220   :  { %3390 = vrot.lane.b32.xlu1 %v6466_v56, %s5195_s20 }
 0x221   :  { %v3073_v16 = vpop.permute.xlu0 %3072 }
 0x222   :  { %v3075_v5 = vpop.permute.xlu1 %3074  ;;  %v6523_v41 = vmax.f32 %v6210_v47, %v3073_v16 }
 0x223   :  { %3400 = vrot.lane.b32.xlu0 %v6473_v42, %s5195_s20  ;;  %v6526_v27 = vmax.f32 %v6214_v0, %v3075_v5 }
 0x224   :  { %3402 = vrot.lane.b32.xlu1 %v6476_v26, %s5195_s20 }
 0x225   :  { %v3085_v19 = vpop.permute.xlu0 %3084 }
 0x226   :  { %v3087_v54 = vpop.permute.xlu1 %3086  ;;  %v6533_v12 = vmax.f32 %v6222_v46, %v3085_v19 }
 0x227   :  { %3396 = vrot.lane.b32.xlu0 %v6483_v9, %s5195_s20  ;;  %v6536_v37 = vmax.f32 %v6228_v58, %v3087_v54 }
 0x228   :  { %3398 = vrot.lane.b32.xlu1 %v6486_v23, %s5195_s20 }
 0x229   :  { %v3081_v14 = vpop.permute.xlu0 %3080 }
 0x22a   :  { %v3083_v52 = vpop.permute.xlu1 %3082  ;;  %v6543_v0 = vmax.f32 %v6226_v39, %v3081_v14 }
 0x22b   :  { %3408 = vrot.lane.b32.xlu0 %v6493_v11, %s5195_s20  ;;  %v6546_v5 = vmax.f32 %v6230_v57, %v3083_v52 }
 0x22c   :  { %3410 = vrot.lane.b32.xlu1 %v6496_v25, %s5195_s20 }
 0x22d   :  { %v3093_v13 = vpop.permute.xlu0 %3092  ;;  %7192 = vst [vmem:[#allocation23_spill] sm:$0xff] %v6546_v5 }
 0x22e   :  { %v3095_v3 = vpop.permute.xlu1 %3094  ;;  %v6553_v58 = vmax.f32 %v6238_v60, %v3093_v13 }
 0x22f   :  { %3404 = vrot.lane.b32.xlu0 %v6503_v48, %s5195_s20  ;;  %v6556_v54 = vmax.f32 %v6244_v63, %v3095_v3 }
 0x230   :  { %3406 = vrot.lane.b32.xlu1 %v6506_v50, %s5195_s20  ;;  %7193 = vst [vmem:[#allocation24_spill] sm:$0xff] %v6553_v58 }
 0x231   :  { %v3089_v51 = vpop.permute.xlu0 %3088  ;;  %7194 = vst [vmem:[#allocation25_spill] sm:$0xff] %v6556_v54 }
 0x232   :  { %v3091_v29 = vpop.permute.xlu1 %3090  ;;  %v6563_v57 = vmax.f32 %v6242_v45, %v3089_v51 }
 0x233   :  { %3416 = vrot.lane.b32.xlu0 %v6513_v8, %s5195_s20  ;;  %v6566_v52 = vmax.f32 %v6246_v44, %v3091_v29  ;;  %v7199_v44 = vld [vmem:[#allocation2_spill] sm:$0xff] }
 0x234   :  { %3418 = vrot.lane.b32.xlu1 %v6516_v17, %s5195_s20  ;;  %7195 = vst [vmem:[#allocation26_spill] sm:$0xff] %v6563_v57 }
 0x235   :  { %v3101_v59 = vpop.permute.xlu0 %3100  ;;  %7196 = vst [vmem:[#allocation27_spill] sm:$0xff] %v6566_v52 }
 0x236   :  { %v3103_v15 = vpop.permute.xlu1 %3102  ;;  %v6573_v63 = vmax.f32 %v6254_v32, %v3101_v59 }
 0x237   :  { %3412 = vrot.lane.b32.xlu0 %v6523_v41, %s5195_s20  ;;  %v6576_v3 = vmax.f32 %v6260_v43, %v3103_v15  ;;  %v7203_v43 = vld [vmem:[#allocation4_spill] sm:$0xff] }
 0x238   :  { %3414 = vrot.lane.b32.xlu1 %v6526_v27, %s5195_s20  ;;  %7197 = vst [vmem:[#allocation28_spill] sm:$0xff] %v6573_v63 }
 0x239   :  { %v3097_v4 = vpop.permute.xlu0 %3096  ;;  %7198 = vst [vmem:[#allocation29_spill] sm:$0xff] %v6576_v3 }
 0x23a   :  { %v3099_v47 = vpop.permute.xlu1 %3098  ;;  %v6583_v51 = vmax.f32 %v7199_v44, %v3097_v4  ;;  %v6608_v44 = vld [vmem:[%s7107_s2] ss:$0 sm:$0xff] }
 0x23b   :  { %3424 = vrot.lane.b32.xlu0 %v6533_v12, %s5195_s20 }
 0x23c   :  { %3426 = vrot.lane.b32.xlu1 %v6536_v37, %s5195_s20  ;;  %7200 = vst [vmem:[#allocation2_spill] sm:$0xff] %v6583_v51 }
 0x23d   :  { %v3109_v16 = vpop.permute.xlu0 %3108 }
 0x23e   :  { %v3111_v46 = vpop.permute.xlu1 %3110  ;;  %v6593_v59 = vmax.f32 %v7203_v43, %v3109_v16  ;;  %v7208_v43 = vld [vmem:[#allocation6_spill] sm:$0xff] }
 0x23f   :  { %3420 = vrot.lane.b32.xlu0 %v6543_v0, %s5195_s20 }
 0x240   :  { %3422 = vrot.lane.b32.xlu1 %v6546_v5, %s5195_s20  ;;  %7204 = vst [vmem:[#allocation4_spill] sm:$0xff] %v6593_v59 }
 0x241   :  { %v3105_v19 = vpop.permute.xlu0 %3104 }
 0x242   :  { %v3107_v39 = vpop.permute.xlu1 %3106 }
 0x243   :  { %3432 = vrot.lane.b32.xlu0 %v6553_v58, %s5195_s20 }
 0x244   :  { %3434 = vrot.lane.b32.xlu1 %v6556_v54, %s5195_s20  ;;  %v7211_v54 = vld [vmem:[#allocation17_spill] sm:$0xff] }
 0x245   :  { %v3117_v14 = vpop.permute.xlu0 %3116 }
 0x246   :  { %v3119_v60 = vpop.permute.xlu1 %3118 }
 0x247   :  { %3428 = vrot.lane.b32.xlu0 %v6563_v57, %s5195_s20  ;;  %v7201_v57 = vld [vmem:[#allocation3_spill] sm:$0xff] }
 0x248   :  { %3430 = vrot.lane.b32.xlu1 %v6566_v52, %s5195_s20  ;;  %v6586_v52 = vmax.f32 %v7201_v57, %v3099_v47  ;;  %v7207_v47 = vld [vmem:[#allocation5_spill] sm:$0xff] }
 0x249   :  { %v3113_v13 = vpop.permute.xlu0 %3112  ;;  %v6603_v57 = vmax.f32 %v7207_v47, %v3105_v19  ;;  %v7212_v47 = vld [vmem:[#allocation9_spill] sm:$0xff] }
 0x24a   :  { %v3115_v45 = vpop.permute.xlu1 %3114  ;;  %7202 = vst [vmem:[#allocation3_spill] sm:$0xff] %v6586_v52 }
 0x24b   :  { %3440 = vrot.lane.b32.xlu0 %v6573_v63, %s5195_s20  ;;  %v7205_v63 = vld [vmem:[#allocation7_spill] sm:$0xff] }
 0x24c   :  { %3442 = vrot.lane.b32.xlu1 %v6576_v3, %s5195_s20  ;;  %v6596_v3 = vmax.f32 %v7205_v63, %v3111_v46  ;;  %v7210_v46 = vld [vmem:[#allocation16_spill] sm:$0xff] }
 0x24d   :  { %v3125_v29 = vpop.permute.xlu0 %3124 }
 0x24e   :  { %v3127_v32 = vpop.permute.xlu1 %3126  ;;  %7206 = vst [vmem:[#allocation7_spill] sm:$0xff] %v6596_v3 }
 0x24f   :  { %3436 = vrot.lane.b32.xlu0 %v6583_v51, %s5195_s20 }
 0x250   :  { %3438 = vrot.lane.b32.xlu1 %v6586_v52, %s5195_s20  ;;  %v6611_v52 = vmax.f32 %v7208_v43, %v3107_v39  ;;  %v7213_v43 = vld [vmem:[#allocation10_spill] sm:$0xff] }
 0x251   :  { %v3121_v15 = vpop.permute.xlu0 %3120  ;;  %v6625_v5 = vmax.f32 %v7213_v43, %v3119_v60 }
 0x252   :  { %v3123_v4 = vpop.permute.xlu1 %3122  ;;  %7209 = vst [vmem:[#allocation5_spill] sm:$0xff] %v6611_v52 }
 0x253   :  { %3448 = vrot.lane.b32.xlu0 %v6593_v59, %s5195_s20 }
 0x254   :  { %3450 = vrot.lane.b32.xlu1 %v6596_v3, %s5195_s20  ;;  %v6621_v3 = vmax.f32 %v7212_v47, %v3117_v14 }
 0x255   :  { %v3353_v16 = vpop.permute.xlu0 %3352 }
 0x256   :  { %v3554_v63 = vmax.f32 %v7210_v46, %v3353_v16  ;;  %v3355_v51 = vpop.permute.xlu1 %3354 }
 0x257   :  { %v3555_v59 = vmax.f32 %v7211_v54, %v3355_v51  ;;  %3444 = vrot.lane.b32.xlu0 %v6603_v57, %s5195_s20 }
 0x258   :  { %v3629_v19 = vadd.f32 %v6608_v44, %v3554_v63  ;;  %3446 = vrot.lane.b32.xlu1 %v6611_v52, %s5195_s20 }
 0x259   :  { %v3630_v58 = vadd.f32 %v6608_v44, %v3555_v59  ;;  %v3349_v39 = vpop.permute.xlu0 %3348  ;;  %v7214_v59 = vld [vmem:[#allocation8_spill] sm:$0xff] }
 0x25a   :  { %v3697_v16 = vmax.f32 %v3629_v19, 0.0  ;;  %v3552_v54 = vmax.f32 %v6339_v7, %v3349_v39  ;;  %v3351_v51 = vpop.permute.xlu1 %3350  ;;  %v6635_v60 = vmax.f32 %v7214_v59, %v3113_v13  ;;  %v7215_v39 = vld [vmem:[#allocation11_spill] sm:$0xff] }
 0x25b   :  { %v3698_v46 = vmax.f32 %v3630_v58, 0.0  ;;  %v3553_v63 = vmax.f32 %v6342_v33, %v3351_v51  ;;  %3456 = vrot.lane.b32.xlu0 %v6621_v3, %s5195_s20  ;;  %v6639_v58 = vmax.f32 %v7215_v39, %v3115_v45  ;;  %v7216_v45 = vld [vmem:[#allocation12_spill] sm:$0xff] }
 0x25c   :  { %v4396_v52 = vpack.c.bf16 %v3697_v16, %v3697_v16  ;;  %v3627_v14 = vadd.f32 %v6608_v44, %v3552_v54  ;;  %3458 = vrot.lane.b32.xlu1 %v6625_v5, %s5195_s20  ;;  %v6654_v54 = vmax.f32 %v7216_v45, %v3125_v29  ;;  %v7218_v29 = vld [vmem:[#allocation13_spill] sm:$0xff] }
 0x25d   :  { %v4397_v19 = vpack.c.bf16 %v3698_v46, %v3698_v46  ;;  %v3628_v7 = vadd.f32 %v6608_v44, %v3553_v63  ;;  %v3133_v47 = vpop.permute.xlu0 %3132  ;;  %v7217_v46 = vld [vmem:[#allocation14_spill] sm:$0xff] }
 0x25e   :  { %4038 = vst.msk [vmem:[%s7108_s3 + $0x8] sm:$0xf] %vm4035_vm5, %v4396_v52  ;;  %v3695_v33 = vmax.f32 %v3627_v14, 0.0  ;;  %v3135_v43 = vpop.permute.xlu1 %3134  ;;  %v6657_v63 = vmax.f32 %v7217_v46, %v3127_v32  ;;  %v6672_v32 = vmax.f32 %v7218_v29, %v3121_v15  ;;  %v6685_v15 = vmax.f32 %v6318_v61, %v3133_v47  ;;  %v7220_v47 = vld [vmem:[#allocation18_spill] sm:$0xff] }
 0x25f   :  { %4039 = vst.msk [vmem:[%s7108_s3 + $0xc] sm:$0xf] %vm4035_vm5, %v4397_v19  ;;  %v3696_v13 = vmax.f32 %v3628_v7, 0.0  ;;  %3452 = vrot.lane.b32.xlu0 %v6635_v60, %s5195_s20  ;;  %v7219_v19 = vld [vmem:[#allocation15_spill] sm:$0xff] }
 0x260   :  { %v4394_v16 = vpack.c.bf16 %v3695_v33, %v3695_v33  ;;  %3454 = vrot.lane.b32.xlu1 %v6639_v58, %s5195_s20  ;;  %v6675_v7 = vmax.f32 %v7219_v19, %v3123_v4 }
 0x261   :  { %v4395_v51 = vpack.c.bf16 %v3696_v13, %v3696_v13  ;;  %v3129_v52 = vpop.permute.xlu0 %3128 }
 0x262   :  { %4036 = vst.msk [vmem:[%s7108_s3] sm:$0xf] %vm4035_vm5, %v4394_v16  ;;  %v3131_v14 = vpop.permute.xlu1 %3130 }
 0x263   :  { %4037 = vst.msk [vmem:[%s7108_s3 + $0x4] sm:$0xf] %vm4035_vm5, %v4395_v51  ;;  %3464 = vrot.lane.b32.xlu0 %v6654_v54, %s5195_s20  ;;  %v6689_v51 = vmax.f32 %v6330_v40, %v3135_v43 }
 0x264   :  { %3466 = vrot.lane.b32.xlu1 %v6657_v63, %s5195_s20 }
 0x265   :  { %v3361_v59 = vpop.permute.xlu0 %3360 }
 0x266   :  { %v3558_v39 = vmax.f32 %v6365_v21, %v3361_v59  ;;  %v3363_v33 = vpop.permute.xlu1 %3362 }
 0x267   :  { %v3559_v13 = vmax.f32 %v6368_v24, %v3363_v33  ;;  %3460 = vrot.lane.b32.xlu0 %v6672_v32, %s5195_s20  ;;  %v7221_v33 = vld [vmem:[#allocation19_spill] sm:$0xff] }
 0x268   :  { %v3633_v16 = vadd.f32 %v6608_v44, %v3558_v39  ;;  %3462 = vrot.lane.b32.xlu1 %v6675_v7, %s5195_s20  ;;  %v6699_v39 = vmax.f32 %v7220_v47, %v3129_v52 }
 0x269   :  { %v3634_v45 = vadd.f32 %v6608_v44, %v3559_v13  ;;  %v3357_v4 = vpop.permute.xlu0 %3356  ;;  %v6703_v13 = vmax.f32 %v7221_v33, %v3131_v14 }
 0x26a   :  { %v3701_v21 = vmax.f32 %v3633_v16, 0.0  ;;  %v3556_v24 = vmax.f32 %v6375_v6, %v3357_v4  ;;  %v3359_v46 = vpop.permute.xlu1 %3358 }
 0x26b   :  { %v3702_v29 = vmax.f32 %v3634_v45, 0.0  ;;  %v3557_v59 = vmax.f32 %v6378_v2, %v3359_v46  ;;  %3472 = vrot.lane.b32.xlu0 %v6685_v15, %s5195_s20  ;;  %v7222_v46 = vld [vmem:[#allocation22_spill] sm:$0xff] }
 0x26c   :  { %v4400_v19 = vpack.c.bf16 %v3701_v21, %v3701_v21  ;;  %v3631_v61 = vadd.f32 %v6608_v44, %v3556_v24  ;;  %3474 = vrot.lane.b32.xlu1 %v6689_v51, %s5195_s20 }
 0x26d   :  { %v4401_v40 = vpack.c.bf16 %v3702_v29, %v3702_v29  ;;  %v3632_v43 = vadd.f32 %v6608_v44, %v3557_v59  ;;  %v3141_v6 = vpop.permute.xlu0 %3140 }
 0x26e   :  { %4042 = vst.msk [vmem:[%s7108_s3 + $0x18] sm:$0xf] %vm4035_vm5, %v4400_v19  ;;  %v3699_v2 = vmax.f32 %v3631_v61, 0.0  ;;  %v3143_v16 = vpop.permute.xlu1 %3142  ;;  %v7223_v19 = vld [vmem:[#allocation20_spill] sm:$0xff] }
 0x26f   :  { %4043 = vst.msk [vmem:[%s7108_s3 + $0x1c] sm:$0xf] %vm4035_vm5, %v4401_v40  ;;  %v3700_v52 = vmax.f32 %v3632_v43, 0.0  ;;  %3468 = vrot.lane.b32.xlu0 %v6699_v39, %s5195_s20  ;;  %v6736_v61 = vmax.f32 %v7223_v19, %v3141_v6  ;;  %v7224_v40 = vld [vmem:[#allocation21_spill] sm:$0xff] }
 0x270   :  { %v4398_v45 = vpack.c.bf16 %v3699_v2, %v3699_v2  ;;  %3470 = vrot.lane.b32.xlu1 %v6703_v13, %s5195_s20  ;;  %v6740_v43 = vmax.f32 %v7224_v40, %v3143_v16 }
 0x271   :  { %v4399_v14 = vpack.c.bf16 %v3700_v52, %v3700_v52  ;;  %v3137_v4 = vpop.permute.xlu0 %3136 }
 0x272   :  { %4040 = vst.msk [vmem:[%s7108_s3 + $0x10] sm:$0xf] %vm4035_vm5, %v4398_v45  ;;  %v6722_v21 = vmax.f32 %v6350_v31, %v3137_v4  ;;  %v3139_v24 = vpop.permute.xlu1 %3138 }
 0x273   :  { %4041 = vst.msk [vmem:[%s7108_s3 + $0x14] sm:$0xf] %vm4035_vm5, %v4399_v14  ;;  %v6729_v29 = vmax.f32 %v7222_v46, %v3139_v24 }
 0x274   :  { %3476 = vrot.lane.b32.xlu0 %v6722_v21, %s5195_s20 }
 0x275   :  { %v3369_v59 = vpop.permute.xlu0 %3368  ;;  %3478 = vrot.lane.b32.xlu1 %v6729_v29, %s5195_s20 }
 0x276   :  { %v3562_v31 = vmax.f32 %v6393_v55, %v3369_v59  ;;  %v3371_v47 = vpop.permute.xlu1 %3370 }
 0x277   :  { %v3563_v33 = vmax.f32 %v6396_v28, %v3371_v47 }
 0x278   :  { %v3637_v2 = vadd.f32 %v6608_v44, %v3562_v31  ;;  %3480 = vrot.lane.b32.xlu0 %v6736_v61, %s5195_s20 }
 0x279   :  { %v3638_v52 = vadd.f32 %v6608_v44, %v3563_v33  ;;  %v3365_v45 = vpop.permute.xlu0 %3364  ;;  %3482 = vrot.lane.b32.xlu1 %v6740_v43, %s5195_s20 }
 0x27a   :  { %v3705_v6 = vmax.f32 %v3637_v2, 0.0  ;;  %v3560_v55 = vmax.f32 %v6403_v36, %v3365_v45  ;;  %v3367_v14 = vpop.permute.xlu1 %3366 }
 0x27b   :  { %v3706_v4 = vmax.f32 %v3638_v52, 0.0  ;;  %v3561_v16 = vmax.f32 %v6406_v1, %v3367_v14 }
 0x27c   :  { %v4404_v24 = vpack.c.bf16 %v3705_v6, %v3705_v6  ;;  %v3635_v28 = vadd.f32 %v6608_v44, %v3560_v55 }
 0x27d   :  { %v4405_v46 = vpack.c.bf16 %v3706_v4, %v3706_v4  ;;  %v3636_v59 = vadd.f32 %v6608_v44, %v3561_v16  ;;  %v3377_v19 = vpop.permute.xlu0 %3376 }
 0x27e   :  { %4046 = vst.msk [vmem:[%s7108_s3 + $0x28] sm:$0xf] %vm4035_vm5, %v4404_v24  ;;  %v3703_v31 = vmax.f32 %v3635_v28, 0.0  ;;  %v3566_v47 = vmax.f32 %v6413_v22, %v3377_v19  ;;  %v3379_v36 = vpop.permute.xlu1 %3378 }
 0x27f   :  { %4047 = vst.msk [vmem:[%s7108_s3 + $0x2c] sm:$0xf] %vm4035_vm5, %v4405_v46  ;;  %v3704_v1 = vmax.f32 %v3636_v59, 0.0  ;;  %v3567_v40 = vmax.f32 %v6416_v53, %v3379_v36 }
 0x280   :  { %v4402_v33 = vpack.c.bf16 %v3703_v31, %v3703_v31  ;;  %v3641_v2 = vadd.f32 %v6608_v44, %v3566_v47 }
 0x281   :  { %v4403_v52 = vpack.c.bf16 %v3704_v1, %v3704_v1  ;;  %v3642_v45 = vadd.f32 %v6608_v44, %v3567_v40  ;;  %v3373_v6 = vpop.permute.xlu0 %3372 }
 0x282   :  { %4044 = vst.msk [vmem:[%s7108_s3 + $0x20] sm:$0xf] %vm4035_vm5, %v4402_v33  ;;  %v3709_v22 = vmax.f32 %v3641_v2, 0.0  ;;  %v3564_v55 = vmax.f32 %v6423_v34, %v3373_v6  ;;  %v3375_v14 = vpop.permute.xlu1 %3374 }
 0x283   :  { %4045 = vst.msk [vmem:[%s7108_s3 + $0x24] sm:$0xf] %vm4035_vm5, %v4403_v52  ;;  %v3710_v53 = vmax.f32 %v3642_v45, 0.0  ;;  %v3565_v4 = vmax.f32 %v6426_v18, %v3375_v14 }
 0x284   :  { %v4408_v16 = vpack.c.bf16 %v3709_v22, %v3709_v22  ;;  %v3639_v24 = vadd.f32 %v6608_v44, %v3564_v55 }
 0x285   :  { %v4409_v28 = vpack.c.bf16 %v3710_v53, %v3710_v53  ;;  %v3640_v46 = vadd.f32 %v6608_v44, %v3565_v4  ;;  %v3385_v59 = vpop.permute.xlu0 %3384 }
 0x286   :  { %4050 = vst.msk [vmem:[%s7108_s3 + $0x38] sm:$0xf] %vm4035_vm5, %v4408_v16  ;;  %v3707_v34 = vmax.f32 %v3639_v24, 0.0  ;;  %v3570_v19 = vmax.f32 %v6433_v35, %v3385_v59  ;;  %v3387_v31 = vpop.permute.xlu1 %3386 }
 0x287   :  { %4051 = vst.msk [vmem:[%s7108_s3 + $0x3c] sm:$0xf] %vm4035_vm5, %v4409_v28  ;;  %v3708_v18 = vmax.f32 %v3640_v46, 0.0  ;;  %v3571_v47 = vmax.f32 %v6436_v20, %v3387_v31 }
 0x288   :  { %v4406_v36 = vpack.c.bf16 %v3707_v34, %v3707_v34  ;;  %v3645_v1 = vadd.f32 %v6608_v44, %v3570_v19 }
 0x289   :  { %v4407_v40 = vpack.c.bf16 %v3708_v18, %v3708_v18  ;;  %v3646_v33 = vadd.f32 %v6608_v44, %v3571_v47  ;;  %v3381_v2 = vpop.permute.xlu0 %3380 }
 0x28a   :  { %4048 = vst.msk [vmem:[%s7108_s3 + $0x30] sm:$0xf] %vm4035_vm5, %v4406_v36  ;;  %v3713_v35 = vmax.f32 %v3645_v1, 0.0  ;;  %v3568_v52 = vmax.f32 %v6443_v10, %v3381_v2  ;;  %v3383_v45 = vpop.permute.xlu1 %3382 }
 0x28b   :  { %4049 = vst.msk [vmem:[%s7108_s3 + $0x34] sm:$0xf] %vm4035_vm5, %v4407_v40  ;;  %v3714_v20 = vmax.f32 %v3646_v33, 0.0  ;;  %v3569_v6 = vmax.f32 %v6446_v49, %v3383_v45 }
 0x28c   :  { %v4412_v22 = vpack.c.bf16 %v3713_v35, %v3713_v35  ;;  %v3643_v55 = vadd.f32 %v6608_v44, %v3568_v52 }
 0x28d   :  { %v4413_v14 = vpack.c.bf16 %v3714_v20, %v3714_v20  ;;  %v3644_v53 = vadd.f32 %v6608_v44, %v3569_v6  ;;  %v3393_v4 = vpop.permute.xlu0 %3392 }
 0x28e   :  { %4054 = vst.msk [vmem:[%s7108_s3 + $0x48] sm:$0xf] %vm4035_vm5, %v4412_v22  ;;  %v3711_v10 = vmax.f32 %v3643_v55, 0.0  ;;  %v3574_v16 = vmax.f32 %v6453_v62, %v3393_v4  ;;  %v3395_v24 = vpop.permute.xlu1 %3394 }
 0x28f   :  { %4055 = vst.msk [vmem:[%s7108_s3 + $0x4c] sm:$0xf] %vm4035_vm5, %v4413_v14  ;;  %v3712_v49 = vmax.f32 %v3644_v53, 0.0  ;;  %v3575_v28 = vmax.f32 %v6456_v38, %v3395_v24 }
 0x290   :  { %v4410_v46 = vpack.c.bf16 %v3711_v10, %v3711_v10  ;;  %v3649_v59 = vadd.f32 %v6608_v44, %v3574_v16 }
 0x291   :  { %v4411_v34 = vpack.c.bf16 %v3712_v49, %v3712_v49  ;;  %v3650_v19 = vadd.f32 %v6608_v44, %v3575_v28  ;;  %v3389_v31 = vpop.permute.xlu0 %3388 }
 0x292   :  { %4052 = vst.msk [vmem:[%s7108_s3 + $0x40] sm:$0xf] %vm4035_vm5, %v4410_v46  ;;  %v3717_v62 = vmax.f32 %v3649_v59, 0.0  ;;  %v3572_v18 = vmax.f32 %v6463_v30, %v3389_v31  ;;  %v3391_v47 = vpop.permute.xlu1 %3390 }
 0x293   :  { %4053 = vst.msk [vmem:[%s7108_s3 + $0x44] sm:$0xf] %vm4035_vm5, %v4411_v34  ;;  %v3718_v38 = vmax.f32 %v3650_v19, 0.0  ;;  %v3573_v36 = vmax.f32 %v6466_v56, %v3391_v47 }
 0x294   :  { %v4416_v1 = vpack.c.bf16 %v3717_v62, %v3717_v62  ;;  %v3647_v40 = vadd.f32 %v6608_v44, %v3572_v18 }
 0x295   :  { %v4417_v33 = vpack.c.bf16 %v3718_v38, %v3718_v38  ;;  %v3648_v2 = vadd.f32 %v6608_v44, %v3573_v36  ;;  %v3401_v35 = vpop.permute.xlu0 %3400 }
 0x296   :  { %4058 = vst.msk [vmem:[%s7108_s3 + $0x58] sm:$0xf] %vm4035_vm5, %v4416_v1  ;;  %v3715_v30 = vmax.f32 %v3647_v40, 0.0  ;;  %v3578_v52 = vmax.f32 %v6473_v42, %v3401_v35  ;;  %v3403_v45 = vpop.permute.xlu1 %3402 }
 0x297   :  { %4059 = vst.msk [vmem:[%s7108_s3 + $0x5c] sm:$0xf] %vm4035_vm5, %v4417_v33  ;;  %v3716_v56 = vmax.f32 %v3648_v2, 0.0  ;;  %v3579_v20 = vmax.f32 %v6476_v26, %v3403_v45 }
 0x298   :  { %v4414_v6 = vpack.c.bf16 %v3715_v30, %v3715_v30  ;;  %v3653_v22 = vadd.f32 %v6608_v44, %v3578_v52 }
 0x299   :  { %v4415_v55 = vpack.c.bf16 %v3716_v56, %v3716_v56  ;;  %v3654_v14 = vadd.f32 %v6608_v44, %v3579_v20  ;;  %v3397_v53 = vpop.permute.xlu0 %3396 }
 0x29a   :  { %4056 = vst.msk [vmem:[%s7108_s3 + $0x50] sm:$0xf] %vm4035_vm5, %v4414_v6  ;;  %v3721_v42 = vmax.f32 %v3653_v22, 0.0  ;;  %v3576_v4 = vmax.f32 %v6483_v9, %v3397_v53  ;;  %v3399_v10 = vpop.permute.xlu1 %3398 }
 0x29b   :  { %4057 = vst.msk [vmem:[%s7108_s3 + $0x54] sm:$0xf] %vm4035_vm5, %v4415_v55  ;;  %v3722_v26 = vmax.f32 %v3654_v14, 0.0  ;;  %v3577_v16 = vmax.f32 %v6486_v23, %v3399_v10 }
 0x29c   :  { %v4420_v24 = vpack.c.bf16 %v3721_v42, %v3721_v42  ;;  %v3651_v49 = vadd.f32 %v6608_v44, %v3576_v4 }
 0x29d   :  { %v4421_v28 = vpack.c.bf16 %v3722_v26, %v3722_v26  ;;  %v3652_v46 = vadd.f32 %v6608_v44, %v3577_v16  ;;  %v3409_v59 = vpop.permute.xlu0 %3408 }
 0x29e   :  { %4062 = vst.msk [vmem:[%s7108_s3 + $0x68] sm:$0xf] %vm4035_vm5, %v4420_v24  ;;  %v3719_v9 = vmax.f32 %v3651_v49, 0.0  ;;  %v3582_v34 = vmax.f32 %v6493_v11, %v3409_v59  ;;  %v3411_v19 = vpop.permute.xlu1 %3410 }
 0x29f   :  { %4063 = vst.msk [vmem:[%s7108_s3 + $0x6c] sm:$0xf] %vm4035_vm5, %v4421_v28  ;;  %v3720_v23 = vmax.f32 %v3652_v46, 0.0  ;;  %v3583_v31 = vmax.f32 %v6496_v25, %v3411_v19 }
 0x2a0   :  { %v4418_v62 = vpack.c.bf16 %v3719_v9, %v3719_v9  ;;  %v3657_v18 = vadd.f32 %v6608_v44, %v3582_v34 }
 0x2a1   :  { %v4419_v47 = vpack.c.bf16 %v3720_v23, %v3720_v23  ;;  %v3658_v38 = vadd.f32 %v6608_v44, %v3583_v31  ;;  %v3405_v36 = vpop.permute.xlu0 %3404 }
 0x2a2   :  { %4060 = vst.msk [vmem:[%s7108_s3 + $0x60] sm:$0xf] %vm4035_vm5, %v4418_v62  ;;  %v3725_v11 = vmax.f32 %v3657_v18, 0.0  ;;  %v3580_v1 = vmax.f32 %v6503_v48, %v3405_v36  ;;  %v3407_v40 = vpop.permute.xlu1 %3406  ;;  %v7225_v36 = vld [vmem:[#allocation23_spill] sm:$0xff] }
 0x2a3   :  { %4061 = vst.msk [vmem:[%s7108_s3 + $0x64] sm:$0xf] %vm4035_vm5, %v4419_v47  ;;  %v3726_v25 = vmax.f32 %v3658_v38, 0.0  ;;  %v3581_v33 = vmax.f32 %v6506_v50, %v3407_v40 }
 0x2a4   :  { %v4424_v2 = vpack.c.bf16 %v3725_v11, %v3725_v11  ;;  %v3655_v35 = vadd.f32 %v6608_v44, %v3580_v1 }
 0x2a5   :  { %v4425_v30 = vpack.c.bf16 %v3726_v25, %v3726_v25  ;;  %v3656_v52 = vadd.f32 %v6608_v44, %v3581_v33  ;;  %v3417_v45 = vpop.permute.xlu0 %3416 }
 0x2a6   :  { %4066 = vst.msk [vmem:[%s7108_s3 + $0x78] sm:$0xf] %vm4035_vm5, %v4424_v2  ;;  %v3723_v48 = vmax.f32 %v3655_v35, 0.0  ;;  %v3586_v56 = vmax.f32 %v6513_v8, %v3417_v45  ;;  %v3419_v20 = vpop.permute.xlu1 %3418  ;;  %v7226_v35 = vld [vmem:[#allocation24_spill] sm:$0xff] }
 0x2a7   :  { %4067 = vst.msk [vmem:[%s7108_s3 + $0x7c] sm:$0xf] %vm4035_vm5, %v4425_v30  ;;  %v3724_v50 = vmax.f32 %v3656_v52, 0.0  ;;  %v3587_v6 = vmax.f32 %v6516_v17, %v3419_v20 }
 0x2a8   :  { %v4422_v22 = vpack.c.bf16 %v3723_v48, %v3723_v48  ;;  %v3661_v55 = vadd.f32 %v6608_v44, %v3586_v56  ;;  %v7227_v48 = vld [vmem:[#allocation25_spill] sm:$0xff] }
 0x2a9   :  { %v4423_v14 = vpack.c.bf16 %v3724_v50, %v3724_v50  ;;  %v3662_v53 = vadd.f32 %v6608_v44, %v3587_v6  ;;  %v3413_v42 = vpop.permute.xlu0 %3412 }
 0x2aa   :  { %4064 = vst.msk [vmem:[%s7108_s3 + $0x70] sm:$0xf] %vm4035_vm5, %v4422_v22  ;;  %v3729_v8 = vmax.f32 %v3661_v55, 0.0  ;;  %v3584_v4 = vmax.f32 %v6523_v41, %v3413_v42  ;;  %v3415_v10 = vpop.permute.xlu1 %3414 }
 0x2ab   :  { %4065 = vst.msk [vmem:[%s7108_s3 + $0x74] sm:$0xf] %vm4035_vm5, %v4423_v14  ;;  %v3730_v17 = vmax.f32 %v3662_v53, 0.0  ;;  %v3585_v26 = vmax.f32 %v6526_v27, %v3415_v10  ;;  %v7228_v53 = vld [vmem:[#allocation26_spill] sm:$0xff]  ;;  %v7229_v10 = vld [vmem:[#allocation27_spill] sm:$0xff] }
 0x2ac   :  { %v4428_v16 = vpack.c.bf16 %v3729_v8, %v3729_v8  ;;  %v3659_v24 = vadd.f32 %v6608_v44, %v3584_v4 }
 0x2ad   :  { %v4429_v49 = vpack.c.bf16 %v3730_v17, %v3730_v17  ;;  %v3660_v28 = vadd.f32 %v6608_v44, %v3585_v26  ;;  %v3425_v46 = vpop.permute.xlu0 %3424 }
 0x2ae   :  { %4070 = vst.msk [vmem:[%s7108_s3 + $0x88] sm:$0xf] %vm4035_vm5, %v4428_v16  ;;  %v3727_v41 = vmax.f32 %v3659_v24, 0.0  ;;  %v3590_v59 = vmax.f32 %v6533_v12, %v3425_v46  ;;  %v3427_v9 = vpop.permute.xlu1 %3426 }
 0x2af   :  { %4071 = vst.msk [vmem:[%s7108_s3 + $0x8c] sm:$0xf] %vm4035_vm5, %v4429_v49  ;;  %v3728_v27 = vmax.f32 %v3660_v28, 0.0  ;;  %v3591_v34 = vmax.f32 %v6536_v37, %v3427_v9 }
 0x2b0   :  { %v4426_v19 = vpack.c.bf16 %v3727_v41, %v3727_v41  ;;  %v3665_v23 = vadd.f32 %v6608_v44, %v3590_v59  ;;  %v7230_v41 = vld [vmem:[#allocation28_spill] sm:$0xff] }
 0x2b1   :  { %v4427_v31 = vpack.c.bf16 %v3728_v27, %v3728_v27  ;;  %v3666_v62 = vadd.f32 %v6608_v44, %v3591_v34  ;;  %v3421_v18 = vpop.permute.xlu0 %3420  ;;  %v7231_v34 = vld [vmem:[#allocation29_spill] sm:$0xff] }
 0x2b2   :  { %4068 = vst.msk [vmem:[%s7108_s3 + $0x80] sm:$0xf] %vm4035_vm5, %v4426_v19  ;;  %v3733_v12 = vmax.f32 %v3665_v23, 0.0  ;;  %v3588_v47 = vmax.f32 %v6543_v0, %v3421_v18  ;;  %v3423_v38 = vpop.permute.xlu1 %3422 }
 0x2b3   :  { %4069 = vst.msk [vmem:[%s7108_s3 + $0x84] sm:$0xf] %vm4035_vm5, %v4427_v31  ;;  %v3734_v37 = vmax.f32 %v3666_v62, 0.0  ;;  %v3589_v11 = vmax.f32 %v7225_v36, %v3423_v38  ;;  %v7232_v38 = vld [vmem:[#allocation2_spill] sm:$0xff] }
 0x2b4   :  { %v4432_v1 = vpack.c.bf16 %v3733_v12, %v3733_v12  ;;  %v3663_v40 = vadd.f32 %v6608_v44, %v3588_v47 }
 0x2b5   :  { %v4433_v25 = vpack.c.bf16 %v3734_v37, %v3734_v37  ;;  %v3664_v33 = vadd.f32 %v6608_v44, %v3589_v11  ;;  %v3433_v2 = vpop.permute.xlu0 %3432 }
 0x2b6   :  { %4074 = vst.msk [vmem:[%s7108_s3 + $0x98] sm:$0xf] %vm4035_vm5, %v4432_v1  ;;  %v3731_v0 = vmax.f32 %v3663_v40, 0.0  ;;  %v3594_v30 = vmax.f32 %v7226_v35, %v3433_v2  ;;  %v3435_v52 = vpop.permute.xlu1 %3434  ;;  %v7233_v1 = vld [vmem:[#allocation3_spill] sm:$0xff] }
 0x2b7   :  { %4075 = vst.msk [vmem:[%s7108_s3 + $0x9c] sm:$0xf] %vm4035_vm5, %v4433_v25  ;;  %v3732_v45 = vmax.f32 %v3664_v33, 0.0  ;;  %v3595_v56 = vmax.f32 %v7227_v48, %v3435_v52  ;;  %v7234_v52 = vld [vmem:[#allocation4_spill] sm:$0xff] }
 0x2b8   :  { %v4430_v20 = vpack.c.bf16 %v3731_v0, %v3731_v0  ;;  %v3669_v50 = vadd.f32 %v6608_v44, %v3594_v30 }
 0x2b9   :  { %v4431_v6 = vpack.c.bf16 %v3732_v45, %v3732_v45  ;;  %v3670_v22 = vadd.f32 %v6608_v44, %v3595_v56  ;;  %v3429_v55 = vpop.permute.xlu0 %3428 }
 0x2ba   :  { %4072 = vst.msk [vmem:[%s7108_s3 + $0x90] sm:$0xf] %vm4035_vm5, %v4430_v20  ;;  %v3737_v14 = vmax.f32 %v3669_v50, 0.0  ;;  %v3592_v42 = vmax.f32 %v7228_v53, %v3429_v55  ;;  %v3431_v8 = vpop.permute.xlu1 %3430  ;;  %v7235_v20 = vld [vmem:[#allocation7_spill] sm:$0xff] }
 0x2bb   :  { %4073 = vst.msk [vmem:[%s7108_s3 + $0x94] sm:$0xf] %vm4035_vm5, %v4431_v6  ;;  %v3738_v4 = vmax.f32 %v3670_v22, 0.0  ;;  %v3593_v17 = vmax.f32 %v7229_v10, %v3431_v8 }
 0x2bc   :  { %v4436_v26 = vpack.c.bf16 %v3737_v14, %v3737_v14  ;;  %v3667_v16 = vadd.f32 %v6608_v44, %v3592_v42 }
 0x2bd   :  { %v4437_v24 = vpack.c.bf16 %v3738_v4, %v3738_v4  ;;  %v3668_v49 = vadd.f32 %v6608_v44, %v3593_v17  ;;  %v3441_v28 = vpop.permute.xlu0 %3440  ;;  %v7236_v17 = vld [vmem:[#allocation5_spill] sm:$0xff] }
 0x2be   :  { %4078 = vst.msk [vmem:[%s7108_s3 + $0xa8] sm:$0xf] %vm4035_vm5, %v4436_v26  ;;  %v3735_v46 = vmax.f32 %v3667_v16, 0.0  ;;  %v3598_v59 = vmax.f32 %v7230_v41, %v3441_v28  ;;  %v3443_v9 = vpop.permute.xlu1 %3442 }
 0x2bf   :  { %4079 = vst.msk [vmem:[%s7108_s3 + $0xac] sm:$0xf] %vm4035_vm5, %v4437_v24  ;;  %v3736_v27 = vmax.f32 %v3668_v49, 0.0  ;;  %v3599_v19 = vmax.f32 %v7231_v34, %v3443_v9 }
 0x2c0   :  { %v4434_v23 = vpack.c.bf16 %v3735_v46, %v3735_v46  ;;  %v3673_v31 = vadd.f32 %v6608_v44, %v3598_v59 }
 0x2c1   :  { %v4435_v62 = vpack.c.bf16 %v3736_v27, %v3736_v27  ;;  %v3674_v18 = vadd.f32 %v6608_v44, %v3599_v19  ;;  %v3437_v12 = vpop.permute.xlu0 %3436 }
 0x2c2   :  { %4076 = vst.msk [vmem:[%s7108_s3 + $0xa0] sm:$0xf] %vm4035_vm5, %v4434_v23  ;;  %v3741_v47 = vmax.f32 %v3673_v31, 0.0  ;;  %v3596_v37 = vmax.f32 %v7232_v38, %v3437_v12  ;;  %v3439_v36 = vpop.permute.xlu1 %3438 }
 0x2c3   :  { %4077 = vst.msk [vmem:[%s7108_s3 + $0xa4] sm:$0xf] %vm4035_vm5, %v4435_v62  ;;  %v3742_v11 = vmax.f32 %v3674_v18, 0.0  ;;  %v3597_v40 = vmax.f32 %v7233_v1, %v3439_v36 }
 0x2c4   :  { %v4440_v25 = vpack.c.bf16 %v3741_v47, %v3741_v47  ;;  %v3671_v33 = vadd.f32 %v6608_v44, %v3596_v37 }
 0x2c5   :  { %v4441_v2 = vpack.c.bf16 %v3742_v11, %v3742_v11  ;;  %v3672_v0 = vadd.f32 %v6608_v44, %v3597_v40  ;;  %v3449_v35 = vpop.permute.xlu0 %3448 }
 0x2c6   :  { %4082 = vst.msk [vmem:[%s7108_s3 + $0xb8] sm:$0xf] %vm4035_vm5, %v4440_v25  ;;  %v3739_v30 = vmax.f32 %v3671_v33, 0.0  ;;  %v3602_v45 = vmax.f32 %v7234_v52, %v3449_v35  ;;  %v3451_v48 = vpop.permute.xlu1 %3450 }
 0x2c7   :  { %4083 = vst.msk [vmem:[%s7108_s3 + $0xbc] sm:$0xf] %vm4035_vm5, %v4441_v2  ;;  %v3740_v56 = vmax.f32 %v3672_v0, 0.0  ;;  %v3603_v50 = vmax.f32 %v7235_v20, %v3451_v48 }
 0x2c8   :  { %v4438_v6 = vpack.c.bf16 %v3739_v30, %v3739_v30  ;;  %v3677_v22 = vadd.f32 %v6608_v44, %v3602_v45 }
 0x2c9   :  { %v4439_v55 = vpack.c.bf16 %v3740_v56, %v3740_v56  ;;  %v3678_v14 = vadd.f32 %v6608_v44, %v3603_v50  ;;  %v3445_v53 = vpop.permute.xlu0 %3444 }
 0x2ca   :  { %4080 = vst.msk [vmem:[%s7108_s3 + $0xb0] sm:$0xf] %vm4035_vm5, %v4438_v6  ;;  %v3745_v42 = vmax.f32 %v3677_v22, 0.0  ;;  %v3600_v8 = vmax.f32 %v6603_v57, %v3445_v53  ;;  %v3447_v4 = vpop.permute.xlu1 %3446 }
 0x2cb   :  { %4081 = vst.msk [vmem:[%s7108_s3 + $0xb4] sm:$0xf] %vm4035_vm5, %v4439_v55  ;;  %v3746_v10 = vmax.f32 %v3678_v14, 0.0  ;;  %v3601_v26 = vmax.f32 %v7236_v17, %v3447_v4 }
 0x2cc   :  { %v4444_v16 = vpack.c.bf16 %v3745_v42, %v3745_v42  ;;  %v3675_v24 = vadd.f32 %v6608_v44, %v3600_v8 }
 0x2cd   :  { %v4445_v49 = vpack.c.bf16 %v3746_v10, %v3746_v10  ;;  %v3676_v28 = vadd.f32 %v6608_v44, %v3601_v26  ;;  %v3457_v46 = vpop.permute.xlu0 %3456 }
 0x2ce   :  { %4086 = vst.msk [vmem:[%s7108_s3 + $0xc8] sm:$0xf] %vm4035_vm5, %v4444_v16  ;;  %v3743_v57 = vmax.f32 %v3675_v24, 0.0  ;;  %v3606_v41 = vmax.f32 %v6621_v3, %v3457_v46  ;;  %v3459_v59 = vpop.permute.xlu1 %3458 }
 0x2cf   :  { %4087 = vst.msk [vmem:[%s7108_s3 + $0xcc] sm:$0xf] %vm4035_vm5, %v4445_v49  ;;  %v3744_v9 = vmax.f32 %v3676_v28, 0.0  ;;  %v3607_v27 = vmax.f32 %v6625_v5, %v3459_v59 }
 0x2d0   :  { %v4442_v34 = vpack.c.bf16 %v3743_v57, %v3743_v57  ;;  %v3681_v19 = vadd.f32 %v6608_v44, %v3606_v41 }
 0x2d1   :  { %v4443_v23 = vpack.c.bf16 %v3744_v9, %v3744_v9  ;;  %v3682_v31 = vadd.f32 %v6608_v44, %v3607_v27  ;;  %v3453_v62 = vpop.permute.xlu0 %3452 }
 0x2d2   :  { %4084 = vst.msk [vmem:[%s7108_s3 + $0xc0] sm:$0xf] %vm4035_vm5, %v4442_v34  ;;  %v3749_v3 = vmax.f32 %v3681_v19, 0.0  ;;  %v3604_v18 = vmax.f32 %v6635_v60, %v3453_v62  ;;  %v3455_v12 = vpop.permute.xlu1 %3454 }
 0x2d3   :  { %4085 = vst.msk [vmem:[%s7108_s3 + $0xc4] sm:$0xf] %vm4035_vm5, %v4443_v23  ;;  %v3750_v5 = vmax.f32 %v3682_v31, 0.0  ;;  %v3605_v47 = vmax.f32 %v6639_v58, %v3455_v12 }
 0x2d4   :  { %v4448_v38 = vpack.c.bf16 %v3749_v3, %v3749_v3  ;;  %v3679_v37 = vadd.f32 %v6608_v44, %v3604_v18 }
 0x2d5   :  { %v4449_v36 = vpack.c.bf16 %v3750_v5, %v3750_v5  ;;  %v3680_v11 = vadd.f32 %v6608_v44, %v3605_v47  ;;  %v3465_v1 = vpop.permute.xlu0 %3464 }
 0x2d6   :  { %4090 = vst.msk [vmem:[%s7108_s3 + $0xd8] sm:$0xf] %vm4035_vm5, %v4448_v38  ;;  %v3747_v60 = vmax.f32 %v3679_v37, 0.0  ;;  %v3610_v40 = vmax.f32 %v6654_v54, %v3465_v1  ;;  %v3467_v25 = vpop.permute.xlu1 %3466 }
 0x2d7   :  { %4091 = vst.msk [vmem:[%s7108_s3 + $0xdc] sm:$0xf] %vm4035_vm5, %v4449_v36  ;;  %v3748_v58 = vmax.f32 %v3680_v11, 0.0  ;;  %v3611_v33 = vmax.f32 %v6657_v63, %v3467_v25 }
 0x2d8   :  { %v4446_v2 = vpack.c.bf16 %v3747_v60, %v3747_v60  ;;  %v3685_v0 = vadd.f32 %v6608_v44, %v3610_v40 }
 0x2d9   :  { %v4447_v35 = vpack.c.bf16 %v3748_v58, %v3748_v58  ;;  %v3686_v30 = vadd.f32 %v6608_v44, %v3611_v33  ;;  %v3461_v52 = vpop.permute.xlu0 %3460 }
 0x2da   :  { %4088 = vst.msk [vmem:[%s7108_s3 + $0xd0] sm:$0xf] %vm4035_vm5, %v4446_v2  ;;  %v3753_v54 = vmax.f32 %v3685_v0, 0.0  ;;  %v3608_v45 = vmax.f32 %v6672_v32, %v3461_v52  ;;  %v3463_v48 = vpop.permute.xlu1 %3462 }
 0x2db   :  { %4089 = vst.msk [vmem:[%s7108_s3 + $0xd4] sm:$0xf] %vm4035_vm5, %v4447_v35  ;;  %v3754_v63 = vmax.f32 %v3686_v30, 0.0  ;;  %v3609_v56 = vmax.f32 %v6675_v7, %v3463_v48 }
 0x2dc   :  { %v4452_v20 = vpack.c.bf16 %v3753_v54, %v3753_v54  ;;  %v3683_v50 = vadd.f32 %v6608_v44, %v3608_v45 }
 0x2dd   :  { %v4453_v6 = vpack.c.bf16 %v3754_v63, %v3754_v63  ;;  %v3684_v22 = vadd.f32 %v6608_v44, %v3609_v56  ;;  %v3473_v55 = vpop.permute.xlu0 %3472 }
 0x2de   :  { %4094 = vst.msk [vmem:[%s7108_s3 + $0xe8] sm:$0xf] %vm4035_vm5, %v4452_v20  ;;  %v3751_v32 = vmax.f32 %v3683_v50, 0.0  ;;  %v3614_v14 = vmax.f32 %v6685_v15, %v3473_v55  ;;  %v3475_v53 = vpop.permute.xlu1 %3474 }
 0x2df   :  { %4095 = vst.msk [vmem:[%s7108_s3 + $0xec] sm:$0xf] %vm4035_vm5, %v4453_v6  ;;  %v3752_v7 = vmax.f32 %v3684_v22, 0.0  ;;  %v3615_v42 = vmax.f32 %v6689_v51, %v3475_v53 }
 0x2e0   :  { %v4450_v8 = vpack.c.bf16 %v3751_v32, %v3751_v32  ;;  %v3689_v4 = vadd.f32 %v6608_v44, %v3614_v14 }
 0x2e1   :  { %v4451_v10 = vpack.c.bf16 %v3752_v7, %v3752_v7  ;;  %v3690_v17 = vadd.f32 %v6608_v44, %v3615_v42  ;;  %v3469_v26 = vpop.permute.xlu0 %3468 }
 0x2e2   :  { %4092 = vst.msk [vmem:[%s7108_s3 + $0xe0] sm:$0xf] %vm4035_vm5, %v4450_v8  ;;  %v3757_v15 = vmax.f32 %v3689_v4, 0.0  ;;  %v3612_v16 = vmax.f32 %v6699_v39, %v3469_v26  ;;  %v3471_v24 = vpop.permute.xlu1 %3470 }
 0x2e3   :  { %4093 = vst.msk [vmem:[%s7108_s3 + $0xe4] sm:$0xf] %vm4035_vm5, %v4451_v10  ;;  %v3758_v51 = vmax.f32 %v3690_v17, 0.0  ;;  %v3613_v49 = vmax.f32 %v6703_v13, %v3471_v24 }
 0x2e4   :  { %v4456_v28 = vpack.c.bf16 %v3757_v15, %v3757_v15  ;;  %v3687_v46 = vadd.f32 %v6608_v44, %v3612_v16 }
 0x2e5   :  { %v4457_v57 = vpack.c.bf16 %v3758_v51, %v3758_v51  ;;  %v3688_v41 = vadd.f32 %v6608_v44, %v3613_v49 }
 0x2e6   :  { %4098 = vst.msk [vmem:[%s7108_s3 + $0xf8] sm:$0xf] %vm4035_vm5, %v4456_v28  ;;  %v3755_v39 = vmax.f32 %v3687_v46, 0.0  ;;  %v3477_v59 = vpop.permute.xlu0 %3476 }
 0x2e7   :  { %4099 = vst.msk [vmem:[%s7108_s3 + $0xfc] sm:$0xf] %vm4035_vm5, %v4457_v57  ;;  %v3756_v9 = vmax.f32 %v3688_v41, 0.0  ;;  %v3616_v13 = vmax.f32 %v6722_v21, %v3477_v59  ;;  %v3479_v27 = vpop.permute.xlu1 %3478 }
 0x2e8   :  { %v4454_v34 = vpack.c.bf16 %v3755_v39, %v3755_v39  ;;  %v3617_v19 = vmax.f32 %v6729_v29, %v3479_v27 }
 0x2e9   :  { %v4455_v23 = vpack.c.bf16 %v3756_v9, %v3756_v9  ;;  %v3691_v31 = vadd.f32 %v6608_v44, %v3616_v13 }
 0x2ea   :  { %4096 = vst.msk [vmem:[%s7108_s3 + $0xf0] sm:$0xf] %vm4035_vm5, %v4454_v34  ;;  %v3692_v62 = vadd.f32 %v6608_v44, %v3617_v19  ;;  %v3481_v3 = vpop.permute.xlu0 %3480 }
 0x2eb   :  { %4097 = vst.msk [vmem:[%s7108_s3 + $0xf4] sm:$0xf] %vm4035_vm5, %v4455_v23  ;;  %v3759_v21 = vmax.f32 %v3691_v31, 0.0  ;;  %v3618_v18 = vmax.f32 %v6736_v61, %v3481_v3  ;;  %v3483_v29 = vpop.permute.xlu1 %3482 }
 0x2ec   :  { %v3760_v12 = vmax.f32 %v3692_v62, 0.0  ;;  %v3619_v5 = vmax.f32 %v6740_v43, %v3483_v29 }
 0x2ed   :  { %v4458_v47 = vpack.c.bf16 %v3759_v21, %v3759_v21  ;;  %v3693_v38 = vadd.f32 %v6608_v44, %v3618_v18 }
 0x2ee   :  { %v4459_v37 = vpack.c.bf16 %v3760_v12, %v3760_v12  ;;  %v3694_v36 = vadd.f32 %v6608_v44, %v3619_v5 }
 0x2ef   :  { %4100 = vst.msk [vmem:[%s7108_s3 + $0x100] sm:$0xf] %vm4035_vm5, %v4458_v47  ;;  %v3761_v11 = vmax.f32 %v3693_v38, 0.0 }
 0x2f0   :  { %4101 = vst.msk [vmem:[%s7108_s3 + $0x104] sm:$0xf] %vm4035_vm5, %v4459_v37  ;;  %v3762_v61 = vmax.f32 %v3694_v36, 0.0 }
 0x2f1   :  { %v4460_v1 = vpack.c.bf16 %v3761_v11, %v3761_v11 }
 0x2f2   :  { %v4461_v43 = vpack.c.bf16 %v3762_v61, %v3762_v61 }
 0x2f3   :  { %4102 = vst.msk [vmem:[%s7108_s3 + $0x108] sm:$0xf] %vm4035_vm5, %v4460_v1 }
 0x2f4   :  { %4103 = vst.msk [vmem:[%s7108_s3 + $0x10c] sm:$0xf] %vm4035_vm5, %v4461_v43 }

// kernel: simple_cnn_v2_forward.5
= control target key start
LH: loop header
LB: loop body
LE: loop exit
PB: predicated region body
PF: predicated region fallthrough
CT: control target
= control target key end

     0   :  { %v1838_v0 = vmov 0.0   ;;  %vm1839_vm0 = vmmov 0   ;;  %vm99_vm1 = vsmask.f32 7424  ;;  %vm200_vm2 = vcmask 523264   ;;  %s1841_s4 = smov 64   ;;  %s2517_s1 = inlined_call_operand.vmem [shape: bf16[4,64,128], index: 1, kind: input, shape index: {}]   ;;  %s2518_s0 = inlined_call_operand.vmem [shape: bf16[1,180,64], index: 0, kind: input, shape index: {}]   ;;  %s2519_s2 = inlined_call_operand.vmem [shape: f32[1,32], index: 2, kind: input, shape index: {}]   ;;  %s2520_s3 = inlined_call_operand.vmem [shape: bf16[1,144,32], index: 3, kind: output, shape index: {}]  }
   0x1   :  { %1531 = vmatprep.subr.bf16.mxu1 %v1838_v0  ;;  %1619 = vmatprep.subr.bf16.mxu0 %v1838_v0  ;;  %v1801_v1 = vld [vmem:[%s2517_s1 + $0x20] sm:$0xff]   ;;  %v1803_v3 = vld [vmem:[%s2517_s1 + $0x28] sm:$0xff]   ;;  %v1805_v5 = vld [vmem:[%s2517_s1 + $0x30] sm:$0xff]   ;;  %vm556_vm3 = vcmask 1046528   ;;  %vm763_vm4 = vsmask.f32 6400 }
   0x2   :  { %v1802_v2 = vld [vmem:[%s2517_s1 + $0x40] sm:$0xff]   ;;  %1539 = vmatprep.mubr.msk.bf16.mxu1 %vm1839_vm0, %v1838_v0  ;;  %1627 = vmatprep.mubr.msk.bf16.mxu0 %vm1839_vm0, %v1838_v0  ;;  %v1804_v4 = vld [vmem:[%s2517_s1 + $0x48] sm:$0xff]   ;;  %v1806_v6 = vld [vmem:[%s2517_s1 + $0x50] sm:$0xff]   ;;  %vm1322_vm5 = vcmask 257024  }
   0x3   :  { %1532 = vmatpush3.bf16.msra.mxu1 %v1801_v1  ;;  %1620 = vmatpush3.bf16.msra.mxu0 %v1802_v2  ;;  %v1807_v7 = vld [vmem:[%s2517_s1 + $0x38] sm:$0xff]   ;;  %v1899_v9 = vld [vmem:[%s2518_s0] sm:$0xff]   ;;  %v1904_v10 = vld [vmem:[%s2518_s0 + $0x8] sm:$0xff]  }
   0x4   :  { %1533 = vmatprep.subr.bf16.mxu1 %v1838_v0  ;;  %1621 = vmatprep.subr.bf16.mxu0 %v1838_v0  ;;  %v1808_v8 = vld [vmem:[%s2517_s1 + $0x58] sm:$0xff]   ;;  %v101_v11 = vshrl.u32 %v1899_v9, 16  ;;  %v103_v12 = vshll.u32 %v1899_v9, 16  ;;  %v108_v13 = vshll.u32 %v1904_v10, 16  ;;  %v1913_v14 = vld [vmem:[%s2518_s0 + $0x10] sm:$0xff]   ;;  %v1813_v19 = vld [vmem:[%s2517_s1] sm:$0xff]  }
   0x5   :  { %v1919_v15 = vld [vmem:[%s2518_s0 + $0x8] sm:$0xfe]   ;;  %v558_v18 = vrot.slane %v1913_v14, 1  ;;  %v1814_v21 = vld [vmem:[%s2517_s1 + $0x60] sm:$0xff]   ;;  %v1933_v23 = vld [vmem:[%s2518_s0 + $0x10] sm:$0xff]   ;;  %v112_v24 = vshrl.u32 %v1904_v10, 16 }
   0x6   :  { %v105_v16 = vrot.slane %v103_v12, 1  ;;  %v110_v17 = vrot.slane %v108_v13, 1  ;;  %v557_v20 = vrot.slane %v1919_v15, 1  ;;  %v1941_v26 = vld [vmem:[%s2518_s0 + $0x18] sm:$0xff]   ;;  %v116_v28 = vshll.u32 %v1933_v23, 16  ;;  %v1819_v33 = vld [vmem:[%s2517_s1 + $0x8] sm:$0xff]  }
   0x7   :  { %1534 = vmatpush3.bf16.msra.mxu1 %v1803_v3  ;;  %1622 = vmatpush3.bf16.msra.mxu0 %v1804_v4  ;;  %v1950_v29 = vld [vmem:[%s2518_s0 + $0x18] sm:$0xff]   ;;  %v560_v32 = vrot.slane %v1941_v26, 1  ;;  %v1820_v34 = vld [vmem:[%s2517_s1 + $0x68] sm:$0xff]   ;;  %v1966_v35 = vld [vmem:[%s2518_s0 + $0x20] sm:$0xff]   ;;  %v120_v36 = vshrl.u32 %v1933_v23, 16  ;;  %v765_v51 = vshrl.u32 %v1919_v15, 16 }
   0x8   :  { %1535 = vmatprep.subr.bf16.mxu1 %v1838_v0  ;;  %1623 = vmatprep.subr.bf16.mxu0 %v1838_v0  ;;  %v106_v22 = vor.u32 %v105_v16, %v101_v11  ;;  %v559_v25 = vsel %vm556_vm3, %v557_v20, %v558_v18  ;;  %v114_v30 = vor.u32 %v112_v24, %v110_v17  ;;  %v118_v31 = vrot.slane %v116_v28, 1  ;;  %v1974_v37 = vld [vmem:[%s2518_s0 + $0x20] sm:$0xff]   ;;  %v1982_v41 = vld [vmem:[%s2518_s0 + $0x28] sm:$0xff]   ;;  %v1825_v44 = vld [vmem:[%s2517_s1 + $0x10] sm:$0xff]  }
   0x9   :  { %v561_v39 = vsel %vm556_vm3, %v558_v18, %v560_v32  ;;  %v124_v40 = vshll.u32 %v1950_v29, 16  ;;  %v562_v42 = vrot.slane %v1966_v35, 1  ;;  %v1990_v43 = vld [vmem:[%s2518_s0 + $0x28] sm:$0xff]   ;;  %v132_v47 = vshll.u32 %v1974_v37, 16  ;;  %v1826_v49 = vld [vmem:[%s2517_s1 + $0x70] sm:$0xff]   ;;  %v2027_v60 = vld [vmem:[%s2518_s0 + $0x38] sm:$0xff]  }
   0xa   :  { %v111_v27 = vsel %vm99_vm1, %v106_v22, %v110_v17  ;;  %v119_v38 = vsel %vm99_vm1, %v114_v30, %v118_v31  ;;  %v122_v45 = vor.u32 %v120_v36, %v118_v31  ;;  %v140_v48 = vshll.u32 %v1982_v41, 16  ;;  %v2012_v53 = vld [vmem:[%s2518_s0 + $0x30] sm:$0xff]   ;;  %v1831_v61 = vld [vmem:[%s2517_s1 + $0x18] sm:$0xff]   ;;  %v2040_v4 = vld [vmem:[%s2518_s0 + $0x40] sm:$0xff]  }
   0xb   :  { %1536 = vmatpush3.bf16.msra.mxu1 %v1805_v5  ;;  %1624 = vmatpush3.bf16.msra.mxu0 %v1806_v6  ;;  %v126_v46 = vrot.slane %v124_v40, 1  ;;  %v128_v50 = vshrl.u32 %v1950_v29, 16  ;;  %v136_v52 = vshrl.u32 %v1974_v37, 16  ;;  %v564_v54 = vrot.slane %v1990_v43, 1  ;;  %v2019_v55 = vld [vmem:[%s2518_s0 + $0x30] sm:$0xff]   ;;  %v1832_v3 = vld [vmem:[%s2517_s1 + $0x78] sm:$0xff]  }
   0xc   :  { %1537 = vmatprep.subr.bf16.mxu1 %v1838_v0  ;;  %1625 = vmatprep.subr.bf16.mxu0 %v1838_v0  ;;  %v563_v57 = vsel %vm556_vm3, %v560_v32, %v562_v42  ;;  %v134_v58 = vrot.slane %v132_v47, 1  ;;  %v142_v59 = vrot.slane %v140_v48, 1  ;;  %v566_v1 = vrot.slane %v2012_v53, 1  ;;  %v2048_v6 = vld [vmem:[%s2518_s0 + $0x48] sm:$0xff]  }
   0xd   :  { %v127_v56 = vsel %vm99_vm1, %v122_v45, %v126_v46  ;;  %v130_v62 = vor.u32 %v128_v50, %v126_v46  ;;  %v144_v2 = vshrl.u32 %v1982_v41, 16  ;;  %v148_v5 = vshll.u32 %v2019_v55, 16  ;;  %v1835_v16 = vld [vmem:[%s2518_s0 + $0x48] ss:$0 sps:$4 sm:$0x11]  }
   0xe   :  { %v138_v63 = vor.u32 %v136_v52, %v134_v58  ;;  %v565_v12 = vsel %vm556_vm3, %v562_v42, %v564_v54  ;;  %v568_v13 = vrot.slane %v2027_v60, 1  ;;  %v567_v18 = vsel %vm556_vm3, %v564_v54, %v566_v1 }
   0xf   :  { %1538 = vmatpush3.bf16.msra.mxu1 %v1807_v7  ;;  %1626 = vmatpush3.bf16.msra.mxu0 %v1808_v8  ;;  %v164_v7 = vshll.u32 %v2040_v4, 16  ;;  %v168_v8 = vshrl.u32 %v2040_v4, 16  ;;  %v135_v11 = vsel %vm99_vm1, %v130_v62, %v134_v58  ;;  %v2073_v22 = vrot.slane %v148_v5, 1 }
  0x10   :  { %1575 = vmatprep.subr.bf16.mxu1 %v1838_v0  ;;  %1663 = vmatprep.subr.bf16.mxu0 %v1838_v0  ;;  %v143_v17 = vsel %vm99_vm1, %v138_v63, %v142_v59  ;;  %v172_v24 = vshll.u32 %v1835_v16, 16  ;;  %v572_v28 = vrot.slane %v2048_v6, 1  ;;  %v773_v32 = vshrl.u32 %v1913_v14, 16 }
  0x11   :  { %v2068_v20 = vrot.slane %v164_v7, 1  ;;  %v776_v36 = vshll.u32 %v1913_v14, 16  ;;  %v791_v42 = vshrl.u32 %v1966_v35, 16  ;;  %v794_v48 = vshll.u32 %v1966_v35, 16 }
  0x12   :  { %1540 = vmatmul.mubr.msk.bf16.vlgmr.msra.gmra.mrb[0].mxu1 %vm200_vm2, %v111_v27  ;;  %1628 = vmatmul.mubr.msk.bf16.vlgmr.msra.gmra.mrb[0].mxu0 %vm200_vm2, %v559_v25  ;;  %v767_v25 = vrot.slane %v765_v51, 1  ;;  %v768_v27 = vshll.u32 %v1919_v15, 16  ;;  %v775_v40 = vrot.slane %v773_v32, 1  ;;  %v785_v15 = vshll.u32 %v1941_v26, 16 }
  0x13   :  { %1576 = vmatpush3.bf16.msra.mxu1 %v1813_v19  ;;  %1664 = vmatpush3.bf16.msra.mxu0 %v1814_v21  ;;  %v2066_v19 = vor.u32 %v144_v2, %v142_v59  ;;  %v1836_v21 = vld [vmem:[%s2518_s0 + $0x50] ss:$0 sps:$4 sm:$0x11]   ;;  %v170_v30 = vor.u32 %v168_v8, %v2068_v20  ;;  %v778_v45 = vrot.slane %v776_v36, 2  ;;  %v803_v51 = vshll.u32 %v1990_v43, 16 }
  0x14   :  { %1543 = vmatprep.mubr.msk.bf16.mxu1 %vm1839_vm0, %v1838_v0  ;;  %1631 = vmatprep.mubr.msk.bf16.mxu0 %vm1839_vm0, %v1838_v0  ;;  %v574_v31 = vrot.slane %v1836_v21, 1  ;;  %v787_v47 = vrot.slane %v785_v15, 2  ;;  %v809_v52 = vshrl.u32 %v2012_v53, 16  ;;  %v812_v54 = vshll.u32 %v2012_v53, 16 }
  0x15   :  { %1577 = vmatprep.subr.bf16.mxu1 %v1838_v0  ;;  %1665 = vmatprep.subr.bf16.mxu0 %v1838_v0  ;;  %v779_v50 = vor.u32 %v778_v45, %v775_v40  ;;  %v818_v59 = vshrl.u32 %v2027_v60, 16  ;;  %v805_v62 = vrot.slane %v803_v51, 2  ;;  %v821_v7 = vshll.u32 %v2027_v60, 16  ;;  %v1837_v8 = vld [vmem:[%s2518_s0 + $0x50] ss:$0 sps:$4 sm:$0x33]  }
  0x16   :  { %v811_v63 = vrot.slane %v809_v52, 1  ;;  %v845_v40 = vshrl.u32 %v1837_v8, 16 }
  0x17   :  { %1578 = vmatpush3.bf16.msra.mxu1 %v1819_v33  ;;  %1666 = vmatpush3.bf16.msra.mxu0 %v1820_v34  ;;  %v174_v33 = vrot.slane %v172_v24, 1  ;;  %v770_v34 = vrot.slane %v768_v27, 2  ;;  %v820_v5 = vrot.slane %v818_v59, 1  ;;  %v836_v27 = vshrl.u32 %v2048_v6, 16 }
  0x18   :  { %1579 = vmatprep.subr.bf16.mxu1 %v1838_v0  ;;  %1667 = vmatprep.subr.bf16.mxu0 %v1838_v0 }
  0x19   :  { %v771_v14 = vor.u32 %v770_v34, %v767_v25  ;;  %v823_v25 = vrot.slane %v821_v7, 2  ;;  %v838_v36 = vrot.slane %v836_v27, 1 }
  0x1a   :  { %1544 = vmatmul.mubr.msk.bf16.gmra.mrb[4].mxu1 %vm200_vm2, %v119_v38  ;;  %1632 = vmatmul.mubr.msk.bf16.gmra.mrb[4].mxu0 %vm200_vm2, %v561_v39  ;;  %v782_v38 = vshrl.u32 %v1941_v26, 16  ;;  %v2084_v39 = vsel %vm556_vm3, %v572_v28, %v574_v31  ;;  %v793_v26 = vrot.slane %v791_v42, 1  ;;  %v848_v42 = vshll.u32 %v1837_v8, 16 }
  0x1b   :  { %1547 = vmatprep.mubr.msk.bf16.mxu1 %vm1839_vm0, %v1838_v0  ;;  %1635 = vmatprep.mubr.msk.bf16.mxu0 %vm1839_vm0, %v1838_v0  ;;  %v2109_v35 = vsel %vm763_vm4, %v771_v14, %v779_v50 }
  0x1c   :  { %1580 = vmatpush3.bf16.msra.mxu1 %v1825_v44  ;;  %1668 = vmatpush3.bf16.msra.mxu0 %v1826_v49  ;;  %v2091_v44 = vsel %vm99_vm1, %v170_v30, %v174_v33  ;;  %v784_v46 = vrot.slane %v782_v38, 1  ;;  %v800_v49 = vshrl.u32 %v1990_v43, 16  ;;  %v814_v43 = vrot.slane %v812_v54, 2 }
  0x1d   :  { %1581 = vmatprep.subr.bf16.mxu1 %v1838_v0  ;;  %1669 = vmatprep.subr.bf16.mxu0 %v1838_v0  ;;  %v839_v30 = vshll.u32 %v2048_v6, 16 }
  0x1e   :  { %v802_v58 = vrot.slane %v800_v49, 1  ;;  %v151_v49 = vsel %vm99_vm1, %v2066_v19, %v2073_v22 }
  0x1f   :  { %v841_v38 = vrot.slane %v839_v30, 2 }
  0x20   :  { %1582 = vmatpush3.bf16.msra.mxu1 %v1831_v61  ;;  %1670 = vmatpush3.bf16.msra.mxu0 %v1832_v3  ;;  %v2106_v61 = vld [vmem:[%s2518_s0 + $0x40] sm:$0xff]  }
  0x21   :  { %v827_v16 = vshrl.u32 %v2106_v61, 16  ;;  %v830_v21 = vshll.u32 %v2106_v61, 16  ;;  %v842_v45 = vor.u32 %v841_v38, %v838_v36  ;;  %v570_v19 = vrot.slane %v2106_v61, 1 }
  0x22   :  { %1548 = vmatmul.mubr.msk.bf16.gmra.mrb[8].mxu1 %vm200_vm2, %v127_v56  ;;  %1636 = vmatmul.mubr.msk.bf16.gmra.mrb[8].mxu0 %vm200_vm2, %v563_v57  ;;  %v788_v56 = vor.u32 %v787_v47, %v784_v46  ;;  %v796_v57 = vrot.slane %v794_v48, 2  ;;  %v847_v46 = vrot.slane %v845_v40, 1  ;;  %v152_v47 = vshrl.u32 %v2019_v55, 16 }
  0x23   :  { %1551 = vmatprep.mubr.msk.bf16.mxu1 %vm1839_vm0, %v1838_v0  ;;  %1639 = vmatprep.mubr.msk.bf16.mxu0 %vm1839_vm0, %v1838_v0  ;;  %v829_v33 = vrot.slane %v827_v16, 1  ;;  %v832_v34 = vrot.slane %v830_v21, 2  ;;  %v850_v48 = vrot.slane %v848_v42, 2  ;;  %v573_v60 = vsel %vm556_vm3, %v570_v19, %v572_v28 }
  0x24   :  { %v2112_v2 = vsel %vm763_vm4, %v779_v50, %v788_v56  ;;  %v797_v3 = vor.u32 %v796_v57, %v793_v26  ;;  %v569_v50 = vsel %vm556_vm3, %v566_v1, %v568_v13  ;;  %v154_v53 = vor.u32 %v152_v47, %v2073_v22 }
  0x25   :  { %v833_v15 = vor.u32 %v832_v34, %v829_v33  ;;  %v851_v54 = vor.u32 %v850_v48, %v847_v46 }
  0x26   :  { %v2121_v24 = vsel %vm763_vm4, %v788_v56, %v797_v3 }
  0x27   :  { %v843_v52 = vsel %vm763_vm4, %v833_v15, %v842_v45  ;;  %v852_v56 = vsel %vm763_vm4, %v842_v45, %v851_v54 }
  0x2a   :  { %1552 = vmatmul.mubr.msk.bf16.gmra.mrb[12].mxu1 %vm200_vm2, %v135_v11  ;;  %1640 = vmatmul.mubr.msk.bf16.gmra.mrb[12].mxu0 %vm200_vm2, %v565_v12  ;;  %v806_v11 = vor.u32 %v805_v62, %v802_v58  ;;  %v815_v12 = vor.u32 %v814_v43, %v811_v63  ;;  %v571_v58 = vsel %vm556_vm3, %v568_v13, %v570_v19 }
  0x2b   :  { %1555 = vmatprep.mubr.msk.bf16.mxu1 %vm1839_vm0, %v1838_v0  ;;  %1643 = vmatprep.mubr.msk.bf16.mxu0 %vm1839_vm0, %v1838_v0 }
  0x2c   :  { %v2128_v31 = vsel %vm763_vm4, %v797_v3, %v806_v11  ;;  %v2131_v32 = vsel %vm763_vm4, %v806_v11, %v815_v12 }
  0x32   :  { %1556 = vmatmul.mubr.msk.bf16.gmra.mrb[16].mxu1 %vm200_vm2, %v143_v17  ;;  %1644 = vmatmul.mubr.msk.bf16.gmra.mrb[16].mxu0 %vm200_vm2, %v567_v18  ;;  %v2140_v17 = vld [vmem:[%s2518_s0 + $0x38] sm:$0xff]   ;;  %v824_v18 = vor.u32 %v823_v25, %v820_v5  ;;  %s1840_s0 = smov 96  }
  0x33   :  { %1559 = vmatprep.mubr.msk.bf16.mxu1 %vm1839_vm0, %v1838_v0  ;;  %1647 = vmatprep.mubr.msk.bf16.mxu0 %vm1839_vm0, %v1838_v0  ;;  %v156_v51 = vshll.u32 %v2140_v17, 16  ;;  %v160_v59 = vshrl.u32 %v2140_v17, 16 }
  0x34   :  { %v825_v14 = vsel %vm763_vm4, %v815_v12, %v824_v18  ;;  %v834_v26 = vsel %vm763_vm4, %v824_v18, %v833_v15 }
  0x35   :  { %v158_v1 = vrot.slane %v156_v51, 1 }
  0x37   :  { %v159_v57 = vsel %vm99_vm1, %v154_v53, %v158_v1  ;;  %v162_v22 = vor.u32 %v160_v59, %v158_v1 }
  0x39   :  { %v167_v61 = vsel %vm99_vm1, %v162_v22, %v2068_v20 }
  0x3a   :  { %1560 = vmatmul.mubr.msk.bf16.gmra.mrb[20].mxu1 %vm200_vm2, %v151_v49  ;;  %1648 = vmatmul.mubr.msk.bf16.gmra.mrb[20].mxu0 %vm200_vm2, %v569_v50 }
  0x3b   :  { %1563 = vmatprep.mubr.msk.bf16.mxu1 %vm1839_vm0, %v1838_v0  ;;  %1651 = vmatprep.mubr.msk.bf16.mxu0 %vm1839_vm0, %v1838_v0 }
  0x42   :  { %1564 = vmatmul.mubr.msk.bf16.gmra.mrb[24].mxu1 %vm200_vm2, %v159_v57  ;;  %1652 = vmatmul.mubr.msk.bf16.gmra.mrb[24].mxu0 %vm200_vm2, %v571_v58 }
  0x43   :  { %1567 = vmatprep.mubr.msk.bf16.mxu1 %vm1839_vm0, %v1838_v0  ;;  %1655 = vmatprep.mubr.msk.bf16.mxu0 %vm1839_vm0, %v1838_v0 }
  0x4a   :  { %1568 = vmatmul.mubr.msk.bf16.gmra.mrb[28].mxu1 %vm200_vm2, %v167_v61  ;;  %1656 = vmatmul.mubr.msk.bf16.gmra.mrb[28].mxu0 %vm200_vm2, %v573_v60 }
  0x4b   :  { %1571 = vmatprep.mubr.msk.bf16.mxu1 %vm1839_vm0, %v1838_v0  ;;  %1659 = vmatprep.mubr.msk.bf16.mxu0 %vm1839_vm0, %v1838_v0 }
  0x52   :  { %1572 = vmatmul.mubr.msk.bf16.gmra.mrb[32].mxu1 %vm200_vm2, %v2091_v44  ;;  %1660 = vmatmul.mubr.msk.bf16.gmra.mrb[32].mxu0 %vm200_vm2, %v2084_v39 }
  0x53   :  { %1583 = vmatprep.mubr.msk.bf16.mxu1 %vm1839_vm0, %v1838_v0  ;;  %1671 = vmatprep.mubr.msk.bf16.mxu0 %vm1839_vm0, %v1838_v0 }
  0x5a   :  { %1584 = vmatmul.mubr.msk.bf16.vlgmr.msra.gmra.mrb[0].mxu1 %vm200_vm2, %v1899_v9  ;;  %1672 = vmatmul.mubr.msk.bf16.vlgmr.msra.gmra.mrb[0].mxu0 %vm200_vm2, %v2109_v35 }
  0x5b   :  { %1587 = vmatprep.mubr.msk.bf16.mxu1 %vm1839_vm0, %v1838_v0  ;;  %1675 = vmatprep.mubr.msk.bf16.mxu0 %vm1839_vm0, %v1838_v0 }
  0x62   :  { %1588 = vmatmul.mubr.msk.bf16.gmra.mrb[4].mxu1 %vm200_vm2, %v1904_v10  ;;  %1676 = vmatmul.mubr.msk.bf16.gmra.mrb[4].mxu0 %vm200_vm2, %v2112_v2 }
  0x63   :  { %1591 = vmatprep.mubr.msk.bf16.mxu1 %vm1839_vm0, %v1838_v0  ;;  %1679 = vmatprep.mubr.msk.bf16.mxu0 %vm1839_vm0, %v1838_v0 }
  0x6a   :  { %1592 = vmatmul.mubr.msk.bf16.gmra.mrb[8].mxu1 %vm200_vm2, %v1933_v23  ;;  %1680 = vmatmul.mubr.msk.bf16.gmra.mrb[8].mxu0 %vm200_vm2, %v2121_v24 }
  0x6b   :  { %1595 = vmatprep.mubr.msk.bf16.mxu1 %vm1839_vm0, %v1838_v0  ;;  %1683 = vmatprep.mubr.msk.bf16.mxu0 %vm1839_vm0, %v1838_v0 }
  0x72   :  { %1596 = vmatmul.mubr.msk.bf16.gmra.mrb[12].mxu1 %vm200_vm2, %v1950_v29  ;;  %1684 = vmatmul.mubr.msk.bf16.gmra.mrb[12].mxu0 %vm200_vm2, %v2128_v31 }
  0x73   :  { %1599 = vmatprep.mubr.msk.bf16.mxu1 %vm1839_vm0, %v1838_v0  ;;  %1687 = vmatprep.mubr.msk.bf16.mxu0 %vm1839_vm0, %v1838_v0 }
  0x7a   :  { %1600 = vmatmul.mubr.msk.bf16.gmra.mrb[16].mxu1 %vm200_vm2, %v1974_v37  ;;  %1688 = vmatmul.mubr.msk.bf16.gmra.mrb[16].mxu0 %vm200_vm2, %v2131_v32 }
  0x7b   :  { %1603 = vmatprep.mubr.msk.bf16.mxu1 %vm1839_vm0, %v1838_v0  ;;  %1691 = vmatprep.mubr.msk.bf16.mxu0 %vm1839_vm0, %v1838_v0 }
  0x82   :  { %1604 = vmatmul.mubr.msk.bf16.gmra.mrb[20].mxu1 %vm200_vm2, %v1982_v41  ;;  %1692 = vmatmul.mubr.msk.bf16.gmra.mrb[20].mxu0 %vm200_vm2, %v825_v14 }
  0x83   :  { %1607 = vmatprep.mubr.msk.bf16.mxu1 %vm1839_vm0, %v1838_v0  ;;  %1695 = vmatprep.mubr.msk.bf16.mxu0 %vm1839_vm0, %v1838_v0 }
  0x8a   :  { %1608 = vmatmul.mubr.msk.bf16.gmra.mrb[24].mxu1 %vm200_vm2, %v2019_v55  ;;  %1696 = vmatmul.mubr.msk.bf16.gmra.mrb[24].mxu0 %vm200_vm2, %v834_v26 }
  0x8b   :  { %1611 = vmatprep.mubr.msk.bf16.mxu1 %vm1839_vm0, %v1838_v0  ;;  %1699 = vmatprep.mubr.msk.bf16.mxu0 %vm1839_vm0, %v1838_v0 }
  0x92   :  { %1612 = vmatmul.mubr.msk.bf16.gmra.mrb[28].mxu1 %vm200_vm2, %v2140_v17  ;;  %1700 = vmatmul.mubr.msk.bf16.gmra.mrb[28].mxu0 %vm200_vm2, %v843_v52 }
  0x93   :  { %1615 = vmatprep.mubr.msk.bf16.mxu1 %vm1839_vm0, %v1838_v0  ;;  %1703 = vmatprep.mubr.msk.bf16.mxu0 %vm1839_vm0, %v1838_v0 }
  0x9a   :  { %1616 = vmatmul.mubr.msk.bf16.gmra.mrb[32].mxu1 %vm200_vm2, %v2040_v4  ;;  %1704 = vmatmul.mubr.msk.bf16.gmra.mrb[32].mxu0 %vm200_vm2, %v852_v56 }
 0x12d   :  { %v409_v9 = vpop.f32.mrb[0].mxu1  ;;  %v938_v10 = vpop.f32.mrb[0].mxu0 }
 0x12e   :  { %v2258_v23 = vadd.f32 %v938_v10, %v409_v9  ;;  %v1585_v29 = vpop.f32.mrb[1].mxu1  ;;  %v1673_v37 = vpop.f32.mrb[1].mxu0 }
 0x12f   :  { %v412_v41 = vpop.f32.mrb[2].mxu1  ;;  %v941_v55 = vpop.f32.mrb[2].mxu0 }
 0x130   :  { %v2260_v6 = vadd.f32 %v941_v55, %v412_v41  ;;  %v1674_v13 = vpop.f32.mrb[3].mxu0  ;;  %1045 = vrot.lane.b32.xlu0 %v2258_v23, %s1840_s0  ;;  %v1586_v0 = vpop.f32.mrb[3].mxu1 }
 0x134   :  { %1047 = vrot.lane.b32.xlu0 %v2260_v6, %s1840_s0 }
 0x135   :  { %v417_v4 = vpop.f32.mrb[4].mxu1  ;;  %v946_v20 = vpop.f32.mrb[4].mxu0 }
 0x136   :  { %v2266_v28 = vadd.f32 %v946_v20, %v417_v4  ;;  %v1589_v39 = vpop.f32.mrb[5].mxu1  ;;  %v1677_v44 = vpop.f32.mrb[5].mxu0 }
 0x137   :  { %v420_v35 = vpop.f32.mrb[6].mxu1  ;;  %v949_v62 = vpop.f32.mrb[6].mxu0 }
 0x138   :  { %v2268_v63 = vadd.f32 %v949_v62, %v420_v35  ;;  %v1678_v43 = vpop.f32.mrb[7].mxu0  ;;  %1049 = vrot.lane.b32.xlu1 %v2266_v28, %s1840_s0  ;;  %v1590_v2 = vpop.f32.mrb[7].mxu1 }
 0x13c   :  { %1051 = vrot.lane.b32.xlu1 %v2268_v63, %s1840_s0 }
 0x13d   :  { %v425_v3 = vpop.f32.mrb[8].mxu1  ;;  %v954_v5 = vpop.f32.mrb[8].mxu0 }
 0x13e   :  { %v2274_v7 = vadd.f32 %v954_v5, %v425_v3  ;;  %v1593_v8 = vpop.f32.mrb[9].mxu1  ;;  %v1681_v11 = vpop.f32.mrb[9].mxu0 }
 0x13f   :  { %v428_v12 = vpop.f32.mrb[10].mxu1  ;;  %v957_v16 = vpop.f32.mrb[10].mxu0 }
 0x140   :  { %v2276_v21 = vadd.f32 %v957_v16, %v428_v12  ;;  %v1682_v24 = vpop.f32.mrb[11].mxu0  ;;  %1053 = vrot.lane.b32.xlu0 %v2274_v7, %s1840_s0  ;;  %v1594_v25 = vpop.f32.mrb[11].mxu1 }
 0x142   :  { %1055 = vrot.lane.b32.xlu1 %v2276_v21, %s1840_s0 }
 0x145   :  { %v433_v27 = vpop.f32.mrb[12].mxu1  ;;  %v962_v30 = vpop.f32.mrb[12].mxu0 }
 0x146   :  { %v2282_v31 = vadd.f32 %v962_v30, %v433_v27  ;;  %v1597_v32 = vpop.f32.mrb[13].mxu1  ;;  %v1685_v33 = vpop.f32.mrb[13].mxu0 }
 0x147   :  { %v436_v34 = vpop.f32.mrb[14].mxu1  ;;  %v965_v17 = vpop.f32.mrb[14].mxu0 }
 0x148   :  { %v2284_v18 = vadd.f32 %v965_v17, %v436_v34  ;;  %v1686_v36 = vpop.f32.mrb[15].mxu0  ;;  %1057 = vrot.lane.b32.xlu0 %v2282_v31, %s1840_s0  ;;  %v1598_v38 = vpop.f32.mrb[15].mxu1 }
 0x14a   :  { %1059 = vrot.lane.b32.xlu1 %v2284_v18, %s1840_s0 }
 0x14d   :  { %v441_v40 = vpop.f32.mrb[16].mxu1  ;;  %v970_v15 = vpop.f32.mrb[16].mxu0 }
 0x14e   :  { %v2290_v42 = vadd.f32 %v970_v15, %v441_v40  ;;  %v1601_v14 = vpop.f32.mrb[17].mxu1  ;;  %v1689_v45 = vpop.f32.mrb[17].mxu0 }
 0x14f   :  { %v444_v46 = vpop.f32.mrb[18].mxu1  ;;  %v973_v47 = vpop.f32.mrb[18].mxu0 }
 0x150   :  { %v2292_v26 = vadd.f32 %v973_v47, %v444_v46  ;;  %v1690_v48 = vpop.f32.mrb[19].mxu0  ;;  %1061 = vrot.lane.b32.xlu0 %v2290_v42, %s1840_s0  ;;  %v1602_v49 = vpop.f32.mrb[19].mxu1 }
 0x152   :  { %1063 = vrot.lane.b32.xlu1 %v2292_v26, %s1840_s0 }
 0x155   :  { %v449_v50 = vpop.f32.mrb[20].mxu1  ;;  %v978_v51 = vpop.f32.mrb[20].mxu0 }
 0x156   :  { %v2298_v52 = vadd.f32 %v978_v51, %v449_v50  ;;  %v1605_v54 = vpop.f32.mrb[21].mxu1  ;;  %v1693_v56 = vpop.f32.mrb[21].mxu0 }
 0x157   :  { %v452_v53 = vpop.f32.mrb[22].mxu1  ;;  %v981_v1 = vpop.f32.mrb[22].mxu0 }
 0x158   :  { %v2300_v19 = vadd.f32 %v981_v1, %v452_v53  ;;  %v1694_v57 = vpop.f32.mrb[23].mxu0  ;;  %1065 = vrot.lane.b32.xlu0 %v2298_v52, %s1840_s0  ;;  %v1606_v58 = vpop.f32.mrb[23].mxu1 }
 0x15a   :  { %1067 = vrot.lane.b32.xlu1 %v2300_v19, %s1840_s0 }
 0x15d   :  { %v457_v59 = vpop.f32.mrb[24].mxu1  ;;  %v986_v22 = vpop.f32.mrb[24].mxu0 }
 0x15e   :  { %v2306_v61 = vadd.f32 %v986_v22, %v457_v59  ;;  %v1609_v60 = vpop.f32.mrb[25].mxu1  ;;  %v1697_v9 = vpop.f32.mrb[25].mxu0 }
 0x15f   :  { %v460_v10 = vpop.f32.mrb[26].mxu1  ;;  %v989_v29 = vpop.f32.mrb[26].mxu0 }
 0x160   :  { %v2308_v37 = vadd.f32 %v989_v29, %v460_v10  ;;  %v1698_v41 = vpop.f32.mrb[27].mxu0  ;;  %1069 = vrot.lane.b32.xlu0 %v2306_v61, %s1840_s0  ;;  %v1610_v55 = vpop.f32.mrb[27].mxu1 }
 0x162   :  { %1071 = vrot.lane.b32.xlu1 %v2308_v37, %s1840_s0 }
 0x165   :  { %v465_v13 = vpop.f32.mrb[28].mxu1  ;;  %v994_v0 = vpop.f32.mrb[28].mxu0 }
 0x166   :  { %v2314_v4 = vadd.f32 %v994_v0, %v465_v13  ;;  %v1613_v20 = vpop.f32.mrb[29].mxu1  ;;  %v1701_v39 = vpop.f32.mrb[29].mxu0 }
 0x167   :  { %v468_v44 = vpop.f32.mrb[30].mxu1  ;;  %v997_v35 = vpop.f32.mrb[30].mxu0 }
 0x168   :  { %v2316_v62 = vadd.f32 %v997_v35, %v468_v44  ;;  %v1702_v43 = vpop.f32.mrb[31].mxu0  ;;  %1073 = vrot.lane.b32.xlu0 %v2314_v4, %s1840_s0  ;;  %v1614_v2 = vpop.f32.mrb[31].mxu1 }
 0x16a   :  { %1075 = vrot.lane.b32.xlu1 %v2316_v62, %s1840_s0 }
 0x16d   :  { %v473_v3 = vpop.f32.mrb[32].mxu1  ;;  %v1002_v5 = vpop.f32.mrb[32].mxu0 }
 0x16e   :  { %v1723_v8 = vadd.f32 %v1002_v5, %v473_v3  ;;  %v1617_v11 = vpop.f32.mrb[33].mxu1  ;;  %v1705_v12 = vpop.f32.mrb[33].mxu0 }
 0x16f   :  { %v476_v16 = vpop.f32.mrb[34].mxu1  ;;  %v1005_v24 = vpop.f32.mrb[34].mxu0 }
 0x170   :  { %v1724_v25 = vadd.f32 %v1005_v24, %v476_v16  ;;  %v1706_v27 = vpop.f32.mrb[35].mxu0  ;;  %1077 = vrot.lane.b32.xlu0 %v1723_v8, %s1840_s0  ;;  %v1618_v30 = vpop.f32.mrb[35].mxu1 }
 0x172   :  { %1079 = vrot.lane.b32.xlu1 %v1724_v25, %s1840_s0 }
 0x1a2   :  { %v1046_v32 = vpop.permute.xlu0 %1045 }
 0x1a3   :  { %v1099_v33 = vmax.f32 %v2258_v23, %v1046_v32 }
 0x1a5   :  { %1135 = vrot.lane.b32.xlu0 %v1099_v33, %s1841_s4 }
 0x1a6   :  { %v1048_v34 = vpop.permute.xlu0 %1047 }
 0x1a7   :  { %v1100_v17 = vmax.f32 %v2260_v6, %v1048_v34 }
 0x1a9   :  { %1137 = vrot.lane.b32.xlu1 %v1100_v17, %s1841_s4 }
 0x1aa   :  { %v1050_v36 = vpop.permute.xlu1 %1049 }
 0x1ab   :  { %v2329_v38 = vmax.f32 %v2266_v28, %v1050_v36 }
 0x1ad   :  { %1139 = vrot.lane.b32.xlu0 %v2329_v38, %s1841_s4 }
 0x1ae   :  { %v1052_v40 = vpop.permute.xlu1 %1051 }
 0x1af   :  { %v2334_v15 = vmax.f32 %v2268_v63, %v1052_v40 }
 0x1b1   :  { %1141 = vrot.lane.b32.xlu1 %v2334_v15, %s1841_s4 }
 0x1b2   :  { %v1054_v23 = vpop.permute.xlu0 %1053 }
 0x1b3   :  { %v2339_v14 = vmax.f32 %v2274_v7, %v1054_v23 }
 0x1b4   :  { %v1056_v6 = vpop.permute.xlu1 %1055 }
 0x1b5   :  { %v2342_v45 = vmax.f32 %v2276_v21, %v1056_v6  ;;  %1143 = vrot.lane.b32.xlu0 %v2339_v14, %s1841_s4 }
 0x1b7   :  { %1145 = vrot.lane.b32.xlu1 %v2342_v45, %s1841_s4 }
 0x1ba   :  { %v1058_v28 = vpop.permute.xlu0 %1057 }
 0x1bb   :  { %v2349_v63 = vmax.f32 %v2282_v31, %v1058_v28 }
 0x1bc   :  { %v1060_v46 = vpop.permute.xlu1 %1059 }
 0x1bd   :  { %v2352_v47 = vmax.f32 %v2284_v18, %v1060_v46  ;;  %1147 = vrot.lane.b32.xlu0 %v2349_v63, %s1841_s4 }
 0x1bf   :  { %1149 = vrot.lane.b32.xlu1 %v2352_v47, %s1841_s4 }
 0x1c2   :  { %v1062_v7 = vpop.permute.xlu0 %1061 }
 0x1c3   :  { %v2359_v21 = vmax.f32 %v2290_v42, %v1062_v7 }
 0x1c4   :  { %v1064_v48 = vpop.permute.xlu1 %1063 }
 0x1c5   :  { %v2362_v49 = vmax.f32 %v2292_v26, %v1064_v48  ;;  %1151 = vrot.lane.b32.xlu0 %v2359_v21, %s1841_s4 }
 0x1c7   :  { %1153 = vrot.lane.b32.xlu1 %v2362_v49, %s1841_s4 }
 0x1ca   :  { %v1066_v31 = vpop.permute.xlu0 %1065 }
 0x1cb   :  { %v2369_v18 = vmax.f32 %v2298_v52, %v1066_v31 }
 0x1cc   :  { %v1068_v50 = vpop.permute.xlu1 %1067 }
 0x1cd   :  { %v2372_v51 = vmax.f32 %v2300_v19, %v1068_v50  ;;  %1155 = vrot.lane.b32.xlu0 %v2369_v18, %s1841_s4 }
 0x1cf   :  { %1157 = vrot.lane.b32.xlu1 %v2372_v51, %s1841_s4 }
 0x1d2   :  { %v1070_v42 = vpop.permute.xlu0 %1069 }
 0x1d3   :  { %v2379_v26 = vmax.f32 %v2306_v61, %v1070_v42  ;;  %v2409_v61 = vld [vmem:[%s2519_s2] ss:$0 sm:$0xff] }
 0x1d4   :  { %v1072_v54 = vpop.permute.xlu1 %1071 }
 0x1d5   :  { %v2382_v56 = vmax.f32 %v2308_v37, %v1072_v54  ;;  %1159 = vrot.lane.b32.xlu0 %v2379_v26, %s1841_s4 }
 0x1d7   :  { %1161 = vrot.lane.b32.xlu1 %v2382_v56, %s1841_s4 }
 0x1da   :  { %v1074_v52 = vpop.permute.xlu0 %1073 }
 0x1db   :  { %v2389_v53 = vmax.f32 %v2314_v4, %v1074_v52 }
 0x1dc   :  { %v1076_v1 = vpop.permute.xlu1 %1075 }
 0x1dd   :  { %v2392_v19 = vmax.f32 %v2316_v62, %v1076_v1  ;;  %1163 = vrot.lane.b32.xlu0 %v2389_v53, %s1841_s4 }
 0x1df   :  { %1165 = vrot.lane.b32.xlu1 %v2392_v19, %s1841_s4 }
 0x1e2   :  { %v1078_v57 = vpop.permute.xlu0 %1077 }
 0x1e3   :  { %v2398_v58 = vmax.f32 %v1723_v8, %v1078_v57 }
 0x1e4   :  { %v1080_v59 = vpop.permute.xlu1 %1079 }
 0x1e5   :  { %v2400_v22 = vmax.f32 %v1724_v25, %v1080_v59  ;;  %1167 = vrot.lane.b32.xlu0 %v2398_v58, %s1841_s4 }
 0x1e7   :  { %1169 = vrot.lane.b32.xlu1 %v2400_v22, %s1841_s4 }
 0x217   :  { %v1136_v60 = vpop.permute.xlu0 %1135 }
 0x218   :  { %v1189_v9 = vmax.f32 %v1099_v33, %v1136_v60 }
 0x21a   :  { %v1214_v10 = vadd.f32 %v2409_v61, %v1189_v9 }
 0x21b   :  { %v1138_v29 = vpop.permute.xlu1 %1137 }
 0x21c   :  { %v1232_v37 = vmax.f32 %v1214_v10, 0.0  ;;  %v1190_v41 = vmax.f32 %v1100_v17, %v1138_v29 }
 0x21e   :  { %v1461_v55 = vpack.c.bf16 %v1232_v37, %v1232_v37  ;;  %v1215_v13 = vadd.f32 %v2409_v61, %v1190_v41 }
 0x21f   :  { %v1140_v0 = vpop.permute.xlu0 %1139 }
 0x220   :  { %1323 = vst.msk [vmem:[%s2520_s3] sm:$0xf] %vm1322_vm5, %v1461_v55  ;;  %v1233_v4 = vmax.f32 %v1215_v13, 0.0  ;;  %v1191_v20 = vmax.f32 %v2329_v38, %v1140_v0 }
 0x222   :  { %v1462_v39 = vpack.c.bf16 %v1233_v4, %v1233_v4  ;;  %v1216_v44 = vadd.f32 %v2409_v61, %v1191_v20 }
 0x223   :  { %v1142_v35 = vpop.permute.xlu1 %1141 }
 0x224   :  { %1324 = vst.msk [vmem:[%s2520_s3 + $0x4] sm:$0xf] %vm1322_vm5, %v1462_v39  ;;  %v1234_v62 = vmax.f32 %v1216_v44, 0.0  ;;  %v1192_v43 = vmax.f32 %v2334_v15, %v1142_v35 }
 0x226   :  { %v1463_v2 = vpack.c.bf16 %v1234_v62, %v1234_v62  ;;  %v1217_v3 = vadd.f32 %v2409_v61, %v1192_v43 }
 0x227   :  { %v1144_v5 = vpop.permute.xlu0 %1143 }
 0x228   :  { %1325 = vst.msk [vmem:[%s2520_s3 + $0x8] sm:$0xf] %vm1322_vm5, %v1463_v2  ;;  %v1235_v8 = vmax.f32 %v1217_v3, 0.0  ;;  %v1193_v11 = vmax.f32 %v2339_v14, %v1144_v5 }
 0x229   :  { %v1146_v12 = vpop.permute.xlu1 %1145 }
 0x22a   :  { %v1464_v16 = vpack.c.bf16 %v1235_v8, %v1235_v8  ;;  %v1218_v24 = vadd.f32 %v2409_v61, %v1193_v11  ;;  %v1194_v25 = vmax.f32 %v2342_v45, %v1146_v12 }
 0x22c   :  { %1326 = vst.msk [vmem:[%s2520_s3 + $0xc] sm:$0xf] %vm1322_vm5, %v1464_v16  ;;  %v1236_v27 = vmax.f32 %v1218_v24, 0.0  ;;  %v1219_v30 = vadd.f32 %v2409_v61, %v1194_v25 }
 0x22e   :  { %v1465_v32 = vpack.c.bf16 %v1236_v27, %v1236_v27  ;;  %v1237_v33 = vmax.f32 %v1219_v30, 0.0 }
 0x22f   :  { %v1148_v34 = vpop.permute.xlu0 %1147 }
 0x230   :  { %1327 = vst.msk [vmem:[%s2520_s3 + $0x10] sm:$0xf] %vm1322_vm5, %v1465_v32  ;;  %v1466_v17 = vpack.c.bf16 %v1237_v33, %v1237_v33  ;;  %v1195_v36 = vmax.f32 %v2349_v63, %v1148_v34 }
 0x231   :  { %v1150_v38 = vpop.permute.xlu1 %1149 }
 0x232   :  { %1328 = vst.msk [vmem:[%s2520_s3 + $0x14] sm:$0xf] %vm1322_vm5, %v1466_v17  ;;  %v1220_v40 = vadd.f32 %v2409_v61, %v1195_v36  ;;  %v1196_v15 = vmax.f32 %v2352_v47, %v1150_v38 }
 0x234   :  { %v1238_v23 = vmax.f32 %v1220_v40, 0.0  ;;  %v1221_v14 = vadd.f32 %v2409_v61, %v1196_v15 }
 0x236   :  { %v1467_v6 = vpack.c.bf16 %v1238_v23, %v1238_v23  ;;  %v1239_v45 = vmax.f32 %v1221_v14, 0.0 }
 0x237   :  { %v1152_v28 = vpop.permute.xlu0 %1151 }
 0x238   :  { %1329 = vst.msk [vmem:[%s2520_s3 + $0x18] sm:$0xf] %vm1322_vm5, %v1467_v6  ;;  %v1468_v63 = vpack.c.bf16 %v1239_v45, %v1239_v45  ;;  %v1197_v46 = vmax.f32 %v2359_v21, %v1152_v28 }
 0x239   :  { %v1154_v7 = vpop.permute.xlu1 %1153 }
 0x23a   :  { %1330 = vst.msk [vmem:[%s2520_s3 + $0x1c] sm:$0xf] %vm1322_vm5, %v1468_v63  ;;  %v1222_v47 = vadd.f32 %v2409_v61, %v1197_v46  ;;  %v1198_v48 = vmax.f32 %v2362_v49, %v1154_v7 }
 0x23c   :  { %v1240_v31 = vmax.f32 %v1222_v47, 0.0  ;;  %v1223_v50 = vadd.f32 %v2409_v61, %v1198_v48 }
 0x23e   :  { %v1469_v42 = vpack.c.bf16 %v1240_v31, %v1240_v31  ;;  %v1241_v54 = vmax.f32 %v1223_v50, 0.0 }
 0x23f   :  { %v1156_v52 = vpop.permute.xlu0 %1155 }
 0x240   :  { %1331 = vst.msk [vmem:[%s2520_s3 + $0x20] sm:$0xf] %vm1322_vm5, %v1469_v42  ;;  %v1470_v21 = vpack.c.bf16 %v1241_v54, %v1241_v54  ;;  %v1199_v1 = vmax.f32 %v2369_v18, %v1156_v52 }
 0x241   :  { %v1158_v57 = vpop.permute.xlu1 %1157 }
 0x242   :  { %1332 = vst.msk [vmem:[%s2520_s3 + $0x24] sm:$0xf] %vm1322_vm5, %v1470_v21  ;;  %v1224_v49 = vadd.f32 %v2409_v61, %v1199_v1  ;;  %v1200_v59 = vmax.f32 %v2372_v51, %v1158_v57 }
 0x244   :  { %v1242_v60 = vmax.f32 %v1224_v49, 0.0  ;;  %v1225_v9 = vadd.f32 %v2409_v61, %v1200_v59 }
 0x246   :  { %v1471_v10 = vpack.c.bf16 %v1242_v60, %v1242_v60  ;;  %v1243_v29 = vmax.f32 %v1225_v9, 0.0 }
 0x247   :  { %v1160_v37 = vpop.permute.xlu0 %1159 }
 0x248   :  { %1333 = vst.msk [vmem:[%s2520_s3 + $0x28] sm:$0xf] %vm1322_vm5, %v1471_v10  ;;  %v1472_v18 = vpack.c.bf16 %v1243_v29, %v1243_v29  ;;  %v1201_v41 = vmax.f32 %v2379_v26, %v1160_v37 }
 0x249   :  { %v1162_v55 = vpop.permute.xlu1 %1161 }
 0x24a   :  { %1334 = vst.msk [vmem:[%s2520_s3 + $0x2c] sm:$0xf] %vm1322_vm5, %v1472_v18  ;;  %v1226_v51 = vadd.f32 %v2409_v61, %v1201_v41  ;;  %v1202_v13 = vmax.f32 %v2382_v56, %v1162_v55 }
 0x24c   :  { %v1244_v0 = vmax.f32 %v1226_v51, 0.0  ;;  %v1227_v4 = vadd.f32 %v2409_v61, %v1202_v13 }
 0x24e   :  { %v1473_v20 = vpack.c.bf16 %v1244_v0, %v1244_v0  ;;  %v1245_v39 = vmax.f32 %v1227_v4, 0.0 }
 0x24f   :  { %v1164_v44 = vpop.permute.xlu0 %1163 }
 0x250   :  { %1335 = vst.msk [vmem:[%s2520_s3 + $0x30] sm:$0xf] %vm1322_vm5, %v1473_v20  ;;  %v1474_v26 = vpack.c.bf16 %v1245_v39, %v1245_v39  ;;  %v1203_v35 = vmax.f32 %v2389_v53, %v1164_v44 }
 0x251   :  { %v1166_v62 = vpop.permute.xlu1 %1165 }
 0x252   :  { %1336 = vst.msk [vmem:[%s2520_s3 + $0x34] sm:$0xf] %vm1322_vm5, %v1474_v26  ;;  %v1228_v56 = vadd.f32 %v2409_v61, %v1203_v35  ;;  %v1204_v43 = vmax.f32 %v2392_v19, %v1166_v62 }
 0x254   :  { %v1246_v2 = vmax.f32 %v1228_v56, 0.0  ;;  %v1229_v3 = vadd.f32 %v2409_v61, %v1204_v43 }
 0x256   :  { %v1475_v5 = vpack.c.bf16 %v1246_v2, %v1246_v2  ;;  %v1247_v8 = vmax.f32 %v1229_v3, 0.0 }
 0x257   :  { %v1168_v11 = vpop.permute.xlu0 %1167 }
 0x258   :  { %1337 = vst.msk [vmem:[%s2520_s3 + $0x38] sm:$0xf] %vm1322_vm5, %v1475_v5  ;;  %v1476_v53 = vpack.c.bf16 %v1247_v8, %v1247_v8  ;;  %v1205_v12 = vmax.f32 %v2398_v58, %v1168_v11 }
 0x259   :  { %v1170_v16 = vpop.permute.xlu1 %1169 }
 0x25a   :  { %1338 = vst.msk [vmem:[%s2520_s3 + $0x3c] sm:$0xf] %vm1322_vm5, %v1476_v53  ;;  %v1230_v19 = vadd.f32 %v2409_v61, %v1205_v12  ;;  %v1206_v24 = vmax.f32 %v2400_v22, %v1170_v16 }
 0x25c   :  { %v1248_v25 = vmax.f32 %v1230_v19, 0.0  ;;  %v1231_v27 = vadd.f32 %v2409_v61, %v1206_v24 }
 0x25e   :  { %v1477_v30 = vpack.c.bf16 %v1248_v25, %v1248_v25  ;;  %v1249_v32 = vmax.f32 %v1231_v27, 0.0 }
 0x260   :  { %1339 = vst.msk [vmem:[%s2520_s3 + $0x40] sm:$0xf] %vm1322_vm5, %v1477_v30  ;;  %v1478_v58 = vpack.c.bf16 %v1249_v32, %v1249_v32 }
 0x262   :  { %1340 = vst.msk [vmem:[%s2520_s3 + $0x44] sm:$0xf] %vm1322_vm5, %v1478_v58 }

// kernel: simple_cnn_v2_forward.6
= control target key start
LH: loop header
LB: loop body
LE: loop exit
PB: predicated region body
PF: predicated region fallthrough
CT: control target
= control target key end

     0   :  { %v1156_v1 = vmov 0   ;;  %vm420_vm0 = vcmask 1046528   ;;  %vm69_vm1 = vsmask.f32 7424  ;;  %vm601_vm2 = vsmask.f32 6400  ;;  %s1471_s1 = inlined_call_operand.vmem [shape: bf16[4,128,256], index: 1, kind: input, shape index: {}]   ;;  %s1472_s0 = inlined_call_operand.vmem [shape: bf16[1,60,128], index: 0, kind: input, shape index: {}]   ;;  %s1473_s2 = inlined_call_operand.vmem [shape: f32[1,64], index: 2, kind: input, shape index: {}]   ;;  %s1474_s3 = inlined_call_operand.vmem [shape: bf16[1,40,64], index: 3, kind: output, shape index: {}]  }
   0x1   :  { %v1052_v0 = vld [vmem:[%s1471_s1 + $0x84] ss:$8 sps:$4 sm:$0xff]   ;;  %208 = vmatprep.mubr.bf16.mxu1 %v1156_v1  ;;  %541 = vmatprep.mubr.bf16.mxu0 %v1156_v1  ;;  %v1056_v3 = vld [vmem:[%s1471_s1 + $0x80] ss:$8 sps:$4 sm:$0xff]   ;;  %v1058_v5 = vld [vmem:[%s1471_s1 + $0x94] ss:$8 sps:$4 sm:$0xff]  }
   0x2   :  { %v1054_v2 = vld [vmem:[%s1471_s1 + $0x104] ss:$8 sps:$4 sm:$0xff]   ;;  %176 = vmatprep.subr.bf16.mxu1 %v1052_v0  ;;  %v1057_v4 = vld [vmem:[%s1471_s1 + $0x100] ss:$8 sps:$4 sm:$0xff]   ;;  %v1060_v6 = vld [vmem:[%s1471_s1 + $0x114] ss:$8 sps:$4 sm:$0xff]  }
   0x3   :  { %509 = vmatprep.subr.bf16.mxu0 %v1054_v2  ;;  %177 = vmatpush1.bf16.msra.mxu1 %v1056_v3  ;;  %v1062_v7 = vld [vmem:[%s1471_s1 + $0x90] ss:$8 sps:$4 sm:$0xff]   ;;  %v1064_v9 = vld [vmem:[%s1471_s1 + $0xa4] ss:$8 sps:$4 sm:$0xff]   ;;  %v1068_v11 = vld [vmem:[%s1471_s1 + $0xa0] ss:$8 sps:$4 sm:$0xff]  }
   0x4   :  { %510 = vmatpush1.bf16.msra.mxu0 %v1057_v4  ;;  %178 = vmatprep.subr.bf16.mxu1 %v1058_v5  ;;  %v1063_v8 = vld [vmem:[%s1471_s1 + $0x110] ss:$8 sps:$4 sm:$0xff]   ;;  %v1066_v10 = vld [vmem:[%s1471_s1 + $0x124] ss:$8 sps:$4 sm:$0xff]   ;;  %v1069_v12 = vld [vmem:[%s1471_s1 + $0x120] ss:$8 sps:$4 sm:$0xff]  }
   0x5   :  { %511 = vmatprep.subr.bf16.mxu0 %v1060_v6  ;;  %v1070_v13 = vld [vmem:[%s1471_s1 + $0xb4] ss:$8 sps:$4 sm:$0xff]   ;;  %v1074_v15 = vld [vmem:[%s1471_s1 + $0xb0] ss:$8 sps:$4 sm:$0xff]   ;;  %v1076_v17 = vld [vmem:[%s1471_s1 + $0xc4] ss:$8 sps:$4 sm:$0xff]  }
   0x6   :  { %v1072_v14 = vld [vmem:[%s1471_s1 + $0x134] ss:$8 sps:$4 sm:$0xff]   ;;  %v1075_v16 = vld [vmem:[%s1471_s1 + $0x130] ss:$8 sps:$4 sm:$0xff]   ;;  %v1078_v18 = vld [vmem:[%s1471_s1 + $0x144] ss:$8 sps:$4 sm:$0xff]  }
   0x7   :  { %179 = vmatpush1.bf16.msra.mxu1 %v1062_v7  ;;  %v1080_v19 = vld [vmem:[%s1471_s1 + $0xc0] ss:$8 sps:$4 sm:$0xff]   ;;  %v1082_v21 = vld [vmem:[%s1471_s1 + $0xd4] ss:$8 sps:$4 sm:$0xff]   ;;  %v1086_v23 = vld [vmem:[%s1471_s1 + $0xd0] ss:$8 sps:$4 sm:$0xff]  }
   0x8   :  { %512 = vmatpush1.bf16.msra.mxu0 %v1063_v8  ;;  %180 = vmatprep.subr.bf16.mxu1 %v1064_v9  ;;  %v1081_v20 = vld [vmem:[%s1471_s1 + $0x140] ss:$8 sps:$4 sm:$0xff]   ;;  %v1084_v22 = vld [vmem:[%s1471_s1 + $0x154] ss:$8 sps:$4 sm:$0xff]   ;;  %v1087_v24 = vld [vmem:[%s1471_s1 + $0x150] ss:$8 sps:$4 sm:$0xff]  }
   0x9   :  { %513 = vmatprep.subr.bf16.mxu0 %v1066_v10  ;;  %v1088_v25 = vld [vmem:[%s1471_s1 + $0xe4] ss:$8 sps:$4 sm:$0xff]   ;;  %v1092_v27 = vld [vmem:[%s1471_s1 + $0xe0] ss:$8 sps:$4 sm:$0xff]   ;;  %v1094_v29 = vld [vmem:[%s1471_s1 + $0xf4] ss:$8 sps:$4 sm:$0xff]  }
   0xa   :  { %v1090_v26 = vld [vmem:[%s1471_s1 + $0x164] ss:$8 sps:$4 sm:$0xff]   ;;  %v1093_v28 = vld [vmem:[%s1471_s1 + $0x160] ss:$8 sps:$4 sm:$0xff]   ;;  %v1096_v30 = vld [vmem:[%s1471_s1 + $0x174] ss:$8 sps:$4 sm:$0xff]  }
   0xb   :  { %181 = vmatpush1.bf16.msra.mxu1 %v1068_v11  ;;  %v1273_v31 = vld [vmem:[%s1472_s0] sm:$0xff]   ;;  %v1278_v32 = vld [vmem:[%s1472_s0 + $0x8] sm:$0xff]   ;;  %v1098_v33 = vld [vmem:[%s1471_s1 + $0xf0] ss:$8 sps:$4 sm:$0xff]   ;;  %vm875_vm3 = vcmask 519168  }
   0xc   :  { %514 = vmatpush1.bf16.msra.mxu0 %v1069_v12  ;;  %182 = vmatprep.subr.bf16.mxu1 %v1070_v13  ;;  %v1099_v34 = vld [vmem:[%s1471_s1 + $0x170] ss:$8 sps:$4 sm:$0xff]   ;;  %v1102_v35 = vld [vmem:[%s1471_s1 + $0x4] ss:$8 sps:$4 sm:$0xff]   ;;  %v71_v36 = vshrl.u32 %v1273_v31, 16  ;;  %v73_v37 = vshll.u32 %v1273_v31, 16 }
   0xd   :  { %515 = vmatprep.subr.bf16.mxu0 %v1072_v14  ;;  %v78_v38 = vshll.u32 %v1278_v32, 16  ;;  %v1295_v39 = vld [vmem:[%s1472_s0 + $0xc] sm:$0xff]   ;;  %v1300_v40 = vld [vmem:[%s1472_s0 + $0x4] sm:$0xfe]   ;;  %v1112_v51 = vld [vmem:[%s1471_s1 + $0x14] ss:$8 sps:$4 sm:$0xff]  }
   0xe   :  { %v1105_v41 = vld [vmem:[%s1471_s1 + $0x184] ss:$8 sps:$4 sm:$0xff]   ;;  %v75_v42 = vrot.slane %v73_v37, 1  ;;  %v422_v44 = vrot.slane %v1295_v39, 1  ;;  %v421_v45 = vrot.slane %v1300_v40, 1  ;;  %v82_v55 = vshrl.u32 %v1278_v32, 16 }
   0xf   :  { %183 = vmatpush1.bf16.msra.mxu1 %v1074_v15  ;;  %v80_v43 = vrot.slane %v78_v38, 1  ;;  %v1100_v47 = vld [vmem:[%s1471_s1] ss:$8 sps:$4 sm:$0xff]   ;;  %v1115_v52 = vld [vmem:[%s1471_s1 + $0x194] ss:$8 sps:$4 sm:$0xff]  }
  0x10   :  { %516 = vmatpush1.bf16.msra.mxu0 %v1075_v16  ;;  %184 = vmatprep.subr.bf16.mxu1 %v1076_v17  ;;  %v76_v46 = vor.u32 %v75_v42, %v71_v36  ;;  %v1103_v48 = vld [vmem:[%s1471_s1 + $0x180] ss:$8 sps:$4 sm:$0xff]   ;;  %v423_v49 = vsel %vm420_vm0, %v421_v45, %v422_v44  ;;  %v1110_v53 = vld [vmem:[%s1471_s1 + $0x10] ss:$8 sps:$4 sm:$0xff]   ;;  %v1118_v56 = vld [vmem:[%s1471_s1 + $0x24] ss:$8 sps:$4 sm:$0xff]  }
  0x11   :  { %517 = vmatprep.subr.bf16.mxu0 %v1078_v18  ;;  %v1113_v54 = vld [vmem:[%s1471_s1 + $0x190] ss:$8 sps:$4 sm:$0xff]   ;;  %v1121_v57 = vld [vmem:[%s1471_s1 + $0x1a4] ss:$8 sps:$4 sm:$0xff]   ;;  %v36_v59 = vld [vmem:[%s1472_s0 + $0x14] sm:$0x1]  ;;  %v84_v3 = vor.u32 %v82_v55, %v80_v43 }
  0x12   :  { %v81_v50 = vsel %vm69_vm1, %v76_v46, %v80_v43  ;;  %v1337_v58 = vld [vmem:[%s1472_s0 + $0x10] sm:$0xf]  ;;  %v386_v61 = vld [vmem:[%s1472_s0 + $0x14] sm:$0xf]  ;;  %v1116_v62 = vld [vmem:[%s1471_s1 + $0x20] ss:$8 sps:$4 sm:$0xff]  }
  0x13   :  { %185 = vmatpush1.bf16.msra.mxu1 %v1080_v19  ;;  %v903_v60 = vcombine.low %v1337_v58, %v36_v59  ;;  %v387_v63 = vld [vmem:[%s1472_s0 + $0x18] sm:$0x1]  ;;  %v1119_v0 = vld [vmem:[%s1471_s1 + $0x1a0] ss:$8 sps:$4 sm:$0xff]   ;;  %v1124_v2 = vld [vmem:[%s1471_s1 + $0x34] ss:$8 sps:$4 sm:$0xff]  }
  0x14   :  { %518 = vmatpush1.bf16.msra.mxu0 %v1081_v20  ;;  %186 = vmatprep.subr.bf16.mxu1 %v1082_v21  ;;  %v955_v5 = vcombine.low %v386_v61, %v387_v63  ;;  %v1127_v6 = vld [vmem:[%s1471_s1 + $0x1b4] ss:$8 sps:$4 sm:$0xff]   ;;  %v1122_v9 = vld [vmem:[%s1471_s1 + $0x30] ss:$8 sps:$4 sm:$0xff]   ;;  %v1131_v12 = vld [vmem:[%s1471_s1 + $0x44] ss:$8 sps:$4 sm:$0xff]  }
  0x15   :  { %519 = vmatprep.subr.bf16.mxu0 %v1084_v22  ;;  %v86_v4 = vshll.u32 %v903_v60, 16  ;;  %v1125_v10 = vld [vmem:[%s1471_s1 + $0x1b0] ss:$8 sps:$4 sm:$0xff]   ;;  %v1136_v14 = vld [vmem:[%s1471_s1 + $0x1c4] ss:$8 sps:$4 sm:$0xff]   ;;  %v90_v15 = vshrl.u32 %v903_v60, 16 }
  0x16   :  { %v424_v8 = vrot.slane %v955_v5, 1  ;;  %v1129_v16 = vld [vmem:[%s1471_s1 + $0x40] ss:$8 sps:$4 sm:$0xff]   ;;  %v1139_v18 = vld [vmem:[%s1471_s1 + $0x54] ss:$8 sps:$4 sm:$0xff]   ;;  %v603_v21 = vshrl.u32 %v1300_v40, 16 }
  0x17   :  { %187 = vmatpush1.bf16.msra.mxu1 %v1086_v23  ;;  %v88_v7 = vrot.slane %v86_v4, 1  ;;  %v1134_v17 = vld [vmem:[%s1471_s1 + $0x1c0] ss:$8 sps:$4 sm:$0xff]   ;;  %v1142_v19 = vld [vmem:[%s1471_s1 + $0x1d4] ss:$8 sps:$4 sm:$0xff]   ;;  %v606_v22 = vshll.u32 %v1300_v40, 16 }
  0x18   :  { %520 = vmatpush1.bf16.msra.mxu0 %v1087_v24  ;;  %188 = vmatprep.subr.bf16.mxu1 %v1088_v25  ;;  %v425_v13 = vsel %vm420_vm0, %v422_v44, %v424_v8  ;;  %v1137_v23 = vld [vmem:[%s1471_s1 + $0x50] ss:$8 sps:$4 sm:$0xff]   ;;  %v611_v25 = vshrl.u32 %v1295_v39, 16  ;;  %v1146_v36 = vld [vmem:[%s1471_s1 + $0x1e0] ss:$8 sps:$4 sm:$0xff]  }
  0x19   :  { %521 = vmatprep.subr.bf16.mxu0 %v1090_v26  ;;  %v89_v11 = vsel %vm69_vm1, %v84_v3, %v88_v7  ;;  %v92_v20 = vor.u32 %v90_v15, %v88_v7  ;;  %v1140_v24 = vld [vmem:[%s1471_s1 + $0x1d0] ss:$8 sps:$4 sm:$0xff]   ;;  %v614_v26 = vshll.u32 %v1295_v39, 16  ;;  %v1151_v39 = vld [vmem:[%s1471_s1 + $0x74] ss:$8 sps:$4 sm:$0xff]  }
  0x1a   :  { %v613_v37 = vrot.slane %v611_v25, 1  ;;  %v1154_v40 = vld [vmem:[%s1471_s1 + $0x1f4] ss:$8 sps:$4 sm:$0xff]   ;;  %v1152_v42 = vld [vmem:[%s1471_s1 + $0x1f0] ss:$8 sps:$4 sm:$0xff]  }
  0x1b   :  { %189 = vmatpush1.bf16.msra.mxu1 %v1092_v27  ;;  %v580_v27 = vld [vmem:[%s1472_s0 + $0x18] sm:$0x3]  ;;  %v616_v38 = vrot.slane %v614_v26, 2  ;;  %v1005_v25 = vld [vmem:[%s1473_s2] ss:$0 sm:$0xff] }
  0x1c   :  { %522 = vmatpush1.bf16.msra.mxu0 %v1093_v28  ;;  %190 = vmatprep.subr.bf16.mxu1 %v1094_v29  ;;  %v1145_v28 = vld [vmem:[%s1471_s1 + $0x64] ss:$8 sps:$4 sm:$0xff]  }
  0x1d   :  { %523 = vmatprep.subr.bf16.mxu0 %v1096_v30  ;;  %v1148_v29 = vld [vmem:[%s1471_s1 + $0x1e4] ss:$8 sps:$4 sm:$0xff]   ;;  %v605_v30 = vrot.slane %v603_v21, 1  ;;  %v617_v44 = vor.u32 %v616_v38, %v613_v37 }
  0x1f   :  { %191 = vmatpush1.bf16.msra.mxu1 %v1098_v33  ;;  %v608_v33 = vrot.slane %v606_v22, 2 }
  0x20   :  { %524 = vmatpush1.bf16.msra.mxu0 %v1099_v34  ;;  %321 = vmatprep.subr.bf16.mxu1 %v1102_v35  ;;  %v988_v34 = vcombine.low %v386_v61, %v580_v27  ;;  %v1143_v35 = vld [vmem:[%s1471_s1 + $0x60] ss:$8 sps:$4 sm:$0xff]  }
  0x21   :  { %711 = vmatprep.subr.bf16.mxu0 %v1105_v41  ;;  %v1149_v41 = vld [vmem:[%s1471_s1 + $0x70] ss:$8 sps:$4 sm:$0xff]   ;;  %v609_v43 = vor.u32 %v608_v33, %v605_v30  ;;  %s1157_s1 = smov 64  }
  0x22   :  { %209 = vmatmul.mubr.bf16.vlgmr.msra.gmra.mrb[0].mxu1 %v81_v50  ;;  %v620_v45 = vshrl.u32 %v988_v34, 16  ;;  %v623_v46 = vshll.u32 %v988_v34, 16 }
  0x23   :  { %542 = vmatmul.mubr.bf16.vlgmr.msra.gmra.mrb[0].mxu0 %v423_v49  ;;  %322 = vmatpush1.bf16.msra.mxu1 %v1100_v47  ;;  %v618_v47 = vsel %vm601_vm2, %v609_v43, %v617_v44 }
  0x24   :  { %712 = vmatpush1.bf16.msra.mxu0 %v1103_v48  ;;  %323 = vmatprep.subr.bf16.mxu1 %v1112_v51  ;;  %v622_v48 = vrot.slane %v620_v45, 1  ;;  %v625_v49 = vrot.slane %v623_v46, 2 }
  0x25   :  { %713 = vmatprep.subr.bf16.mxu0 %v1115_v52  ;;  %218 = vmatprep.mubr.bf16.mxu1 %v1156_v1  ;;  %v920_v52 = vcombine.low %v1337_v58, %v1337_v58 }
  0x26   :  { %551 = vmatprep.mubr.bf16.mxu0 %v1156_v1  ;;  %v626_v50 = vor.u32 %v625_v49, %v622_v48 }
  0x27   :  { %324 = vmatpush1.bf16.msra.mxu1 %v1110_v53 }
  0x28   :  { %714 = vmatpush1.bf16.msra.mxu0 %v1113_v54  ;;  %325 = vmatprep.subr.bf16.mxu1 %v1118_v56  ;;  %v627_v51 = vsel %vm601_vm2, %v617_v44, %v626_v50 }
  0x29   :  { %715 = vmatprep.subr.bf16.mxu0 %v1121_v57 }
  0x2a   :  { %219 = vmatmul.mubr.bf16.gmra.mrb[4].mxu1 %v89_v11 }
  0x2b   :  { %326 = vmatpush1.bf16.msra.mxu1 %v1116_v62  ;;  %552 = vmatmul.mubr.bf16.gmra.mrb[4].mxu0 %v425_v13 }
  0x2c   :  { %716 = vmatpush1.bf16.msra.mxu0 %v1119_v0  ;;  %327 = vmatprep.subr.bf16.mxu1 %v1124_v2 }
  0x2d   :  { %717 = vmatprep.subr.bf16.mxu0 %v1127_v6  ;;  %228 = vmatprep.mubr.bf16.mxu1 %v1156_v1 }
  0x2e   :  { %561 = vmatprep.mubr.bf16.mxu0 %v1156_v1 }
  0x2f   :  { %328 = vmatpush1.bf16.msra.mxu1 %v1122_v9 }
  0x30   :  { %718 = vmatpush1.bf16.msra.mxu0 %v1125_v10  ;;  %329 = vmatprep.subr.bf16.mxu1 %v1131_v12 }
  0x31   :  { %719 = vmatprep.subr.bf16.mxu0 %v1136_v14 }
  0x32   :  { %229 = vmatmul.mubr.bf16.gmra.mrb[8].mxu1 %v92_v20 }
  0x33   :  { %330 = vmatpush1.bf16.msra.mxu1 %v1129_v16  ;;  %562 = vmatmul.mubr.bf16.gmra.mrb[8].mxu0 %v424_v8 }
  0x34   :  { %720 = vmatpush1.bf16.msra.mxu0 %v1134_v17  ;;  %331 = vmatprep.subr.bf16.mxu1 %v1139_v18 }
  0x35   :  { %721 = vmatprep.subr.bf16.mxu0 %v1142_v19  ;;  %353 = vmatprep.mubr.bf16.mxu1 %v1156_v1 }
  0x36   :  { %743 = vmatprep.mubr.bf16.mxu0 %v1156_v1 }
  0x37   :  { %332 = vmatpush1.bf16.msra.mxu1 %v1137_v23 }
  0x38   :  { %722 = vmatpush1.bf16.msra.mxu0 %v1140_v24  ;;  %333 = vmatprep.subr.bf16.mxu1 %v1145_v28 }
  0x39   :  { %723 = vmatprep.subr.bf16.mxu0 %v1148_v29 }
  0x3b   :  { %334 = vmatpush1.bf16.msra.mxu1 %v1143_v35 }
  0x3c   :  { %724 = vmatpush1.bf16.msra.mxu0 %v1146_v36  ;;  %335 = vmatprep.subr.bf16.mxu1 %v1151_v39 }
  0x3d   :  { %725 = vmatprep.subr.bf16.mxu0 %v1154_v40 }
  0x3f   :  { %336 = vmatpush1.bf16.msra.mxu1 %v1149_v41 }
  0x40   :  { %726 = vmatpush1.bf16.msra.mxu0 %v1152_v42 }
  0x42   :  { %354 = vmatmul.mubr.bf16.vlgmr.msra.gmra.mrb[0].mxu1 %v1273_v31 }
  0x43   :  { %744 = vmatmul.mubr.bf16.vlgmr.msra.gmra.mrb[0].mxu0 %v618_v47  ;;  %363 = vmatprep.mubr.bf16.mxu1 %v1156_v1 }
  0x44   :  { %753 = vmatprep.mubr.bf16.mxu0 %v1156_v1 }
  0x4a   :  { %364 = vmatmul.mubr.bf16.gmra.mrb[4].mxu1 %v1278_v32 }
  0x4b   :  { %754 = vmatmul.mubr.bf16.gmra.mrb[4].mxu0 %v627_v51  ;;  %373 = vmatprep.mubr.bf16.mxu1 %v1156_v1 }
  0x4c   :  { %763 = vmatprep.mubr.bf16.mxu0 %v1156_v1 }
  0x52   :  { %374 = vmatmul.mubr.bf16.gmra.mrb[8].mxu1 %v920_v52 }
  0x53   :  { %764 = vmatmul.mubr.bf16.gmra.mrb[8].mxu0 %v626_v50 }
 0x115   :  { %v355_v31 = vpop.f32.mrb[0].mxu1 }
 0x116   :  { %v745_v53 = vpop.f32.mrb[0].mxu0  ;;  %v357_v55 = vpop.f32.mrb[1].mxu1 }
 0x117   :  { %v1016_v54 = vadd.f32 %v745_v53, %v355_v31  ;;  %v747_v56 = vpop.f32.mrb[1].mxu0  ;;  %v359_v59 = vpop.f32.mrb[2].mxu1 }
 0x118   :  { %v1017_v57 = vadd.f32 %v747_v56, %v357_v55  ;;  %v749_v60 = vpop.f32.mrb[2].mxu0  ;;  %v361_v62 = vpop.f32.mrb[3].mxu1 }
 0x119   :  { %v1018_v61 = vadd.f32 %v749_v60, %v359_v59  ;;  %v751_v32 = vpop.f32.mrb[3].mxu0  ;;  %787 = vrot.lane.b32.xlu0 %v1016_v54, %s1157_s1 }
 0x11a   :  { %v1019_v1 = vadd.f32 %v751_v32, %v361_v62  ;;  %812 = vrot.lane.b32.xlu1 %v1017_v57, %s1157_s1 }
 0x11d   :  { %789 = vrot.lane.b32.xlu0 %v1018_v61, %s1157_s1  ;;  %v365_v58 = vpop.f32.mrb[4].mxu1 }
 0x11e   :  { %v755_v63 = vpop.f32.mrb[4].mxu0  ;;  %v367_v2 = vpop.f32.mrb[5].mxu1 }
 0x11f   :  { %v1020_v0 = vadd.f32 %v755_v63, %v365_v58  ;;  %v757_v3 = vpop.f32.mrb[5].mxu0  ;;  %v369_v5 = vpop.f32.mrb[6].mxu1 }
 0x120   :  { %v1021_v4 = vadd.f32 %v757_v3, %v367_v2  ;;  %v759_v6 = vpop.f32.mrb[6].mxu0  ;;  %v371_v9 = vpop.f32.mrb[7].mxu1 }
 0x121   :  { %v1022_v7 = vadd.f32 %v759_v6, %v369_v5  ;;  %v761_v8 = vpop.f32.mrb[7].mxu0  ;;  %814 = vrot.lane.b32.xlu0 %v1019_v1, %s1157_s1  ;;  %791 = vrot.lane.b32.xlu1 %v1020_v0, %s1157_s1 }
 0x122   :  { %v1023_v10 = vadd.f32 %v761_v8, %v371_v9 }
 0x125   :  { %816 = vrot.lane.b32.xlu1 %v1021_v4, %s1157_s1  ;;  %v375_v11 = vpop.f32.mrb[8].mxu1 }
 0x126   :  { %v765_v12 = vpop.f32.mrb[8].mxu0  ;;  %v377_v14 = vpop.f32.mrb[9].mxu1 }
 0x127   :  { %v1024_v13 = vadd.f32 %v765_v12, %v375_v11  ;;  %v767_v15 = vpop.f32.mrb[9].mxu0  ;;  %v379_v17 = vpop.f32.mrb[10].mxu1 }
 0x128   :  { %v1025_v16 = vadd.f32 %v767_v15, %v377_v14  ;;  %v769_v18 = vpop.f32.mrb[10].mxu0  ;;  %v380_v20 = vpop.f32.mrb[11].mxu1 }
 0x129   :  { %v770_v19 = vpop.f32.mrb[11].mxu0  ;;  %793 = vrot.lane.b32.xlu1 %v1022_v7, %s1157_s1  ;;  %795 = vrot.lane.b32.xlu0 %v1024_v13, %s1157_s1 }
 0x12d   :  { %818 = vrot.lane.b32.xlu0 %v1023_v10, %s1157_s1  ;;  %820 = vrot.lane.b32.xlu1 %v1025_v16, %s1157_s1 }
 0x18b   :  { %v788_v21 = vpop.permute.xlu0 %787 }
 0x18c   :  { %v802_v22 = vmax.f32 %v1016_v54, %v788_v21  ;;  %v813_v23 = vpop.permute.xlu1 %812 }
 0x18d   :  { %v827_v24 = vmax.f32 %v1017_v57, %v813_v23 }
 0x18f   :  { %v832_v26 = vmax.f32 %v802_v22, %v827_v24  ;;  %v790_v27 = vpop.permute.xlu0 %789 }
 0x190   :  { %v803_v34 = vmax.f32 %v1018_v61, %v790_v27 }
 0x191   :  { %v844_v28 = vadd.f32 %v1005_v25, %v832_v26 }
 0x193   :  { %v849_v29 = vmax.f32 %v844_v28, 0.0  ;;  %v815_v30 = vpop.permute.xlu0 %814  ;;  %v792_v33 = vpop.permute.xlu1 %791 }
 0x194   :  { %v828_v35 = vmax.f32 %v1019_v1, %v815_v30  ;;  %v804_v40 = vmax.f32 %v1020_v0, %v792_v33 }
 0x195   :  { %v1011_v36 = vpack.c.bf16 %v849_v29, %v849_v29 }
 0x196   :  { %v833_v37 = vmax.f32 %v803_v34, %v828_v35 }
 0x197   :  { %876 = vst.msk [vmem:[%s1474_s3] sm:$0xf] %vm875_vm3, %v1011_v36  ;;  %v817_v38 = vpop.permute.xlu1 %816 }
 0x198   :  { %v845_v39 = vadd.f32 %v1005_v25, %v833_v37  ;;  %v829_v41 = vmax.f32 %v1021_v4, %v817_v38 }
 0x19a   :  { %v850_v42 = vmax.f32 %v845_v39, 0.0  ;;  %v834_v43 = vmax.f32 %v804_v40, %v829_v41 }
 0x19b   :  { %v794_v44 = vpop.permute.xlu1 %793  ;;  %v796_v45 = vpop.permute.xlu0 %795 }
 0x19c   :  { %v1012_v46 = vpack.c.bf16 %v850_v42, %v850_v42  ;;  %v846_v47 = vadd.f32 %v1005_v25, %v834_v43  ;;  %v805_v49 = vmax.f32 %v1022_v7, %v794_v44  ;;  %v806_v31 = vmax.f32 %v1024_v13, %v796_v45 }
 0x19e   :  { %877 = vst.msk [vmem:[%s1474_s3 + $0x4] sm:$0xf] %vm875_vm3, %v1012_v46  ;;  %v851_v48 = vmax.f32 %v846_v47, 0.0 }
 0x19f   :  { %v819_v50 = vpop.permute.xlu0 %818  ;;  %v821_v51 = vpop.permute.xlu1 %820 }
 0x1a0   :  { %v1013_v52 = vpack.c.bf16 %v851_v48, %v851_v48  ;;  %v830_v53 = vmax.f32 %v1023_v10, %v819_v50  ;;  %v831_v54 = vmax.f32 %v1025_v16, %v821_v51 }
 0x1a2   :  { %878 = vst.msk [vmem:[%s1474_s3 + $0x8] sm:$0xf] %vm875_vm3, %v1013_v52  ;;  %v835_v55 = vmax.f32 %v805_v49, %v830_v53  ;;  %v836_v56 = vmax.f32 %v806_v31, %v831_v54 }
 0x1a4   :  { %v847_v57 = vadd.f32 %v1005_v25, %v835_v55  ;;  %v848_v59 = vadd.f32 %v1005_v25, %v836_v56 }
 0x1a6   :  { %v852_v60 = vmax.f32 %v847_v57, 0.0  ;;  %v853_v61 = vmax.f32 %v848_v59, 0.0 }
 0x1a8   :  { %v1014_v32 = vpack.c.bf16 %v852_v60, %v852_v60  ;;  %v1015_v62 = vpack.c.bf16 %v853_v61, %v853_v61 }
 0x1aa   :  { %879 = vst.msk [vmem:[%s1474_s3 + $0xc] sm:$0xf] %vm875_vm3, %v1014_v32  ;;  %880 = vst.msk [vmem:[%s1474_s3 + $0x10] sm:$0xf] %vm875_vm3, %v1015_v62 }

// kernel: simple_cnn_v2_forward.7
= control target key start
LH: loop header
LB: loop body
LE: loop exit
PB: predicated region body
PF: predicated region fallthrough
CT: control target
= control target key end

     0   :  { %vm2290_vm0 = vcmask 80896   ;;  %s4022_s1 = inlined_call_operand.vmem [shape: bf16[1024,512], index: 1, kind: input, shape index: {}]   ;;  %s4023_s0 = inlined_call_operand.vmem [shape: bf16[8,1024], index: 0, kind: input, shape index: {}]   ;;  %s4024_s3 = inlined_call_operand.vmem [shape: bf16[512,10], index: 3, kind: input, shape index: {}]   ;;  %s4025_s2 = inlined_call_operand.vmem [shape: f32[1,512], index: 2, kind: input, shape index: {}]   ;;  %s4026_s4 = inlined_call_operand.vmem [shape: f32[1,10], index: 4, kind: input, shape index: {}]   ;;  %s4027_s5 = inlined_call_operand.vmem [shape: f32[8,10], index: 5, kind: output, shape index: {}]  }
   0x1   :  { %v2665_v0 = vld [vmem:[%s4022_s1 + $0x4] ss:$16 sps:$4 sm:$0xff]   ;;  %v2667_v1 = vld [vmem:[%s4022_s1 + $0xc] ss:$16 sps:$4 sm:$0xff]   ;;  %v2669_v2 = vld [vmem:[%s4022_s1] ss:$16 sps:$4 sm:$0xff]  }
   0x2   :  { %1611 = vmatprep.subr.bf16.mxu0 %v2665_v0  ;;  %v2670_v3 = vld [vmem:[%s4022_s1 + $0x8] ss:$16 sps:$4 sm:$0xff]   ;;  %1775 = vmatprep.subr.bf16.mxu1 %v2667_v1  ;;  %v2671_v4 = vld [vmem:[%s4022_s1 + $0x24] ss:$16 sps:$4 sm:$0xff]   ;;  %v2673_v5 = vld [vmem:[%s4022_s1 + $0x2c] ss:$16 sps:$4 sm:$0xff]  }
   0x3   :  { %1612 = vmatpush1.bf16.msra.mxu0 %v2669_v2  ;;  %1776 = vmatpush1.bf16.msra.mxu1 %v2670_v3  ;;  %v2675_v6 = vld [vmem:[%s4022_s1 + $0x20] ss:$16 sps:$4 sm:$0xff]   ;;  %v2676_v7 = vld [vmem:[%s4022_s1 + $0x28] ss:$16 sps:$4 sm:$0xff]   ;;  %v2677_v8 = vld [vmem:[%s4022_s1 + $0x44] ss:$16 sps:$4 sm:$0xff]  }
   0x4   :  { %1613 = vmatprep.subr.bf16.mxu0 %v2671_v4  ;;  %1777 = vmatprep.subr.bf16.mxu1 %v2673_v5  ;;  %v2679_v9 = vld [vmem:[%s4022_s1 + $0x4c] ss:$16 sps:$4 sm:$0xff]   ;;  %v2681_v10 = vld [vmem:[%s4022_s1 + $0x40] ss:$16 sps:$4 sm:$0xff]   ;;  %v2682_v11 = vld [vmem:[%s4022_s1 + $0x48] ss:$16 sps:$4 sm:$0xff]  }
   0x5   :  { %v2683_v12 = vld [vmem:[%s4022_s1 + $0x64] ss:$16 sps:$4 sm:$0xff]   ;;  %v2685_v13 = vld [vmem:[%s4022_s1 + $0x6c] ss:$16 sps:$4 sm:$0xff]   ;;  %v2687_v14 = vld [vmem:[%s4022_s1 + $0x60] ss:$16 sps:$4 sm:$0xff]  }
   0x6   :  { %v2688_v15 = vld [vmem:[%s4022_s1 + $0x68] ss:$16 sps:$4 sm:$0xff]   ;;  %v2689_v16 = vld [vmem:[%s4022_s1 + $0x84] ss:$16 sps:$4 sm:$0xff]   ;;  %v2691_v17 = vld [vmem:[%s4022_s1 + $0x8c] ss:$16 sps:$4 sm:$0xff]  }
   0x7   :  { %1614 = vmatpush1.bf16.msra.mxu0 %v2675_v6  ;;  %1778 = vmatpush1.bf16.msra.mxu1 %v2676_v7  ;;  %v2693_v18 = vld [vmem:[%s4022_s1 + $0x80] ss:$16 sps:$4 sm:$0xff]   ;;  %v2694_v19 = vld [vmem:[%s4022_s1 + $0x88] ss:$16 sps:$4 sm:$0xff]   ;;  %v2695_v20 = vld [vmem:[%s4022_s1 + $0xa4] ss:$16 sps:$4 sm:$0xff]  }
   0x8   :  { %1615 = vmatprep.subr.bf16.mxu0 %v2677_v8  ;;  %1779 = vmatprep.subr.bf16.mxu1 %v2679_v9  ;;  %v2697_v21 = vld [vmem:[%s4022_s1 + $0xac] ss:$16 sps:$4 sm:$0xff]   ;;  %v2699_v22 = vld [vmem:[%s4022_s1 + $0xa0] ss:$16 sps:$4 sm:$0xff]   ;;  %v2700_v23 = vld [vmem:[%s4022_s1 + $0xa8] ss:$16 sps:$4 sm:$0xff]  }
   0x9   :  { %v2701_v24 = vld [vmem:[%s4022_s1 + $0xc4] ss:$16 sps:$4 sm:$0xff]   ;;  %v2703_v25 = vld [vmem:[%s4022_s1 + $0xcc] ss:$16 sps:$4 sm:$0xff]   ;;  %v2705_v26 = vld [vmem:[%s4022_s1 + $0xc0] ss:$16 sps:$4 sm:$0xff]  }
   0xa   :  { %v2706_v27 = vld [vmem:[%s4022_s1 + $0xc8] ss:$16 sps:$4 sm:$0xff]   ;;  %v2707_v28 = vld [vmem:[%s4022_s1 + $0xe4] ss:$16 sps:$4 sm:$0xff]   ;;  %v2709_v29 = vld [vmem:[%s4022_s1 + $0xec] ss:$16 sps:$4 sm:$0xff]  }
   0xb   :  { %1616 = vmatpush1.bf16.msra.mxu0 %v2681_v10  ;;  %1780 = vmatpush1.bf16.msra.mxu1 %v2682_v11  ;;  %v2711_v30 = vld [vmem:[%s4022_s1 + $0xe0] ss:$16 sps:$4 sm:$0xff]   ;;  %v2712_v31 = vld [vmem:[%s4022_s1 + $0xe8] ss:$16 sps:$4 sm:$0xff]   ;;  %v2713_v32 = vld [vmem:[%s4022_s1 + $0x104] ss:$16 sps:$4 sm:$0xff]  }
   0xc   :  { %1617 = vmatprep.subr.bf16.mxu0 %v2683_v12  ;;  %1781 = vmatprep.subr.bf16.mxu1 %v2685_v13  ;;  %v2715_v33 = vld [vmem:[%s4022_s1 + $0x10c] ss:$16 sps:$4 sm:$0xff]   ;;  %v2717_v34 = vld [vmem:[%s4022_s1 + $0x100] ss:$16 sps:$4 sm:$0xff]   ;;  %v2718_v35 = vld [vmem:[%s4022_s1 + $0x108] ss:$16 sps:$4 sm:$0xff]  }
   0xd   :  { %v2719_v36 = vld [vmem:[%s4022_s1 + $0x124] ss:$16 sps:$4 sm:$0xff]   ;;  %v2721_v37 = vld [vmem:[%s4022_s1 + $0x12c] ss:$16 sps:$4 sm:$0xff]   ;;  %v2723_v38 = vld [vmem:[%s4022_s1 + $0x120] ss:$16 sps:$4 sm:$0xff]  }
   0xe   :  { %v2724_v39 = vld [vmem:[%s4022_s1 + $0x128] ss:$16 sps:$4 sm:$0xff]   ;;  %v2725_v40 = vld [vmem:[%s4022_s1 + $0x144] ss:$16 sps:$4 sm:$0xff]   ;;  %v2727_v41 = vld [vmem:[%s4022_s1 + $0x14c] ss:$16 sps:$4 sm:$0xff]  }
   0xf   :  { %1618 = vmatpush1.bf16.msra.mxu0 %v2687_v14  ;;  %1782 = vmatpush1.bf16.msra.mxu1 %v2688_v15  ;;  %v2729_v42 = vld [vmem:[%s4022_s1 + $0x140] ss:$16 sps:$4 sm:$0xff]   ;;  %v2730_v43 = vld [vmem:[%s4022_s1 + $0x148] ss:$16 sps:$4 sm:$0xff]   ;;  %v2731_v44 = vld [vmem:[%s4022_s1 + $0x164] ss:$16 sps:$4 sm:$0xff]  }
  0x10   :  { %1619 = vmatprep.subr.bf16.mxu0 %v2689_v16  ;;  %1783 = vmatprep.subr.bf16.mxu1 %v2691_v17  ;;  %v2733_v45 = vld [vmem:[%s4022_s1 + $0x16c] ss:$16 sps:$4 sm:$0xff]   ;;  %v21_v46 = vld [vmem:[%s4023_s0] sm:$0xff]  ;;  %v2736_v49 = vld [vmem:[%s4022_s1 + $0x168] ss:$16 sps:$4 sm:$0xff]  }
  0x11   :  { %v2735_v47 = vld [vmem:[%s4022_s1 + $0x160] ss:$16 sps:$4 sm:$0xff]   ;;  %v2297_v48 = vcombine.high %v21_v46, %v21_v46  ;;  %v2737_v50 = vld [vmem:[%s4022_s1 + $0x184] ss:$16 sps:$4 sm:$0xff]   ;;  %v2739_v51 = vld [vmem:[%s4022_s1 + $0x18c] ss:$16 sps:$4 sm:$0xff]   ;;  %v2296_v4 = vcombine.low %v21_v46, %v21_v46 }
  0x12   :  { %v2741_v52 = vld [vmem:[%s4022_s1 + $0x180] ss:$16 sps:$4 sm:$0xff]   ;;  %v2742_v53 = vld [vmem:[%s4022_s1 + $0x188] ss:$16 sps:$4 sm:$0xff]   ;;  %v2743_v54 = vld [vmem:[%s4022_s1 + $0x1a4] ss:$16 sps:$4 sm:$0xff]  }
  0x13   :  { %1620 = vmatpush1.bf16.msra.mxu0 %v2693_v18  ;;  %1784 = vmatpush1.bf16.msra.mxu1 %v2694_v19  ;;  %v2745_v55 = vld [vmem:[%s4022_s1 + $0x1ac] ss:$16 sps:$4 sm:$0xff]   ;;  %v2747_v56 = vld [vmem:[%s4022_s1 + $0x1a0] ss:$16 sps:$4 sm:$0xff]   ;;  %v2748_v57 = vld [vmem:[%s4022_s1 + $0x1a8] ss:$16 sps:$4 sm:$0xff]  }
  0x14   :  { %1621 = vmatprep.subr.bf16.mxu0 %v2695_v20  ;;  %1785 = vmatprep.subr.bf16.mxu1 %v2697_v21  ;;  %v2749_v58 = vld [vmem:[%s4022_s1 + $0x1c4] ss:$16 sps:$4 sm:$0xff]   ;;  %v2751_v59 = vld [vmem:[%s4022_s1 + $0x1cc] ss:$16 sps:$4 sm:$0xff]   ;;  %v2753_v60 = vld [vmem:[%s4022_s1 + $0x1c0] ss:$16 sps:$4 sm:$0xff]  }
  0x15   :  { %1643 = vmatprep.mubr.bf16.mxu0 %v2297_v48  ;;  %1807 = vmatprep.mubr.bf16.mxu1 %v2297_v48  ;;  %v2754_v61 = vld [vmem:[%s4022_s1 + $0x1c8] ss:$16 sps:$4 sm:$0xff]   ;;  %v2755_v62 = vld [vmem:[%s4022_s1 + $0x1e4] ss:$16 sps:$4 sm:$0xff]   ;;  %v2757_v63 = vld [vmem:[%s4022_s1 + $0x1ec] ss:$16 sps:$4 sm:$0xff]  }
  0x16   :  { %v2759_v0 = vld [vmem:[%s4022_s1 + $0x1e0] ss:$16 sps:$4 sm:$0xff]   ;;  %v2760_v1 = vld [vmem:[%s4022_s1 + $0x1e8] ss:$16 sps:$4 sm:$0xff]   ;;  %v2765_v2 = vld [vmem:[%s4022_s1 + $0x204] ss:$16 sps:$4 sm:$0xff]  }
  0x17   :  { %1622 = vmatpush1.bf16.msra.mxu0 %v2699_v22  ;;  %1786 = vmatpush1.bf16.msra.mxu1 %v2700_v23  ;;  %v2768_v3 = vld [vmem:[%s4022_s1 + $0x20c] ss:$16 sps:$4 sm:$0xff]   ;;  %v2763_v5 = vld [vmem:[%s4022_s1 + $0x200] ss:$16 sps:$4 sm:$0xff]   ;;  %v2766_v6 = vld [vmem:[%s4022_s1 + $0x208] ss:$16 sps:$4 sm:$0xff]  }
  0x18   :  { %1623 = vmatprep.subr.bf16.mxu0 %v2701_v24  ;;  %1787 = vmatprep.subr.bf16.mxu1 %v2703_v25  ;;  %v2771_v7 = vld [vmem:[%s4022_s1 + $0x224] ss:$16 sps:$4 sm:$0xff]   ;;  %v2774_v8 = vld [vmem:[%s4022_s1 + $0x22c] ss:$16 sps:$4 sm:$0xff]   ;;  %v2769_v9 = vld [vmem:[%s4022_s1 + $0x220] ss:$16 sps:$4 sm:$0xff]  }
  0x19   :  { %v2772_v10 = vld [vmem:[%s4022_s1 + $0x228] ss:$16 sps:$4 sm:$0xff]   ;;  %v2777_v11 = vld [vmem:[%s4022_s1 + $0x244] ss:$16 sps:$4 sm:$0xff]   ;;  %v2780_v12 = vld [vmem:[%s4022_s1 + $0x24c] ss:$16 sps:$4 sm:$0xff]  }
  0x1a   :  { %v2775_v13 = vld [vmem:[%s4022_s1 + $0x240] ss:$16 sps:$4 sm:$0xff]   ;;  %v2778_v14 = vld [vmem:[%s4022_s1 + $0x248] ss:$16 sps:$4 sm:$0xff]   ;;  %v2783_v15 = vld [vmem:[%s4022_s1 + $0x264] ss:$16 sps:$4 sm:$0xff]  }
  0x1b   :  { %1624 = vmatpush1.bf16.msra.mxu0 %v2705_v26  ;;  %1788 = vmatpush1.bf16.msra.mxu1 %v2706_v27  ;;  %v2786_v16 = vld [vmem:[%s4022_s1 + $0x26c] ss:$16 sps:$4 sm:$0xff]   ;;  %v2781_v17 = vld [vmem:[%s4022_s1 + $0x260] ss:$16 sps:$4 sm:$0xff]   ;;  %v2784_v18 = vld [vmem:[%s4022_s1 + $0x268] ss:$16 sps:$4 sm:$0xff]  }
  0x1c   :  { %1625 = vmatprep.subr.bf16.mxu0 %v2707_v28  ;;  %1789 = vmatprep.subr.bf16.mxu1 %v2709_v29  ;;  %v2789_v19 = vld [vmem:[%s4022_s1 + $0x284] ss:$16 sps:$4 sm:$0xff]   ;;  %v2792_v20 = vld [vmem:[%s4022_s1 + $0x28c] ss:$16 sps:$4 sm:$0xff]   ;;  %v2787_v21 = vld [vmem:[%s4022_s1 + $0x280] ss:$16 sps:$4 sm:$0xff]  }
  0x1d   :  { %v2790_v22 = vld [vmem:[%s4022_s1 + $0x288] ss:$16 sps:$4 sm:$0xff]   ;;  %v2795_v23 = vld [vmem:[%s4022_s1 + $0x2a4] ss:$16 sps:$4 sm:$0xff]   ;;  %v2798_v24 = vld [vmem:[%s4022_s1 + $0x2ac] ss:$16 sps:$4 sm:$0xff]  }
  0x1e   :  { %v2793_v25 = vld [vmem:[%s4022_s1 + $0x2a0] ss:$16 sps:$4 sm:$0xff]   ;;  %v2796_v26 = vld [vmem:[%s4022_s1 + $0x2a8] ss:$16 sps:$4 sm:$0xff]   ;;  %v2801_v27 = vld [vmem:[%s4022_s1 + $0x2c4] ss:$16 sps:$4 sm:$0xff]  }
  0x1f   :  { %1626 = vmatpush1.bf16.msra.mxu0 %v2711_v30  ;;  %1790 = vmatpush1.bf16.msra.mxu1 %v2712_v31  ;;  %v2804_v28 = vld [vmem:[%s4022_s1 + $0x2cc] ss:$16 sps:$4 sm:$0xff]   ;;  %v2799_v31 = vld [vmem:[%s4022_s1 + $0x2c0] ss:$16 sps:$4 sm:$0xff]   ;;  %v2826_v48 = vld [vmem:[%s4022_s1 + $0x348] ss:$16 sps:$4 sm:$0xff]  }
  0x20   :  { %1627 = vmatprep.subr.bf16.mxu0 %v2713_v32  ;;  %1791 = vmatprep.subr.bf16.mxu1 %v2715_v33  ;;  %v3395_v29 = vld [vmem:[%s4023_s0 + $0x8] sm:$0xff]  ;;  %v2807_v33 = vld [vmem:[%s4022_s1 + $0x2e4] ss:$16 sps:$4 sm:$0xff]  }
  0x21   :  { %v2299_v30 = vcombine.high %v3395_v29, %v3395_v29  ;;  %v2802_v32 = vld [vmem:[%s4022_s1 + $0x2c8] ss:$16 sps:$4 sm:$0xff]   ;;  %v2828_v46 = vld [vmem:[%s4022_s1 + $0x34c] ss:$16 sps:$4 sm:$0xff]  }
  0x23   :  { %1628 = vmatpush1.bf16.msra.mxu0 %v2717_v34  ;;  %1792 = vmatpush1.bf16.msra.mxu1 %v2718_v35  ;;  %v2810_v34 = vld [vmem:[%s4022_s1 + $0x2ec] ss:$16 sps:$4 sm:$0xff]   ;;  %v2805_v35 = vld [vmem:[%s4022_s1 + $0x2e0] ss:$16 sps:$4 sm:$0xff]  }
  0x24   :  { %1629 = vmatprep.subr.bf16.mxu0 %v2719_v36  ;;  %1793 = vmatprep.subr.bf16.mxu1 %v2721_v37  ;;  %v2808_v36 = vld [vmem:[%s4022_s1 + $0x2e8] ss:$16 sps:$4 sm:$0xff]   ;;  %v2813_v37 = vld [vmem:[%s4022_s1 + $0x304] ss:$16 sps:$4 sm:$0xff]  }
  0x27   :  { %1630 = vmatpush1.bf16.msra.mxu0 %v2723_v38  ;;  %1794 = vmatpush1.bf16.msra.mxu1 %v2724_v39  ;;  %v2816_v38 = vld [vmem:[%s4022_s1 + $0x30c] ss:$16 sps:$4 sm:$0xff]   ;;  %v2811_v39 = vld [vmem:[%s4022_s1 + $0x300] ss:$16 sps:$4 sm:$0xff]  }
  0x28   :  { %1631 = vmatprep.subr.bf16.mxu0 %v2725_v40  ;;  %1795 = vmatprep.subr.bf16.mxu1 %v2727_v41  ;;  %v2814_v40 = vld [vmem:[%s4022_s1 + $0x308] ss:$16 sps:$4 sm:$0xff]   ;;  %v2819_v41 = vld [vmem:[%s4022_s1 + $0x324] ss:$16 sps:$4 sm:$0xff]  }
  0x2b   :  { %1632 = vmatpush1.bf16.msra.mxu0 %v2729_v42  ;;  %1796 = vmatpush1.bf16.msra.mxu1 %v2730_v43  ;;  %v2822_v42 = vld [vmem:[%s4022_s1 + $0x32c] ss:$16 sps:$4 sm:$0xff]   ;;  %v2817_v43 = vld [vmem:[%s4022_s1 + $0x320] ss:$16 sps:$4 sm:$0xff]  }
  0x2c   :  { %1633 = vmatprep.subr.bf16.mxu0 %v2731_v44  ;;  %1797 = vmatprep.subr.bf16.mxu1 %v2733_v45  ;;  %v2820_v44 = vld [vmem:[%s4022_s1 + $0x328] ss:$16 sps:$4 sm:$0xff]   ;;  %v2825_v45 = vld [vmem:[%s4022_s1 + $0x344] ss:$16 sps:$4 sm:$0xff]  }
  0x2f   :  { %1634 = vmatpush1.bf16.msra.mxu0 %v2735_v47  ;;  %1798 = vmatpush1.bf16.msra.mxu1 %v2736_v49  ;;  %v2823_v47 = vld [vmem:[%s4022_s1 + $0x340] ss:$16 sps:$4 sm:$0xff]   ;;  %v2831_v49 = vld [vmem:[%s4022_s1 + $0x364] ss:$16 sps:$4 sm:$0xff]  }
  0x30   :  { %1635 = vmatprep.subr.bf16.mxu0 %v2737_v50  ;;  %1799 = vmatprep.subr.bf16.mxu1 %v2739_v51  ;;  %v2834_v50 = vld [vmem:[%s4022_s1 + $0x36c] ss:$16 sps:$4 sm:$0xff]   ;;  %v2829_v51 = vld [vmem:[%s4022_s1 + $0x360] ss:$16 sps:$4 sm:$0xff]  }
  0x33   :  { %1636 = vmatpush1.bf16.msra.mxu0 %v2741_v52  ;;  %1800 = vmatpush1.bf16.msra.mxu1 %v2742_v53  ;;  %v2832_v52 = vld [vmem:[%s4022_s1 + $0x368] ss:$16 sps:$4 sm:$0xff]   ;;  %v2837_v53 = vld [vmem:[%s4022_s1 + $0x384] ss:$16 sps:$4 sm:$0xff]  }
  0x34   :  { %1637 = vmatprep.subr.bf16.mxu0 %v2743_v54  ;;  %1801 = vmatprep.subr.bf16.mxu1 %v2745_v55  ;;  %v2840_v54 = vld [vmem:[%s4022_s1 + $0x38c] ss:$16 sps:$4 sm:$0xff]   ;;  %v2835_v55 = vld [vmem:[%s4022_s1 + $0x380] ss:$16 sps:$4 sm:$0xff]  }
  0x37   :  { %1638 = vmatpush1.bf16.msra.mxu0 %v2747_v56  ;;  %1802 = vmatpush1.bf16.msra.mxu1 %v2748_v57  ;;  %v2838_v56 = vld [vmem:[%s4022_s1 + $0x388] ss:$16 sps:$4 sm:$0xff]   ;;  %v2843_v57 = vld [vmem:[%s4022_s1 + $0x3a4] ss:$16 sps:$4 sm:$0xff]  }
  0x38   :  { %1639 = vmatprep.subr.bf16.mxu0 %v2749_v58  ;;  %1803 = vmatprep.subr.bf16.mxu1 %v2751_v59  ;;  %v2846_v58 = vld [vmem:[%s4022_s1 + $0x3ac] ss:$16 sps:$4 sm:$0xff]   ;;  %v2841_v59 = vld [vmem:[%s4022_s1 + $0x3a0] ss:$16 sps:$4 sm:$0xff]  }
  0x3b   :  { %1640 = vmatpush1.bf16.msra.mxu0 %v2753_v60  ;;  %1804 = vmatpush1.bf16.msra.mxu1 %v2754_v61  ;;  %v2844_v60 = vld [vmem:[%s4022_s1 + $0x3a8] ss:$16 sps:$4 sm:$0xff]   ;;  %v2849_v61 = vld [vmem:[%s4022_s1 + $0x3c4] ss:$16 sps:$4 sm:$0xff]  }
  0x3c   :  { %1641 = vmatprep.subr.bf16.mxu0 %v2755_v62  ;;  %1805 = vmatprep.subr.bf16.mxu1 %v2757_v63  ;;  %v2852_v62 = vld [vmem:[%s4022_s1 + $0x3cc] ss:$16 sps:$4 sm:$0xff]   ;;  %v2847_v63 = vld [vmem:[%s4022_s1 + $0x3c0] ss:$16 sps:$4 sm:$0xff]  }
  0x3f   :  { %1642 = vmatpush1.bf16.msra.mxu0 %v2759_v0  ;;  %1806 = vmatpush1.bf16.msra.mxu1 %v2760_v1  ;;  %v2850_v0 = vld [vmem:[%s4022_s1 + $0x3c8] ss:$16 sps:$4 sm:$0xff]   ;;  %v2855_v1 = vld [vmem:[%s4022_s1 + $0x3e4] ss:$16 sps:$4 sm:$0xff]  }
  0x40   :  { %1652 = vmatprep.subr.bf16.mxu0 %v2765_v2  ;;  %1816 = vmatprep.subr.bf16.mxu1 %v2768_v3  ;;  %v2858_v2 = vld [vmem:[%s4022_s1 + $0x3ec] ss:$16 sps:$4 sm:$0xff]   ;;  %v2853_v3 = vld [vmem:[%s4022_s1 + $0x3e0] ss:$16 sps:$4 sm:$0xff]  }
  0x42   :  { %1644 = vmatmul.mubr.bf16.vlgmr.msra.gmra.mrb[0].mxu0 %v2296_v4  ;;  %1808 = vmatmul.mubr.bf16.vlgmr.msra.gmra.mrb[0].mxu1 %v2296_v4  ;;  %v2856_v4 = vld [vmem:[%s4022_s1 + $0x3e8] ss:$16 sps:$4 sm:$0xff]  }
  0x43   :  { %1653 = vmatpush1.bf16.msra.mxu0 %v2763_v5  ;;  %1817 = vmatpush1.bf16.msra.mxu1 %v2766_v6  ;;  %v2863_v5 = vld [vmem:[%s4022_s1 + $0x404] ss:$16 sps:$4 sm:$0xff]   ;;  %v2866_v6 = vld [vmem:[%s4022_s1 + $0x40c] ss:$16 sps:$4 sm:$0xff]  }
  0x44   :  { %1654 = vmatprep.subr.bf16.mxu0 %v2771_v7  ;;  %1818 = vmatprep.subr.bf16.mxu1 %v2774_v8  ;;  %v2298_v7 = vcombine.low %v3395_v29, %v3395_v29  ;;  %v2861_v8 = vld [vmem:[%s4022_s1 + $0x400] ss:$16 sps:$4 sm:$0xff]   ;;  %v2896_v29 = vld [vmem:[%s4022_s1 + $0x4ac] ss:$16 sps:$4 sm:$0xff]  }
  0x45   :  { %1684 = vmatprep.mubr.bf16.mxu0 %v2299_v30  ;;  %1848 = vmatprep.mubr.bf16.mxu1 %v2299_v30  ;;  %v2891_v30 = vld [vmem:[%s4022_s1 + $0x4a0] ss:$16 sps:$4 sm:$0xff]  }
  0x47   :  { %1655 = vmatpush1.bf16.msra.mxu0 %v2769_v9  ;;  %1819 = vmatpush1.bf16.msra.mxu1 %v2772_v10  ;;  %v2864_v9 = vld [vmem:[%s4022_s1 + $0x408] ss:$16 sps:$4 sm:$0xff]   ;;  %v2869_v10 = vld [vmem:[%s4022_s1 + $0x424] ss:$16 sps:$4 sm:$0xff]  }
  0x48   :  { %1656 = vmatprep.subr.bf16.mxu0 %v2777_v11  ;;  %1820 = vmatprep.subr.bf16.mxu1 %v2780_v12  ;;  %v3533_v11 = vld [vmem:[%s4023_s0 + $0x10] sm:$0xff]  ;;  %v2872_v12 = vld [vmem:[%s4022_s1 + $0x42c] ss:$16 sps:$4 sm:$0xff]  }
  0x4b   :  { %1657 = vmatpush1.bf16.msra.mxu0 %v2775_v13  ;;  %1821 = vmatpush1.bf16.msra.mxu1 %v2778_v14  ;;  %v2301_v13 = vcombine.high %v3533_v11, %v3533_v11  ;;  %v2867_v14 = vld [vmem:[%s4022_s1 + $0x420] ss:$16 sps:$4 sm:$0xff]  }
  0x4c   :  { %1658 = vmatprep.subr.bf16.mxu0 %v2783_v15  ;;  %1822 = vmatprep.subr.bf16.mxu1 %v2786_v16  ;;  %v2870_v15 = vld [vmem:[%s4022_s1 + $0x428] ss:$16 sps:$4 sm:$0xff]   ;;  %v2875_v16 = vld [vmem:[%s4022_s1 + $0x444] ss:$16 sps:$4 sm:$0xff]  }
  0x4f   :  { %1659 = vmatpush1.bf16.msra.mxu0 %v2781_v17  ;;  %1823 = vmatpush1.bf16.msra.mxu1 %v2784_v18  ;;  %v2878_v17 = vld [vmem:[%s4022_s1 + $0x44c] ss:$16 sps:$4 sm:$0xff]   ;;  %v2873_v18 = vld [vmem:[%s4022_s1 + $0x440] ss:$16 sps:$4 sm:$0xff]  }
  0x50   :  { %1660 = vmatprep.subr.bf16.mxu0 %v2789_v19  ;;  %1824 = vmatprep.subr.bf16.mxu1 %v2792_v20  ;;  %v2876_v19 = vld [vmem:[%s4022_s1 + $0x448] ss:$16 sps:$4 sm:$0xff]   ;;  %v2881_v20 = vld [vmem:[%s4022_s1 + $0x464] ss:$16 sps:$4 sm:$0xff]  }
  0x53   :  { %1661 = vmatpush1.bf16.msra.mxu0 %v2787_v21  ;;  %1825 = vmatpush1.bf16.msra.mxu1 %v2790_v22  ;;  %v2884_v21 = vld [vmem:[%s4022_s1 + $0x46c] ss:$16 sps:$4 sm:$0xff]   ;;  %v2879_v22 = vld [vmem:[%s4022_s1 + $0x460] ss:$16 sps:$4 sm:$0xff]  }
  0x54   :  { %1662 = vmatprep.subr.bf16.mxu0 %v2795_v23  ;;  %1826 = vmatprep.subr.bf16.mxu1 %v2798_v24  ;;  %v2882_v23 = vld [vmem:[%s4022_s1 + $0x468] ss:$16 sps:$4 sm:$0xff]   ;;  %v2887_v24 = vld [vmem:[%s4022_s1 + $0x484] ss:$16 sps:$4 sm:$0xff]  }
  0x57   :  { %1663 = vmatpush1.bf16.msra.mxu0 %v2793_v25  ;;  %1827 = vmatpush1.bf16.msra.mxu1 %v2796_v26  ;;  %v2890_v25 = vld [vmem:[%s4022_s1 + $0x48c] ss:$16 sps:$4 sm:$0xff]   ;;  %v2885_v26 = vld [vmem:[%s4022_s1 + $0x480] ss:$16 sps:$4 sm:$0xff]  }
  0x58   :  { %1664 = vmatprep.subr.bf16.mxu0 %v2801_v27  ;;  %1828 = vmatprep.subr.bf16.mxu1 %v2804_v28  ;;  %v2888_v27 = vld [vmem:[%s4022_s1 + $0x488] ss:$16 sps:$4 sm:$0xff]   ;;  %v2893_v28 = vld [vmem:[%s4022_s1 + $0x4a4] ss:$16 sps:$4 sm:$0xff]  }
  0x5b   :  { %1665 = vmatpush1.bf16.msra.mxu0 %v2799_v31  ;;  %1829 = vmatpush1.bf16.msra.mxu1 %v2802_v32  ;;  %v2894_v31 = vld [vmem:[%s4022_s1 + $0x4a8] ss:$16 sps:$4 sm:$0xff]   ;;  %v2899_v32 = vld [vmem:[%s4022_s1 + $0x4c4] ss:$16 sps:$4 sm:$0xff]  }
  0x5c   :  { %1666 = vmatprep.subr.bf16.mxu0 %v2807_v33  ;;  %1830 = vmatprep.subr.bf16.mxu1 %v2810_v34  ;;  %v2902_v33 = vld [vmem:[%s4022_s1 + $0x4cc] ss:$16 sps:$4 sm:$0xff]   ;;  %v2897_v34 = vld [vmem:[%s4022_s1 + $0x4c0] ss:$16 sps:$4 sm:$0xff]  }
  0x5f   :  { %1667 = vmatpush1.bf16.msra.mxu0 %v2805_v35  ;;  %1831 = vmatpush1.bf16.msra.mxu1 %v2808_v36  ;;  %v2900_v35 = vld [vmem:[%s4022_s1 + $0x4c8] ss:$16 sps:$4 sm:$0xff]   ;;  %v2905_v36 = vld [vmem:[%s4022_s1 + $0x4e4] ss:$16 sps:$4 sm:$0xff]  }
  0x60   :  { %1668 = vmatprep.subr.bf16.mxu0 %v2813_v37  ;;  %1832 = vmatprep.subr.bf16.mxu1 %v2816_v38  ;;  %v2908_v37 = vld [vmem:[%s4022_s1 + $0x4ec] ss:$16 sps:$4 sm:$0xff]   ;;  %v2903_v38 = vld [vmem:[%s4022_s1 + $0x4e0] ss:$16 sps:$4 sm:$0xff]  }
  0x63   :  { %1669 = vmatpush1.bf16.msra.mxu0 %v2811_v39  ;;  %1833 = vmatpush1.bf16.msra.mxu1 %v2814_v40  ;;  %v2906_v39 = vld [vmem:[%s4022_s1 + $0x4e8] ss:$16 sps:$4 sm:$0xff]   ;;  %v2911_v40 = vld [vmem:[%s4022_s1 + $0x504] ss:$16 sps:$4 sm:$0xff]  }
  0x64   :  { %1670 = vmatprep.subr.bf16.mxu0 %v2819_v41  ;;  %1834 = vmatprep.subr.bf16.mxu1 %v2822_v42  ;;  %v2914_v41 = vld [vmem:[%s4022_s1 + $0x50c] ss:$16 sps:$4 sm:$0xff]   ;;  %v2909_v42 = vld [vmem:[%s4022_s1 + $0x500] ss:$16 sps:$4 sm:$0xff]  }
  0x67   :  { %1671 = vmatpush1.bf16.msra.mxu0 %v2817_v43  ;;  %1835 = vmatpush1.bf16.msra.mxu1 %v2820_v44  ;;  %v2912_v43 = vld [vmem:[%s4022_s1 + $0x508] ss:$16 sps:$4 sm:$0xff]   ;;  %v2917_v44 = vld [vmem:[%s4022_s1 + $0x524] ss:$16 sps:$4 sm:$0xff]  }
  0x68   :  { %1672 = vmatprep.subr.bf16.mxu0 %v2825_v45  ;;  %1836 = vmatprep.subr.bf16.mxu1 %v2828_v46  ;;  %v2920_v45 = vld [vmem:[%s4022_s1 + $0x52c] ss:$16 sps:$4 sm:$0xff]   ;;  %v2915_v46 = vld [vmem:[%s4022_s1 + $0x520] ss:$16 sps:$4 sm:$0xff]  }
  0x6b   :  { %1673 = vmatpush1.bf16.msra.mxu0 %v2823_v47  ;;  %1837 = vmatpush1.bf16.msra.mxu1 %v2826_v48  ;;  %v2918_v47 = vld [vmem:[%s4022_s1 + $0x528] ss:$16 sps:$4 sm:$0xff]   ;;  %v2923_v48 = vld [vmem:[%s4022_s1 + $0x544] ss:$16 sps:$4 sm:$0xff]  }
  0x6c   :  { %1674 = vmatprep.subr.bf16.mxu0 %v2831_v49  ;;  %1838 = vmatprep.subr.bf16.mxu1 %v2834_v50  ;;  %v2926_v49 = vld [vmem:[%s4022_s1 + $0x54c] ss:$16 sps:$4 sm:$0xff]   ;;  %v2921_v50 = vld [vmem:[%s4022_s1 + $0x540] ss:$16 sps:$4 sm:$0xff]  }
  0x6f   :  { %1675 = vmatpush1.bf16.msra.mxu0 %v2829_v51  ;;  %1839 = vmatpush1.bf16.msra.mxu1 %v2832_v52  ;;  %v2924_v51 = vld [vmem:[%s4022_s1 + $0x548] ss:$16 sps:$4 sm:$0xff]   ;;  %v2929_v52 = vld [vmem:[%s4022_s1 + $0x564] ss:$16 sps:$4 sm:$0xff]  }
  0x70   :  { %1676 = vmatprep.subr.bf16.mxu0 %v2837_v53  ;;  %1840 = vmatprep.subr.bf16.mxu1 %v2840_v54  ;;  %v2932_v53 = vld [vmem:[%s4022_s1 + $0x56c] ss:$16 sps:$4 sm:$0xff]   ;;  %v2927_v54 = vld [vmem:[%s4022_s1 + $0x560] ss:$16 sps:$4 sm:$0xff]  }
  0x73   :  { %1677 = vmatpush1.bf16.msra.mxu0 %v2835_v55  ;;  %1841 = vmatpush1.bf16.msra.mxu1 %v2838_v56  ;;  %v2930_v55 = vld [vmem:[%s4022_s1 + $0x568] ss:$16 sps:$4 sm:$0xff]   ;;  %v2935_v56 = vld [vmem:[%s4022_s1 + $0x584] ss:$16 sps:$4 sm:$0xff]  }
  0x74   :  { %1678 = vmatprep.subr.bf16.mxu0 %v2843_v57  ;;  %1842 = vmatprep.subr.bf16.mxu1 %v2846_v58  ;;  %v2938_v57 = vld [vmem:[%s4022_s1 + $0x58c] ss:$16 sps:$4 sm:$0xff]   ;;  %v2933_v58 = vld [vmem:[%s4022_s1 + $0x580] ss:$16 sps:$4 sm:$0xff]  }
  0x77   :  { %1679 = vmatpush1.bf16.msra.mxu0 %v2841_v59  ;;  %1843 = vmatpush1.bf16.msra.mxu1 %v2844_v60  ;;  %v2936_v59 = vld [vmem:[%s4022_s1 + $0x588] ss:$16 sps:$4 sm:$0xff]   ;;  %v2941_v60 = vld [vmem:[%s4022_s1 + $0x5a4] ss:$16 sps:$4 sm:$0xff]  }
  0x78   :  { %1680 = vmatprep.subr.bf16.mxu0 %v2849_v61  ;;  %1844 = vmatprep.subr.bf16.mxu1 %v2852_v62  ;;  %v2944_v61 = vld [vmem:[%s4022_s1 + $0x5ac] ss:$16 sps:$4 sm:$0xff]   ;;  %v2939_v62 = vld [vmem:[%s4022_s1 + $0x5a0] ss:$16 sps:$4 sm:$0xff]  }
  0x7b   :  { %1681 = vmatpush1.bf16.msra.mxu0 %v2847_v63  ;;  %1845 = vmatpush1.bf16.msra.mxu1 %v2850_v0  ;;  %v2942_v63 = vld [vmem:[%s4022_s1 + $0x5a8] ss:$16 sps:$4 sm:$0xff]   ;;  %v2947_v0 = vld [vmem:[%s4022_s1 + $0x5c4] ss:$16 sps:$4 sm:$0xff]  }
  0x7c   :  { %1682 = vmatprep.subr.bf16.mxu0 %v2855_v1  ;;  %1846 = vmatprep.subr.bf16.mxu1 %v2858_v2  ;;  %v2950_v1 = vld [vmem:[%s4022_s1 + $0x5cc] ss:$16 sps:$4 sm:$0xff]   ;;  %v2945_v2 = vld [vmem:[%s4022_s1 + $0x5c0] ss:$16 sps:$4 sm:$0xff]  }
  0x7f   :  { %1683 = vmatpush1.bf16.msra.mxu0 %v2853_v3  ;;  %1847 = vmatpush1.bf16.msra.mxu1 %v2856_v4  ;;  %v2948_v3 = vld [vmem:[%s4022_s1 + $0x5c8] ss:$16 sps:$4 sm:$0xff]   ;;  %v2953_v4 = vld [vmem:[%s4022_s1 + $0x5e4] ss:$16 sps:$4 sm:$0xff]  }
  0x80   :  { %1693 = vmatprep.subr.bf16.mxu0 %v2863_v5  ;;  %1857 = vmatprep.subr.bf16.mxu1 %v2866_v6  ;;  %v2956_v5 = vld [vmem:[%s4022_s1 + $0x5ec] ss:$16 sps:$4 sm:$0xff]   ;;  %v2951_v6 = vld [vmem:[%s4022_s1 + $0x5e0] ss:$16 sps:$4 sm:$0xff]  }
  0x82   :  { %1685 = vmatmul.mubr.bf16.vlgmr.msra.gmra.mrb[0].mxu0 %v2298_v7  ;;  %1849 = vmatmul.mubr.bf16.vlgmr.msra.gmra.mrb[0].mxu1 %v2298_v7  ;;  %v2954_v7 = vld [vmem:[%s4022_s1 + $0x5e8] ss:$16 sps:$4 sm:$0xff]  }
  0x83   :  { %1694 = vmatpush1.bf16.msra.mxu0 %v2861_v8  ;;  %1858 = vmatpush1.bf16.msra.mxu1 %v2864_v9  ;;  %v2961_v8 = vld [vmem:[%s4022_s1 + $0x604] ss:$16 sps:$4 sm:$0xff]   ;;  %v2964_v9 = vld [vmem:[%s4022_s1 + $0x60c] ss:$16 sps:$4 sm:$0xff]  }
  0x84   :  { %1695 = vmatprep.subr.bf16.mxu0 %v2869_v10  ;;  %1859 = vmatprep.subr.bf16.mxu1 %v2872_v12  ;;  %v2959_v10 = vld [vmem:[%s4022_s1 + $0x600] ss:$16 sps:$4 sm:$0xff]   ;;  %v2962_v12 = vld [vmem:[%s4022_s1 + $0x608] ss:$16 sps:$4 sm:$0xff]  }
  0x85   :  { %1725 = vmatprep.mubr.bf16.mxu0 %v2301_v13  ;;  %1889 = vmatprep.mubr.bf16.mxu1 %v2301_v13  ;;  %v2300_v13 = vcombine.low %v3533_v11, %v3533_v11  ;;  %v2965_v11 = vld [vmem:[%s4022_s1 + $0x620] ss:$16 sps:$4 sm:$0xff]  }
  0x87   :  { %1696 = vmatpush1.bf16.msra.mxu0 %v2867_v14  ;;  %1860 = vmatpush1.bf16.msra.mxu1 %v2870_v15  ;;  %v3731_v14 = vld [vmem:[%s4023_s0 + $0x18] sm:$0xff]  ;;  %v2967_v15 = vld [vmem:[%s4022_s1 + $0x624] ss:$16 sps:$4 sm:$0xff]  }
  0x88   :  { %1697 = vmatprep.subr.bf16.mxu0 %v2875_v16  ;;  %1861 = vmatprep.subr.bf16.mxu1 %v2878_v17  ;;  %v2970_v16 = vld [vmem:[%s4022_s1 + $0x62c] ss:$16 sps:$4 sm:$0xff]   ;;  %v2968_v17 = vld [vmem:[%s4022_s1 + $0x628] ss:$16 sps:$4 sm:$0xff]  }
  0x8b   :  { %1698 = vmatpush1.bf16.msra.mxu0 %v2873_v18  ;;  %1862 = vmatpush1.bf16.msra.mxu1 %v2876_v19  ;;  %v2303_v18 = vcombine.high %v3731_v14, %v3731_v14  ;;  %v2973_v19 = vld [vmem:[%s4022_s1 + $0x644] ss:$16 sps:$4 sm:$0xff]  }
  0x8c   :  { %1699 = vmatprep.subr.bf16.mxu0 %v2881_v20  ;;  %1863 = vmatprep.subr.bf16.mxu1 %v2884_v21  ;;  %v2976_v20 = vld [vmem:[%s4022_s1 + $0x64c] ss:$16 sps:$4 sm:$0xff]   ;;  %v2971_v21 = vld [vmem:[%s4022_s1 + $0x640] ss:$16 sps:$4 sm:$0xff]  }
  0x8f   :  { %1700 = vmatpush1.bf16.msra.mxu0 %v2879_v22  ;;  %1864 = vmatpush1.bf16.msra.mxu1 %v2882_v23  ;;  %v2974_v22 = vld [vmem:[%s4022_s1 + $0x648] ss:$16 sps:$4 sm:$0xff]   ;;  %v2979_v23 = vld [vmem:[%s4022_s1 + $0x664] ss:$16 sps:$4 sm:$0xff]  }
  0x90   :  { %1701 = vmatprep.subr.bf16.mxu0 %v2887_v24  ;;  %1865 = vmatprep.subr.bf16.mxu1 %v2890_v25  ;;  %v2982_v24 = vld [vmem:[%s4022_s1 + $0x66c] ss:$16 sps:$4 sm:$0xff]   ;;  %v2977_v25 = vld [vmem:[%s4022_s1 + $0x660] ss:$16 sps:$4 sm:$0xff]  }
  0x93   :  { %1702 = vmatpush1.bf16.msra.mxu0 %v2885_v26  ;;  %1866 = vmatpush1.bf16.msra.mxu1 %v2888_v27  ;;  %v2980_v26 = vld [vmem:[%s4022_s1 + $0x668] ss:$16 sps:$4 sm:$0xff]   ;;  %v2985_v27 = vld [vmem:[%s4022_s1 + $0x684] ss:$16 sps:$4 sm:$0xff]  }
  0x94   :  { %1703 = vmatprep.subr.bf16.mxu0 %v2893_v28  ;;  %1867 = vmatprep.subr.bf16.mxu1 %v2896_v29  ;;  %v2988_v28 = vld [vmem:[%s4022_s1 + $0x68c] ss:$16 sps:$4 sm:$0xff]   ;;  %v2983_v29 = vld [vmem:[%s4022_s1 + $0x680] ss:$16 sps:$4 sm:$0xff]  }
  0x97   :  { %1704 = vmatpush1.bf16.msra.mxu0 %v2891_v30  ;;  %1868 = vmatpush1.bf16.msra.mxu1 %v2894_v31  ;;  %v2986_v30 = vld [vmem:[%s4022_s1 + $0x688] ss:$16 sps:$4 sm:$0xff]   ;;  %v2991_v31 = vld [vmem:[%s4022_s1 + $0x6a4] ss:$16 sps:$4 sm:$0xff]  }
  0x98   :  { %1705 = vmatprep.subr.bf16.mxu0 %v2899_v32  ;;  %1869 = vmatprep.subr.bf16.mxu1 %v2902_v33  ;;  %v2994_v32 = vld [vmem:[%s4022_s1 + $0x6ac] ss:$16 sps:$4 sm:$0xff]   ;;  %v2989_v33 = vld [vmem:[%s4022_s1 + $0x6a0] ss:$16 sps:$4 sm:$0xff]  }
  0x9b   :  { %1706 = vmatpush1.bf16.msra.mxu0 %v2897_v34  ;;  %1870 = vmatpush1.bf16.msra.mxu1 %v2900_v35  ;;  %v2992_v34 = vld [vmem:[%s4022_s1 + $0x6a8] ss:$16 sps:$4 sm:$0xff]   ;;  %v2997_v35 = vld [vmem:[%s4022_s1 + $0x6c4] ss:$16 sps:$4 sm:$0xff]  }
  0x9c   :  { %1707 = vmatprep.subr.bf16.mxu0 %v2905_v36  ;;  %1871 = vmatprep.subr.bf16.mxu1 %v2908_v37  ;;  %v3000_v36 = vld [vmem:[%s4022_s1 + $0x6cc] ss:$16 sps:$4 sm:$0xff]   ;;  %v2995_v37 = vld [vmem:[%s4022_s1 + $0x6c0] ss:$16 sps:$4 sm:$0xff]  }
  0x9f   :  { %1708 = vmatpush1.bf16.msra.mxu0 %v2903_v38  ;;  %1872 = vmatpush1.bf16.msra.mxu1 %v2906_v39  ;;  %v2998_v38 = vld [vmem:[%s4022_s1 + $0x6c8] ss:$16 sps:$4 sm:$0xff]   ;;  %v3003_v39 = vld [vmem:[%s4022_s1 + $0x6e4] ss:$16 sps:$4 sm:$0xff]  }
  0xa0   :  { %1709 = vmatprep.subr.bf16.mxu0 %v2911_v40  ;;  %1873 = vmatprep.subr.bf16.mxu1 %v2914_v41  ;;  %v3006_v40 = vld [vmem:[%s4022_s1 + $0x6ec] ss:$16 sps:$4 sm:$0xff]   ;;  %v3001_v41 = vld [vmem:[%s4022_s1 + $0x6e0] ss:$16 sps:$4 sm:$0xff]  }
  0xa3   :  { %1710 = vmatpush1.bf16.msra.mxu0 %v2909_v42  ;;  %1874 = vmatpush1.bf16.msra.mxu1 %v2912_v43  ;;  %v3004_v42 = vld [vmem:[%s4022_s1 + $0x6e8] ss:$16 sps:$4 sm:$0xff]   ;;  %v3009_v43 = vld [vmem:[%s4022_s1 + $0x704] ss:$16 sps:$4 sm:$0xff]  }
  0xa4   :  { %1711 = vmatprep.subr.bf16.mxu0 %v2917_v44  ;;  %1875 = vmatprep.subr.bf16.mxu1 %v2920_v45  ;;  %v3012_v44 = vld [vmem:[%s4022_s1 + $0x70c] ss:$16 sps:$4 sm:$0xff]   ;;  %v3007_v45 = vld [vmem:[%s4022_s1 + $0x700] ss:$16 sps:$4 sm:$0xff]  }
  0xa7   :  { %1712 = vmatpush1.bf16.msra.mxu0 %v2915_v46  ;;  %1876 = vmatpush1.bf16.msra.mxu1 %v2918_v47  ;;  %v3010_v46 = vld [vmem:[%s4022_s1 + $0x708] ss:$16 sps:$4 sm:$0xff]   ;;  %v3015_v47 = vld [vmem:[%s4022_s1 + $0x724] ss:$16 sps:$4 sm:$0xff]  }
  0xa8   :  { %1713 = vmatprep.subr.bf16.mxu0 %v2923_v48  ;;  %1877 = vmatprep.subr.bf16.mxu1 %v2926_v49  ;;  %v3018_v48 = vld [vmem:[%s4022_s1 + $0x72c] ss:$16 sps:$4 sm:$0xff]   ;;  %v3013_v49 = vld [vmem:[%s4022_s1 + $0x720] ss:$16 sps:$4 sm:$0xff]  }
  0xab   :  { %1714 = vmatpush1.bf16.msra.mxu0 %v2921_v50  ;;  %1878 = vmatpush1.bf16.msra.mxu1 %v2924_v51  ;;  %v3016_v50 = vld [vmem:[%s4022_s1 + $0x728] ss:$16 sps:$4 sm:$0xff]   ;;  %v3021_v51 = vld [vmem:[%s4022_s1 + $0x744] ss:$16 sps:$4 sm:$0xff]  }
  0xac   :  { %1715 = vmatprep.subr.bf16.mxu0 %v2929_v52  ;;  %1879 = vmatprep.subr.bf16.mxu1 %v2932_v53  ;;  %v3024_v52 = vld [vmem:[%s4022_s1 + $0x74c] ss:$16 sps:$4 sm:$0xff]   ;;  %v3019_v53 = vld [vmem:[%s4022_s1 + $0x740] ss:$16 sps:$4 sm:$0xff]  }
  0xaf   :  { %1716 = vmatpush1.bf16.msra.mxu0 %v2927_v54  ;;  %1880 = vmatpush1.bf16.msra.mxu1 %v2930_v55  ;;  %v3022_v54 = vld [vmem:[%s4022_s1 + $0x748] ss:$16 sps:$4 sm:$0xff]   ;;  %v3027_v55 = vld [vmem:[%s4022_s1 + $0x764] ss:$16 sps:$4 sm:$0xff]  }
  0xb0   :  { %1717 = vmatprep.subr.bf16.mxu0 %v2935_v56  ;;  %1881 = vmatprep.subr.bf16.mxu1 %v2938_v57  ;;  %v3030_v56 = vld [vmem:[%s4022_s1 + $0x76c] ss:$16 sps:$4 sm:$0xff]   ;;  %v3025_v57 = vld [vmem:[%s4022_s1 + $0x760] ss:$16 sps:$4 sm:$0xff]  }
  0xb3   :  { %1718 = vmatpush1.bf16.msra.mxu0 %v2933_v58  ;;  %1882 = vmatpush1.bf16.msra.mxu1 %v2936_v59  ;;  %v3028_v58 = vld [vmem:[%s4022_s1 + $0x768] ss:$16 sps:$4 sm:$0xff]   ;;  %v3033_v59 = vld [vmem:[%s4022_s1 + $0x784] ss:$16 sps:$4 sm:$0xff]  }
  0xb4   :  { %1719 = vmatprep.subr.bf16.mxu0 %v2941_v60  ;;  %1883 = vmatprep.subr.bf16.mxu1 %v2944_v61  ;;  %v3036_v60 = vld [vmem:[%s4022_s1 + $0x78c] ss:$16 sps:$4 sm:$0xff]   ;;  %v3031_v61 = vld [vmem:[%s4022_s1 + $0x780] ss:$16 sps:$4 sm:$0xff]  }
  0xb7   :  { %1720 = vmatpush1.bf16.msra.mxu0 %v2939_v62  ;;  %1884 = vmatpush1.bf16.msra.mxu1 %v2942_v63  ;;  %v3034_v62 = vld [vmem:[%s4022_s1 + $0x788] ss:$16 sps:$4 sm:$0xff]   ;;  %v3039_v63 = vld [vmem:[%s4022_s1 + $0x7a4] ss:$16 sps:$4 sm:$0xff]  }
  0xb8   :  { %1721 = vmatprep.subr.bf16.mxu0 %v2947_v0  ;;  %1885 = vmatprep.subr.bf16.mxu1 %v2950_v1  ;;  %v3042_v0 = vld [vmem:[%s4022_s1 + $0x7ac] ss:$16 sps:$4 sm:$0xff]   ;;  %v3037_v1 = vld [vmem:[%s4022_s1 + $0x7a0] ss:$16 sps:$4 sm:$0xff]  }
  0xbb   :  { %1722 = vmatpush1.bf16.msra.mxu0 %v2945_v2  ;;  %1886 = vmatpush1.bf16.msra.mxu1 %v2948_v3  ;;  %v3040_v2 = vld [vmem:[%s4022_s1 + $0x7a8] ss:$16 sps:$4 sm:$0xff]   ;;  %v3045_v3 = vld [vmem:[%s4022_s1 + $0x7c4] ss:$16 sps:$4 sm:$0xff]  }
  0xbc   :  { %1723 = vmatprep.subr.bf16.mxu0 %v2953_v4  ;;  %1887 = vmatprep.subr.bf16.mxu1 %v2956_v5  ;;  %v3048_v4 = vld [vmem:[%s4022_s1 + $0x7cc] ss:$16 sps:$4 sm:$0xff]   ;;  %v3043_v5 = vld [vmem:[%s4022_s1 + $0x7c0] ss:$16 sps:$4 sm:$0xff]  }
  0xbf   :  { %1724 = vmatpush1.bf16.msra.mxu0 %v2951_v6  ;;  %1888 = vmatpush1.bf16.msra.mxu1 %v2954_v7  ;;  %v3046_v6 = vld [vmem:[%s4022_s1 + $0x7c8] ss:$16 sps:$4 sm:$0xff]   ;;  %v3051_v7 = vld [vmem:[%s4022_s1 + $0x7e4] ss:$16 sps:$4 sm:$0xff]  }
  0xc0   :  { %1734 = vmatprep.subr.bf16.mxu0 %v2961_v8  ;;  %1898 = vmatprep.subr.bf16.mxu1 %v2964_v9  ;;  %v3054_v8 = vld [vmem:[%s4022_s1 + $0x7ec] ss:$16 sps:$4 sm:$0xff]   ;;  %v3049_v9 = vld [vmem:[%s4022_s1 + $0x7e0] ss:$16 sps:$4 sm:$0xff]  }
  0xc2   :  { %1726 = vmatmul.mubr.bf16.vlgmr.msra.gmra.mrb[0].mxu0 %v2300_v13  ;;  %1890 = vmatmul.mubr.bf16.vlgmr.msra.gmra.mrb[0].mxu1 %v2300_v13  ;;  %v3058_v13 = vld [vmem:[%s4024_s3 + $0xc0] sm:$0xff]  }
  0xc3   :  { %1735 = vmatpush1.bf16.msra.mxu0 %v2959_v10  ;;  %1899 = vmatpush1.bf16.msra.mxu1 %v2962_v12  ;;  %v3052_v10 = vld [vmem:[%s4022_s1 + $0x7e8] ss:$16 sps:$4 sm:$0xff]   ;;  %v3057_v12 = vld [vmem:[%s4024_s3 + $0x40] sm:$0xff]  }
  0xc4   :  { %1736 = vmatprep.subr.bf16.mxu0 %v2967_v15  ;;  %1900 = vmatprep.subr.bf16.mxu1 %v2970_v16  ;;  %v2302_v15 = vcombine.low %v3731_v14, %v3731_v14  ;;  %v3059_v16 = vld [vmem:[%s4024_s3] sm:$0xff]   ;;  %v3062_v14 = vld [vmem:[%s4024_s3 + $0xc8] sm:$0xff]  }
  0xc5   :  { %1766 = vmatprep.mubr.bf16.mxu0 %v2303_v18  ;;  %1930 = vmatprep.mubr.bf16.mxu1 %v2303_v18  ;;  %v3063_v18 = vld [vmem:[%s4024_s3 + $0x8] sm:$0xff]  }
  0xc7   :  { %1737 = vmatpush1.bf16.msra.mxu0 %v2965_v11  ;;  %1901 = vmatpush1.bf16.msra.mxu1 %v2968_v17  ;;  %v3060_v11 = vld [vmem:[%s4024_s3 + $0x80] sm:$0xff]   ;;  %v3061_v17 = vld [vmem:[%s4024_s3 + $0x48] sm:$0xff]  }
  0xc8   :  { %1738 = vmatprep.subr.bf16.mxu0 %v2973_v19  ;;  %1902 = vmatprep.subr.bf16.mxu1 %v2976_v20  ;;  %v3064_v19 = vld [vmem:[%s4024_s3 + $0x88] sm:$0xff]   ;;  %v3065_v20 = vld [vmem:[%s4024_s3 + $0x50] sm:$0xff]  }
  0xcb   :  { %1739 = vmatpush1.bf16.msra.mxu0 %v2971_v21  ;;  %1903 = vmatpush1.bf16.msra.mxu1 %v2974_v22  ;;  %v3066_v21 = vld [vmem:[%s4024_s3 + $0xd0] sm:$0xff]  }
  0xcc   :  { %1740 = vmatprep.subr.bf16.mxu0 %v2979_v23  ;;  %1904 = vmatprep.subr.bf16.mxu1 %v2982_v24  ;;  %v3067_v22 = vld [vmem:[%s4024_s3 + $0x10] sm:$0xff]   ;;  %v3069_v24 = vld [vmem:[%s4024_s3 + $0x58] sm:$0xff]  }
  0xcd   :  { %v3068_v23 = vld [vmem:[%s4024_s3 + $0x90] sm:$0xff]  }
  0xcf   :  { %1741 = vmatpush1.bf16.msra.mxu0 %v2977_v25  ;;  %1905 = vmatpush1.bf16.msra.mxu1 %v2980_v26  ;;  %v3070_v25 = vld [vmem:[%s4024_s3 + $0xd8] sm:$0xff]  }
  0xd0   :  { %1742 = vmatprep.subr.bf16.mxu0 %v2985_v27  ;;  %1906 = vmatprep.subr.bf16.mxu1 %v2988_v28  ;;  %v3071_v26 = vld [vmem:[%s4024_s3 + $0x18] sm:$0xff]   ;;  %v3073_v28 = vld [vmem:[%s4024_s3 + $0x60] sm:$0xff]  }
  0xd1   :  { %v3072_v27 = vld [vmem:[%s4024_s3 + $0x98] sm:$0xff]  }
  0xd3   :  { %1743 = vmatpush1.bf16.msra.mxu0 %v2983_v29  ;;  %1907 = vmatpush1.bf16.msra.mxu1 %v2986_v30  ;;  %v3074_v29 = vld [vmem:[%s4024_s3 + $0xe0] sm:$0xff]  }
  0xd4   :  { %1744 = vmatprep.subr.bf16.mxu0 %v2991_v31  ;;  %1908 = vmatprep.subr.bf16.mxu1 %v2994_v32  ;;  %v3075_v30 = vld [vmem:[%s4024_s3 + $0x20] sm:$0xff]   ;;  %v3077_v32 = vld [vmem:[%s4024_s3 + $0x68] sm:$0xff]  }
  0xd5   :  { %v3076_v31 = vld [vmem:[%s4024_s3 + $0xa0] sm:$0xff]  }
  0xd7   :  { %1745 = vmatpush1.bf16.msra.mxu0 %v2989_v33  ;;  %1909 = vmatpush1.bf16.msra.mxu1 %v2992_v34  ;;  %v3078_v33 = vld [vmem:[%s4024_s3 + $0xe8] sm:$0xff]  }
  0xd8   :  { %1746 = vmatprep.subr.bf16.mxu0 %v2997_v35  ;;  %1910 = vmatprep.subr.bf16.mxu1 %v3000_v36  ;;  %v3079_v34 = vld [vmem:[%s4024_s3 + $0x28] sm:$0xff]   ;;  %v3081_v36 = vld [vmem:[%s4024_s3 + $0x70] sm:$0xff]  }
  0xd9   :  { %v3080_v35 = vld [vmem:[%s4024_s3 + $0xa8] sm:$0xff]  }
  0xdb   :  { %1747 = vmatpush1.bf16.msra.mxu0 %v2995_v37  ;;  %1911 = vmatpush1.bf16.msra.mxu1 %v2998_v38  ;;  %v3082_v37 = vld [vmem:[%s4024_s3 + $0xf0] sm:$0xff]  }
  0xdc   :  { %1748 = vmatprep.subr.bf16.mxu0 %v3003_v39  ;;  %1912 = vmatprep.subr.bf16.mxu1 %v3006_v40  ;;  %v3083_v38 = vld [vmem:[%s4024_s3 + $0x30] sm:$0xff]   ;;  %v3085_v40 = vld [vmem:[%s4024_s3 + $0x78] sm:$0xff]  }
  0xdd   :  { %v3084_v39 = vld [vmem:[%s4024_s3 + $0xb0] sm:$0xff]  }
  0xdf   :  { %1749 = vmatpush1.bf16.msra.mxu0 %v3001_v41  ;;  %1913 = vmatpush1.bf16.msra.mxu1 %v3004_v42  ;;  %v3086_v41 = vld [vmem:[%s4024_s3 + $0xf8] sm:$0xff]  }
  0xe0   :  { %1750 = vmatprep.subr.bf16.mxu0 %v3009_v43  ;;  %1914 = vmatprep.subr.bf16.mxu1 %v3012_v44  ;;  %v3087_v42 = vld [vmem:[%s4024_s3 + $0x38] sm:$0xff]   ;;  %v283_v44 = vlaneseq }
  0xe1   :  { %v3088_v43 = vld [vmem:[%s4024_s3 + $0xb8] sm:$0xff]  }
  0xe3   :  { %1751 = vmatpush1.bf16.msra.mxu0 %v3007_v45  ;;  %1915 = vmatpush1.bf16.msra.mxu1 %v3010_v46  ;;  %v284_v45 = vshrl.u32 %v283_v44, 7 }
  0xe4   :  { %1752 = vmatprep.subr.bf16.mxu0 %v3015_v47  ;;  %1916 = vmatprep.subr.bf16.mxu1 %v3018_v48  ;;  %v281_v48 = vld [vmem:[%s4025_s2] sm:$0xf] }
  0xe5   :  { %v285_v46 = vsub.s32 0, %v284_v45  ;;  %v293_v47 = vsub.s32 2, %v284_v45 }
  0xe7   :  { %1753 = vmatpush1.bf16.msra.mxu0 %v3013_v49  ;;  %1917 = vmatpush1.bf16.msra.mxu1 %v3016_v50  ;;  %v289_v49 = vsub.s32 1, %v284_v45  ;;  %v297_v50 = vsub.s32 3, %v284_v45 }
  0xe8   :  { %1754 = vmatprep.subr.bf16.mxu0 %v3021_v51  ;;  %1918 = vmatprep.subr.bf16.mxu1 %v3024_v52  ;;  %v286_v51 = vrot.slane %v281_v48, %v285_v46  ;;  %v294_v52 = vrot.slane %v281_v48, %v293_v47 }
  0xeb   :  { %1755 = vmatpush1.bf16.msra.mxu0 %v3019_v53  ;;  %1919 = vmatpush1.bf16.msra.mxu1 %v3022_v54  ;;  %v290_v53 = vrot.slane %v281_v48, %v289_v49  ;;  %v298_v54 = vrot.slane %v281_v48, %v297_v50 }
  0xec   :  { %1756 = vmatprep.subr.bf16.mxu0 %v3027_v55  ;;  %1920 = vmatprep.subr.bf16.mxu1 %v3030_v56 }
  0xef   :  { %1757 = vmatpush1.bf16.msra.mxu0 %v3025_v57  ;;  %1921 = vmatpush1.bf16.msra.mxu1 %v3028_v58 }
  0xf0   :  { %1758 = vmatprep.subr.bf16.mxu0 %v3033_v59  ;;  %1922 = vmatprep.subr.bf16.mxu1 %v3036_v60 }
  0xf3   :  { %1759 = vmatpush1.bf16.msra.mxu0 %v3031_v61  ;;  %1923 = vmatpush1.bf16.msra.mxu1 %v3034_v62 }
  0xf4   :  { %1760 = vmatprep.subr.bf16.mxu0 %v3039_v63  ;;  %1924 = vmatprep.subr.bf16.mxu1 %v3042_v0 }
  0xf7   :  { %1761 = vmatpush1.bf16.msra.mxu0 %v3037_v1  ;;  %1925 = vmatpush1.bf16.msra.mxu1 %v3040_v2 }
  0xf8   :  { %1762 = vmatprep.subr.bf16.mxu0 %v3045_v3  ;;  %1926 = vmatprep.subr.bf16.mxu1 %v3048_v4 }
  0xfb   :  { %1763 = vmatpush1.bf16.msra.mxu0 %v3043_v5  ;;  %1927 = vmatpush1.bf16.msra.mxu1 %v3046_v6 }
  0xfc   :  { %1764 = vmatprep.subr.bf16.mxu0 %v3051_v7  ;;  %1928 = vmatprep.subr.bf16.mxu1 %v3054_v8 }
  0xff   :  { %1765 = vmatpush1.bf16.msra.mxu0 %v3049_v9  ;;  %1929 = vmatpush1.bf16.msra.mxu1 %v3052_v10 }
 0x100   :  { %2593 = vmatprep.subr.bf16.mxu0 %v3057_v12  ;;  %2615 = vmatprep.subr.bf16.mxu1 %v3058_v13 }
 0x102   :  { %1767 = vmatmul.mubr.bf16.vlgmr.msra.gmra.mrb[0].mxu0 %v2302_v15  ;;  %1931 = vmatmul.mubr.bf16.vlgmr.msra.gmra.mrb[0].mxu1 %v2302_v15  ;;  %v2560_v15 = vld [vmem:[%s4026_s4] ss:$0 sm:$0xff] }
 0x103   :  { %2594 = vmatpush3.bf16.msra.mxu0 %v3059_v16  ;;  %2616 = vmatpush3.bf16.msra.mxu1 %v3060_v11 }
 0x104   :  { %2595 = vmatprep.subr.bf16.mxu0 %v3061_v17  ;;  %2617 = vmatprep.subr.bf16.mxu1 %v3062_v14 }
 0x107   :  { %2596 = vmatpush3.bf16.msra.mxu0 %v3063_v18  ;;  %2618 = vmatpush3.bf16.msra.mxu1 %v3064_v19 }
 0x108   :  { %2597 = vmatprep.subr.bf16.mxu0 %v3065_v20  ;;  %2619 = vmatprep.subr.bf16.mxu1 %v3066_v21 }
 0x10b   :  { %2598 = vmatpush3.bf16.msra.mxu0 %v3067_v22  ;;  %2620 = vmatpush3.bf16.msra.mxu1 %v3068_v23 }
 0x10c   :  { %2599 = vmatprep.subr.bf16.mxu0 %v3069_v24  ;;  %2621 = vmatprep.subr.bf16.mxu1 %v3070_v25 }
 0x10f   :  { %2600 = vmatpush3.bf16.msra.mxu0 %v3071_v26  ;;  %2622 = vmatpush3.bf16.msra.mxu1 %v3072_v27 }
 0x110   :  { %2601 = vmatprep.subr.bf16.mxu0 %v3073_v28  ;;  %2623 = vmatprep.subr.bf16.mxu1 %v3074_v29 }
 0x113   :  { %2602 = vmatpush3.bf16.msra.mxu0 %v3075_v30  ;;  %2624 = vmatpush3.bf16.msra.mxu1 %v3076_v31 }
 0x114   :  { %2603 = vmatprep.subr.bf16.mxu0 %v3077_v32  ;;  %2625 = vmatprep.subr.bf16.mxu1 %v3078_v33 }
 0x117   :  { %2604 = vmatpush3.bf16.msra.mxu0 %v3079_v34  ;;  %2626 = vmatpush3.bf16.msra.mxu1 %v3080_v35 }
 0x118   :  { %2605 = vmatprep.subr.bf16.mxu0 %v3081_v36  ;;  %2627 = vmatprep.subr.bf16.mxu1 %v3082_v37 }
 0x11b   :  { %2606 = vmatpush3.bf16.msra.mxu0 %v3083_v38  ;;  %2628 = vmatpush3.bf16.msra.mxu1 %v3084_v39 }
 0x11c   :  { %2607 = vmatprep.subr.bf16.mxu0 %v3085_v40  ;;  %2629 = vmatprep.subr.bf16.mxu1 %v3086_v41 }
 0x11f   :  { %2608 = vmatpush3.bf16.msra.mxu0 %v3087_v42  ;;  %2630 = vmatpush3.bf16.msra.mxu1 %v3088_v43 }
 0x1d5   :  { %v1768_v55 = vpop.f32.mrb[0].mxu0  ;;  %v1932_v56 = vpop.f32.mrb[0].mxu1 }
 0x1d6   :  { %v2637_v57 = vadd.f32 %v1768_v55, %v286_v51  ;;  %v2639_v58 = vadd.f32 %v1932_v56, %v294_v52  ;;  %v1770_v59 = vpop.f32.mrb[1].mxu0  ;;  %v1934_v60 = vpop.f32.mrb[1].mxu1 }
 0x1d7   :  { %v2638_v61 = vadd.f32 %v1770_v59, %v290_v53  ;;  %v2640_v62 = vadd.f32 %v1934_v60, %v298_v54  ;;  %v1772_v63 = vpop.f32.mrb[2].mxu0  ;;  %v1936_v0 = vpop.f32.mrb[2].mxu1 }
 0x1d8   :  { %v1939_v1 = vmax.f32 %v2637_v57, 0.0  ;;  %v1941_v2 = vmax.f32 %v2639_v58, 0.0  ;;  %v1773_v3 = vpop.f32.mrb[3].mxu0  ;;  %v1937_v4 = vpop.f32.mrb[3].mxu1 }
 0x1d9   :  { %v1940_v5 = vmax.f32 %v2638_v61, 0.0  ;;  %v1942_v6 = vmax.f32 %v2640_v62, 0.0 }
 0x1da   :  { %v1943_v9 = vpack.c.bf16 %v1939_v1, %v1939_v1  ;;  %v1945_v10 = vpack.c.bf16 %v1941_v2, %v1941_v2 }
 0x1db   :  { %v1944_v7 = vpack.c.bf16 %v1940_v5, %v1940_v5  ;;  %v1946_v8 = vpack.c.bf16 %v1942_v6, %v1942_v6 }
 0x1dd   :  { %2242 = vmatprep.mubr.bf16.mxu0 %v1944_v7  ;;  %2282 = vmatprep.mubr.bf16.mxu1 %v1946_v8 }
 0x1de   :  { %2243 = vmatmul.mubr.bf16.vlgmr.msra.gmra.mrb[4].mxu0 %v1943_v9  ;;  %2283 = vmatmul.mubr.bf16.vlgmr.msra.gmra.mrb[4].mxu1 %v1945_v10 }
 0x2b1   :  { %v2609_v12 = vpop.f32.mrb[4].mxu0  ;;  %v2631_v13 = vpop.f32.mrb[4].mxu1 }
 0x2b2   :  { %v2610_v16 = vpop.f32.mrb[5].mxu0  ;;  %v2632_v11 = vpop.f32.mrb[5].mxu1 }
 0x2b3   :  { %v2611_v17 = vadd.f32 %v2610_v16, %v2609_v12  ;;  %v2633_v14 = vadd.f32 %v2632_v11, %v2631_v13  ;;  %v2612_v18 = vpop.f32.mrb[6].mxu0  ;;  %v2634_v19 = vpop.f32.mrb[6].mxu1 }
 0x2b4   :  { %v2613_v20 = vpop.f32.mrb[7].mxu0  ;;  %v2635_v21 = vpop.f32.mrb[7].mxu1 }
 0x2b5   :  { %v2245_v22 = vadd.f32 %v2611_v17, %v2560_v15 }
 0x2b7   :  { %v2285_v23 = vadd.f32 %v2633_v14, %v2245_v22 }
 0x2b9   :  { %2291 = vst.msk [vmem:[%s4027_s5] sm:$0xff] %vm2290_vm0, %v2285_v23 }

</bundles_post_ra>
